<compile_context>
chip_gen: v5e
topology: v5e:2x2
jax: 0.10.0
libtpu: 0.0.40
codegen_flags: <defaults>
</compile_context>

<pallas_src>
import jax
import jax.numpy as jnp
from jax.experimental import pallas as pl
from jax.experimental.pallas import tpu as pltpu

NEG_SLOPE = 0.01   # torch.nn.LeakyReLU default
LANE = 128
TM_MAX = 128       # M tile (v5e MXU is 128x128; all M here are <= 128 anyway)
TN = 128           # N (output-channel) tile


def _round_up(x, m):
    return ((x + m - 1) // m) * m


# ---------------------------------------------------------------------------
# Pallas kernel: fused (patches @ W + b) -> LeakyReLU, tiled over (M, N)
# ---------------------------------------------------------------------------
def _matmul_bias_lrelu_kernel(x_ref, w_ref, b_ref, o_ref):
    acc = jnp.dot(x_ref[...], w_ref[...], preferred_element_type=jnp.float32)
    acc = acc + b_ref[...]                                   # (1, TN) broadcast
    o_ref[...] = jnp.where(acc >= 0.0, acc, NEG_SLOPE * acc).astype(o_ref.dtype)


def fused_matmul_bias_lrelu(patches, w, b):
    """patches: (M, K) bf16, w: (K, Np) bf16 with Np % 128 == 0, b: (1, Np) f32.
    Returns (M, Np) f32 = LeakyReLU(patches @ w + b)."""
    M, K = patches.shape
    Np = w.shape[1]
    assert Np % TN == 0, Np

    if M <= TM_MAX:                 # tiny layers: one M block == full dim, no pad
        tm, m_pad = M, M
    else:
        tm = TM_MAX
        m_pad = _round_up(M, tm)
        if m_pad != M:              # never hit for this network's shapes
            patches = jnp.pad(patches, ((0, m_pad - M), (0, 0)))

    grid = (m_pad // tm, Np // TN)
    out = pl.pallas_call(
        _matmul_bias_lrelu_kernel,
        out_shape=jax.ShapeDtypeStruct((m_pad, Np), jnp.float32),
        grid=grid,
        in_specs=[
            pl.BlockSpec((tm, K), lambda i, j: (i, 0)),
            pl.BlockSpec((K, TN), lambda i, j: (0, j)),
            pl.BlockSpec((1, TN), lambda i, j: (0, j)),
        ],
        out_specs=pl.BlockSpec((tm, TN), lambda i, j: (i, j)),
        compiler_params=pltpu.CompilerParams(
            dimension_semantics=("parallel", "parallel"),
            vmem_limit_bytes=32 * 1024 * 1024),
    )(patches, w, b)
    if m_pad != M:
        out = out[:M]
    return out


# ---------------------------------------------------------------------------
# Glue (plain JAX): patch construction in bf16, channel order = (kh, kw, cin)
# ---------------------------------------------------------------------------
def _im2col_s2(xp, ho, wo, k=3):
    """Stride-2 im2col of a padded NHWC tensor -> (N, ho, wo, 9*Cin)."""
    slices = []
    for kh in range(k):
        for kw in range(k):
            slices.append(xp[:, kh:kh + 2 * ho:2, kw:kw + 2 * wo:2, :])
    return jnp.concatenate(slices, axis=-1)


def down_block(x, w_flat, b_p, cout):
    """Conv2d(k=3, s=2, p=1) + LeakyReLU.   x: NHWC f32, w_flat: (9*Cin_p, Np) bf16."""
    nb, h, wdt, cin = x.shape
    ho, wo = (h + 1) // 2, (wdt + 1) // 2
    x = x.astype(jnp.bfloat16)
    cin_w = w_flat.shape[0] // 9
    if cin_w > cin:                              # down1: pad Cin 3 -> 8
        x = jnp.pad(x, ((0, 0), (0, 0), (0, 0), (0, cin_w - cin)))
        cin = cin_w
    xp = jnp.pad(x, ((0, 0), (1, 1), (1, 1), (0, 0)))
    patches = _im2col_s2(xp, ho, wo).reshape(-1, 9 * cin)
    out = fused_matmul_bias_lrelu(patches, w_flat, b_p)       # (nb*ho*wo, Np) f32
    return out[:, :cout].reshape(nb, ho, wo, cout)


def up_block(x, w_big, b_big, cout):
    """ConvTranspose2d(k=3, s=2, p=1, output_padding=1) + LeakyReLU via the
    4-phase (output-parity) decomposition packed into a single GEMM.
    x: NHWC f32, w_big: (4*Cin, Np) bf16 with Np = round_up(4*Cout, 128)."""
    nb, h, wdt, cin = x.shape
    x = x.astype(jnp.bfloat16)
    xp = jnp.pad(x, ((0, 0), (0, 1), (0, 1), (0, 0)))         # bottom/right zero
    A = x                                                     # x[i,   j  ]
    B = xp[:, :h, 1:wdt + 1, :]                               # x[i,   j+1]
    C = xp[:, 1:h + 1, :wdt, :]                               # x[i+1, j  ]
    D = xp[:, 1:h + 1, 1:wdt + 1, :]                          # x[i+1, j+1]
    patches = jnp.concatenate([A, B, C, D], axis=-1).reshape(-1, 4 * cin)
    out = fused_matmul_bias_lrelu(patches, w_big, b_big)      # (nb*h*w, Np) f32
    # columns: [phase(0,0) | phase(0,1) | phase(1,0) | phase(1,1)] x Cout
    out = out[:, :4 * cout].reshape(nb, h, wdt, 2, 2, cout)
    out = jnp.transpose(out, (0, 1, 3, 2, 4, 5)).reshape(nb, 2 * h, 2 * wdt, cout)
    return out


# ---------------------------------------------------------------------------
# One-time weight preparation (flatten / flip / phase-pack / pad / bf16)
# ---------------------------------------------------------------------------
def _prep_down(w, b, cin_pad=0):
    """w: (Cout, Cin, 3, 3), b: (Cout,) -> (9*Cin_p, Np) bf16, (1, Np) f32."""
    cout, cin = w.shape[0], w.shape[1]
    cin_p = max(cin, cin_pad)
    if cin_p > cin:
        w = jnp.pad(w, ((0, 0), (0, cin_p - cin), (0, 0), (0, 0)))
    w_flat = jnp.transpose(w, (2, 3, 1, 0)).reshape(9 * cin_p, cout)  # (kh,kw,cin)
    np_ = _round_up(cout, LANE)
    w_flat = jnp.pad(w_flat, ((0, 0), (0, np_ - cout))).astype(jnp.bfloat16)
    b_p = jnp.pad(b, (0, np_ - cout)).reshape(1, np_).astype(jnp.float32)
    return w_flat, b_p


def _prep_up(w, b):
    """w: (Cin, Cout, 3, 3) PyTorch ConvTranspose layout.
    Build the 4-phase packed equivalent-conv weight (4*Cin, round_up(4*Cout,128)).

    With wf[kh,kw] = w[:, :, 2-kh, 2-kw] (spatially flipped taps, (Cin, Cout)):
      out[2i  , 2j  ] = A.wf[1,1]
      out[2i  , 2j+1] = A.wf[1,0] + B.wf[1,2]
      out[2i+1, 2j  ] = A.wf[0,1] + C.wf[2,1]
      out[2i+1, 2j+1] = A.wf[0,0] + B.wf[0,2] + C.wf[2,0] + D.wf[2,2]
    where A=x[i,j], B=x[i,j+1], C=x[i+1,j], D=x[i+1,j+1] (zero past the edge)."""
    cin, cout = w.shape[0], w.shape[1]
    wf = jnp.transpose(w[:, :, ::-1, ::-1], (2, 3, 0, 1))     # (kh, kw, Cin, Cout)
    z = jnp.zeros((cin, cout), w.dtype)
    rowA = jnp.concatenate([wf[1, 1], wf[1, 0], wf[0, 1], wf[0, 0]], axis=1)
    rowB = jnp.concatenate([z,        wf[1, 2], z,        wf[0, 2]], axis=1)
    rowC = jnp.concatenate([z,        z,        wf[2, 1], wf[2, 0]], axis=1)
    rowD = jnp.concatenate([z,        z,        z,        wf[2, 2]], axis=1)
    w_big = jnp.concatenate([rowA, rowB, rowC, rowD], axis=0)  # (4*Cin, 4*Cout)
    b_big = jnp.tile(b, 4)                                     # same bias per phase
    np_ = _round_up(4 * cout, LANE)
    w_big = jnp.pad(w_big, ((0, 0), (0, np_ - 4 * cout))).astype(jnp.bfloat16)
    b_big = jnp.pad(b_big, (0, np_ - 4 * cout)).reshape(1, np_).astype(jnp.float32)
    return w_big, b_big


def init_params(key):
    ch = [3, 64, 128, 256, 512]

    def conv_init(k, cout, cin):
        kw_, kb_ = jax.random.split(k)
        bound = 1.0 / jnp.sqrt(cin * 9.0)
        w = jax.random.uniform(kw_, (cout, cin, 3, 3), jnp.float32, -bound, bound)
        b = jax.random.uniform(kb_, (cout,), jnp.float32, -bound, bound)
        return w, b

    def convT_init(k, cin, cout):
        kw_, kb_ = jax.random.split(k)
        bound = 1.0 / jnp.sqrt(cin * 9.0)
        w = jax.random.uniform(kw_, (cin, cout, 3, 3), jnp.float32, -bound, bound)
        b = jax.random.uniform(kb_, (cout,), jnp.float32, -bound, bound)
        return w, b

    keys = jax.random.split(key, 8)
    return {
        "down1": _prep_down(*conv_init(keys[0], ch[1], ch[0]), cin_pad=8),
        "down2": _prep_down(*conv_init(keys[1], ch[2], ch[1])),
        "down3": _prep_down(*conv_init(keys[2], ch[3], ch[2])),
        "down4": _prep_down(*conv_init(keys[3], ch[4], ch[3])),
        # channel_list_reverse = [512, 256, 128, 64, 3]
        "up1": _prep_up(*convT_init(keys[4], 512, 256)),
        "up2": _prep_up(*convT_init(keys[5], 512, 128)),
        "up3": _prep_up(*convT_init(keys[6], 256, 64)),
        "up4": _prep_up(*convT_init(keys[7], 128, 3)),
    }


@jax.jit
def u_net_forward(x_nhwc, params):
    x1 = down_block(x_nhwc, *params["down1"], cout=64)    # (N, H/2,  W/2,   64)
    x2 = down_block(x1, *params["down2"], cout=128)       # (N, H/4,  W/4,  128)
    x3 = down_block(x2, *params["down3"], cout=256)       # (N, H/8,  W/8,  256)
    x4 = down_block(x3, *params["down4"], cout=512)       # (N, H/16, W/16, 512)
    x3_ = up_block(x4, *params["up1"], cout=256)          # (N, H/8,  W/8,  256)
    x2_ = up_block(jnp.concatenate([x3_, x3], axis=-1), *params["up2"], cout=128)
    x1_ = up_block(jnp.concatenate([x2_, x2], axis=-1), *params["up3"], cout=64)
    x0_ = up_block(jnp.concatenate([x1_, x1], axis=-1), *params["up4"], cout=3)
    return x0_


if __name__ == "__main__":
    key = jax.random.PRNGKey(0)
    k_x, k_p = jax.random.split(key)

    # PyTorch-style NCHW input (2, 3, 16, 16); transpose to NHWC for the kernels.
    x_nchw = jax.random.normal(k_x, (2, 3, 16, 16), jnp.float32)
    x_nhwc = jnp.transpose(x_nchw, (0, 2, 3, 1))

    params = init_params(k_p)

    out_nhwc = u_net_forward(x_nhwc, params)
    out_nchw = jnp.transpose(out_nhwc, (0, 3, 1, 2))  # back to NCHW like torch
    jax.block_until_ready(out_nchw)

    assert out_nchw.shape == (2, 3, 16, 16), out_nchw.shape
    assert bool(jnp.all(jnp.isfinite(out_nchw)))
    print("KERNEL_OK")
</pallas_src>

<mosaic_0001>
module attributes {stable_mosaic.version = 11 : i64} {
  func.func @_matmul_bias_lrelu_kernel(%arg0: i32, %arg1: i32, %arg2: memref<128x72xbf16, #tpu.memory_space<vmem>>, %arg3: memref<72x128xbf16, #tpu.memory_space<vmem>>, %arg4: memref<1x128xf32, #tpu.memory_space<vmem>>, %arg5: memref<128x128xf32, #tpu.memory_space<vmem>>) attributes {dimension_semantics = [#tpu.dimension_semantics<parallel>, #tpu.dimension_semantics<parallel>], iteration_bounds = array<i64: 1, 1>, scalar_prefetch = 0 : i64, scratch_operands = 0 : i64, tpu.core_type = #tpu.core_type<tc>, window_params = [{transform_indices = @transform_0, window_bounds = array<i64: 128, 72>}, {transform_indices = @transform_1, window_bounds = array<i64: 72, 128>}, {transform_indices = @transform_2, window_bounds = array<i64: 1, 128>}, {transform_indices = @transform_3, window_bounds = array<i64: 128, 128>}]} {
    %c0 = arith.constant 0 : index
    %c0_0 = arith.constant 0 : index
    %0 = vector.load %arg2[%c0, %c0_0] : memref<128x72xbf16, #tpu.memory_space<vmem>>, vector<128x72xbf16>
    %c0_1 = arith.constant 0 : index
    %c0_2 = arith.constant 0 : index
    %1 = vector.load %arg3[%c0_1, %c0_2] : memref<72x128xbf16, #tpu.memory_space<vmem>>, vector<72x128xbf16>
    %cst = arith.constant dense<0.000000e+00> : vector<128x128xf32>
    %2 = tpu.matmul %0, %1, %cst {dimension_numbers = #tpu.dot_dimension_numbers<[1], [0], [0], [1], [0, 0, 1, 1], [], []>} : vector<128x72xbf16>, vector<72x128xbf16>, vector<128x128xf32> -> vector<128x128xf32>
    %c0_3 = arith.constant 0 : index
    %c0_4 = arith.constant 0 : index
    %3 = vector.load %arg4[%c0_3, %c0_4] : memref<1x128xf32, #tpu.memory_space<vmem>>, vector<1x128xf32>
    %4 = vector.broadcast %3 : vector<1x128xf32> to vector<128x128xf32>
    %5 = arith.addf %2, %4 : vector<128x128xf32>
    %cst_5 = arith.constant 0.000000e+00 : f32
    %6 = vector.broadcast %cst_5 : f32 to vector<128x128xf32>
    %7 = arith.cmpf oge, %5, %6 : vector<128x128xf32>
    %cst_6 = arith.constant 0.00999999977 : f32
    %8 = vector.broadcast %cst_6 : f32 to vector<128x128xf32>
    %9 = arith.mulf %8, %5 : vector<128x128xf32>
    %10 = arith.select %7, %5, %9 : vector<128x128xi1>, vector<128x128xf32>
    %c0_7 = arith.constant 0 : index
    %c0_8 = arith.constant 0 : index
    %11 = vector.load %arg5[%c0_7, %c0_8] : memref<128x128xf32, #tpu.memory_space<vmem>>, vector<128x128xf32>
    tpu.vector_store %arg5[%c0_7, %c0_8], %10 {strides = array<i32>} : memref<128x128xf32, #tpu.memory_space<vmem>>, vector<128x128xf32>,
    return
  }
  func.func @transform_0(%arg0: i32, %arg1: i32) -> (i32, i32) {
    %c0_i32 = arith.constant 0 : i32
    %c0_i32_0 = arith.constant 0 : i32
    return %arg0, %c0_i32 : i32, i32
  }
  func.func @transform_1(%arg0: i32, %arg1: i32) -> (i32, i32) {
    %c0_i32 = arith.constant 0 : i32
    %c0_i32_0 = arith.constant 0 : i32
    return %c0_i32, %arg1 : i32, i32
  }
  func.func @transform_2(%arg0: i32, %arg1: i32) -> (i32, i32) {
    %c0_i32 = arith.constant 0 : i32
    %c0_i32_0 = arith.constant 0 : i32
    return %c0_i32, %arg1 : i32, i32
  }
  func.func @transform_3(%arg0: i32, %arg1: i32) -> (i32, i32) {
    %c0_i32 = arith.constant 0 : i32
    return %arg0, %arg1 : i32, i32
  }
}

module attributes {stable_mosaic.version = 11 : i64} {
  func.func @_matmul_bias_lrelu_kernel(%arg0: i32, %arg1: i32, %arg2: memref<32x576xbf16, #tpu.memory_space<vmem>>, %arg3: memref<576x128xbf16, #tpu.memory_space<vmem>>, %arg4: memref<1x128xf32, #tpu.memory_space<vmem>>, %arg5: memref<32x128xf32, #tpu.memory_space<vmem>>) attributes {dimension_semantics = [#tpu.dimension_semantics<parallel>, #tpu.dimension_semantics<parallel>], iteration_bounds = array<i64: 1, 1>, scalar_prefetch = 0 : i64, scratch_operands = 0 : i64, tpu.core_type = #tpu.core_type<tc>, window_params = [{transform_indices = @transform_0, window_bounds = array<i64: 32, 576>}, {transform_indices = @transform_1, window_bounds = array<i64: 576, 128>}, {transform_indices = @transform_2, window_bounds = array<i64: 1, 128>}, {transform_indices = @transform_3, window_bounds = array<i64: 32, 128>}]} {
    %c0 = arith.constant 0 : index
    %c0_0 = arith.constant 0 : index
    %0 = vector.load %arg2[%c0, %c0_0] : memref<32x576xbf16, #tpu.memory_space<vmem>>, vector<32x576xbf16>
    %c0_1 = arith.constant 0 : index
    %c0_2 = arith.constant 0 : index
    %1 = vector.load %arg3[%c0_1, %c0_2] : memref<576x128xbf16, #tpu.memory_space<vmem>>, vector<576x128xbf16>
    %cst = arith.constant dense<0.000000e+00> : vector<32x128xf32>
    %2 = tpu.matmul %0, %1, %cst {dimension_numbers = #tpu.dot_dimension_numbers<[1], [0], [0], [1], [0, 0, 1, 1], [], []>} : vector<32x576xbf16>, vector<576x128xbf16>, vector<32x128xf32> -> vector<32x128xf32>
    %c0_3 = arith.constant 0 : index
    %c0_4 = arith.constant 0 : index
    %3 = vector.load %arg4[%c0_3, %c0_4] : memref<1x128xf32, #tpu.memory_space<vmem>>, vector<1x128xf32>
    %4 = vector.broadcast %3 : vector<1x128xf32> to vector<32x128xf32>
    %5 = arith.addf %2, %4 : vector<32x128xf32>
    %cst_5 = arith.constant 0.000000e+00 : f32
    %6 = vector.broadcast %cst_5 : f32 to vector<32x128xf32>
    %7 = arith.cmpf oge, %5, %6 : vector<32x128xf32>
    %cst_6 = arith.constant 0.00999999977 : f32
    %8 = vector.broadcast %cst_6 : f32 to vector<32x128xf32>
    %9 = arith.mulf %8, %5 : vector<32x128xf32>
    %10 = arith.select %7, %5, %9 : vector<32x128xi1>, vector<32x128xf32>
    %c0_7 = arith.constant 0 : index
    %c0_8 = arith.constant 0 : index
    %11 = vector.load %arg5[%c0_7, %c0_8] : memref<32x128xf32, #tpu.memory_space<vmem>>, vector<32x128xf32>
    tpu.vector_store %arg5[%c0_7, %c0_8], %10 {strides = array<i32>} : memref<32x128xf32, #tpu.memory_space<vmem>>, vector<32x128xf32>,
    return
  }
  func.func @transform_0(%arg0: i32, %arg1: i32) -> (i32, i32) {
    %c0_i32 = arith.constant 0 : i32
    %c0_i32_0 = arith.constant 0 : i32
    return %arg0, %c0_i32 : i32, i32
  }
  func.func @transform_1(%arg0: i32, %arg1: i32) -> (i32, i32) {
    %c0_i32 = arith.constant 0 : i32
    %c0_i32_0 = arith.constant 0 : i32
    return %c0_i32, %arg1 : i32, i32
  }
  func.func @transform_2(%arg0: i32, %arg1: i32) -> (i32, i32) {
    %c0_i32 = arith.constant 0 : i32
    %c0_i32_0 = arith.constant 0 : i32
    return %c0_i32, %arg1 : i32, i32
  }
  func.func @transform_3(%arg0: i32, %arg1: i32) -> (i32, i32) {
    %c0_i32 = arith.constant 0 : i32
    return %arg0, %arg1 : i32, i32
  }
}

module attributes {stable_mosaic.version = 11 : i64} {
  func.func @_matmul_bias_lrelu_kernel(%arg0: i32, %arg1: i32, %arg2: memref<8x1152xbf16, #tpu.memory_space<vmem>>, %arg3: memref<1152x128xbf16, #tpu.memory_space<vmem>>, %arg4: memref<1x128xf32, #tpu.memory_space<vmem>>, %arg5: memref<8x128xf32, #tpu.memory_space<vmem>>) attributes {dimension_semantics = [#tpu.dimension_semantics<parallel>, #tpu.dimension_semantics<parallel>], iteration_bounds = array<i64: 1, 2>, scalar_prefetch = 0 : i64, scratch_operands = 0 : i64, tpu.core_type = #tpu.core_type<tc>, window_params = [{transform_indices = @transform_0, window_bounds = array<i64: 8, 1152>}, {transform_indices = @transform_1, window_bounds = array<i64: 1152, 128>}, {transform_indices = @transform_2, window_bounds = array<i64: 1, 128>}, {transform_indices = @transform_3, window_bounds = array<i64: 8, 128>}]} {
    %c0 = arith.constant 0 : index
    %c0_0 = arith.constant 0 : index
    %0 = vector.load %arg2[%c0, %c0_0] : memref<8x1152xbf16, #tpu.memory_space<vmem>>, vector<8x1152xbf16>
    %c0_1 = arith.constant 0 : index
    %c0_2 = arith.constant 0 : index
    %1 = vector.load %arg3[%c0_1, %c0_2] : memref<1152x128xbf16, #tpu.memory_space<vmem>>, vector<1152x128xbf16>
    %cst = arith.constant dense<0.000000e+00> : vector<8x128xf32>
    %2 = tpu.matmul %0, %1, %cst {dimension_numbers = #tpu.dot_dimension_numbers<[1], [0], [0], [1], [0, 0, 1, 1], [], []>} : vector<8x1152xbf16>, vector<1152x128xbf16>, vector<8x128xf32> -> vector<8x128xf32>
    %c0_3 = arith.constant 0 : index
    %c0_4 = arith.constant 0 : index
    %3 = vector.load %arg4[%c0_3, %c0_4] : memref<1x128xf32, #tpu.memory_space<vmem>>, vector<1x128xf32>
    %4 = vector.broadcast %3 : vector<1x128xf32> to vector<8x128xf32>
    %5 = arith.addf %2, %4 : vector<8x128xf32>
    %cst_5 = arith.constant 0.000000e+00 : f32
    %6 = vector.broadcast %cst_5 : f32 to vector<8x128xf32>
    %7 = arith.cmpf oge, %5, %6 : vector<8x128xf32>
    %cst_6 = arith.constant 0.00999999977 : f32
    %8 = vector.broadcast %cst_6 : f32 to vector<8x128xf32>
    %9 = arith.mulf %8, %5 : vector<8x128xf32>
    %10 = arith.select %7, %5, %9 : vector<8x128xi1>, vector<8x128xf32>
    %c0_7 = arith.constant 0 : index
    %c0_8 = arith.constant 0 : index
    %11 = vector.load %arg5[%c0_7, %c0_8] : memref<8x128xf32, #tpu.memory_space<vmem>>, vector<8x128xf32>
    tpu.vector_store %arg5[%c0_7, %c0_8], %10 {strides = array<i32>} : memref<8x128xf32, #tpu.memory_space<vmem>>, vector<8x128xf32>,
    return
  }
  func.func @transform_0(%arg0: i32, %arg1: i32) -> (i32, i32) {
    %c0_i32 = arith.constant 0 : i32
    %c0_i32_0 = arith.constant 0 : i32
    return %arg0, %c0_i32 : i32, i32
  }
  func.func @transform_1(%arg0: i32, %arg1: i32) -> (i32, i32) {
    %c0_i32 = arith.constant 0 : i32
    %c0_i32_0 = arith.constant 0 : i32
    return %c0_i32, %arg1 : i32, i32
  }
  func.func @transform_2(%arg0: i32, %arg1: i32) -> (i32, i32) {
    %c0_i32 = arith.constant 0 : i32
    %c0_i32_0 = arith.constant 0 : i32
    return %c0_i32, %arg1 : i32, i32
  }
  func.func @transform_3(%arg0: i32, %arg1: i32) -> (i32, i32) {
    %c0_i32 = arith.constant 0 : i32
    return %arg0, %arg1 : i32, i32
  }
}

module attributes {stable_mosaic.version = 11 : i64} {
  func.func @_matmul_bias_lrelu_kernel(%arg0: i32, %arg1: i32, %arg2: memref<2x2304xbf16, #tpu.memory_space<vmem>>, %arg3: memref<2304x128xbf16, #tpu.memory_space<vmem>>, %arg4: memref<1x128xf32, #tpu.memory_space<vmem>>, %arg5: memref<2x128xf32, #tpu.memory_space<vmem>>) attributes {dimension_semantics = [#tpu.dimension_semantics<parallel>, #tpu.dimension_semantics<parallel>], iteration_bounds = array<i64: 1, 4>, scalar_prefetch = 0 : i64, scratch_operands = 0 : i64, tpu.core_type = #tpu.core_type<tc>, window_params = [{transform_indices = @transform_0, window_bounds = array<i64: 2, 2304>}, {transform_indices = @transform_1, window_bounds = array<i64: 2304, 128>}, {transform_indices = @transform_2, window_bounds = array<i64: 1, 128>}, {transform_indices = @transform_3, window_bounds = array<i64: 2, 128>}]} {
    %c0 = arith.constant 0 : index
    %c0_0 = arith.constant 0 : index
    %0 = vector.load %arg2[%c0, %c0_0] : memref<2x2304xbf16, #tpu.memory_space<vmem>>, vector<2x2304xbf16>
    %c0_1 = arith.constant 0 : index
    %c0_2 = arith.constant 0 : index
    %1 = vector.load %arg3[%c0_1, %c0_2] : memref<2304x128xbf16, #tpu.memory_space<vmem>>, vector<2304x128xbf16>
    %cst = arith.constant dense<0.000000e+00> : vector<2x128xf32>
    %2 = tpu.matmul %0, %1, %cst {dimension_numbers = #tpu.dot_dimension_numbers<[1], [0], [0], [1], [0, 0, 1, 1], [], []>} : vector<2x2304xbf16>, vector<2304x128xbf16>, vector<2x128xf32> -> vector<2x128xf32>
    %c0_3 = arith.constant 0 : index
    %c0_4 = arith.constant 0 : index
    %3 = vector.load %arg4[%c0_3, %c0_4] : memref<1x128xf32, #tpu.memory_space<vmem>>, vector<1x128xf32>
    %4 = vector.broadcast %3 : vector<1x128xf32> to vector<2x128xf32>
    %5 = arith.addf %2, %4 : vector<2x128xf32>
    %cst_5 = arith.constant 0.000000e+00 : f32
    %6 = vector.broadcast %cst_5 : f32 to vector<2x128xf32>
    %7 = arith.cmpf oge, %5, %6 : vector<2x128xf32>
    %cst_6 = arith.constant 0.00999999977 : f32
    %8 = vector.broadcast %cst_6 : f32 to vector<2x128xf32>
    %9 = arith.mulf %8, %5 : vector<2x128xf32>
    %10 = arith.select %7, %5, %9 : vector<2x128xi1>, vector<2x128xf32>
    %c0_7 = arith.constant 0 : index
    %c0_8 = arith.constant 0 : index
    %11 = vector.load %arg5[%c0_7, %c0_8] : memref<2x128xf32, #tpu.memory_space<vmem>>, vector<2x128xf32>
    tpu.vector_store %arg5[%c0_7, %c0_8], %10 {strides = array<i32>} : memref<2x128xf32, #tpu.memory_space<vmem>>, vector<2x128xf32>,
    return
  }
  func.func @transform_0(%arg0: i32, %arg1: i32) -> (i32, i32) {
    %c0_i32 = arith.constant 0 : i32
    %c0_i32_0 = arith.constant 0 : i32
    return %arg0, %c0_i32 : i32, i32
  }
  func.func @transform_1(%arg0: i32, %arg1: i32) -> (i32, i32) {
    %c0_i32 = arith.constant 0 : i32
    %c0_i32_0 = arith.constant 0 : i32
    return %c0_i32, %arg1 : i32, i32
  }
  func.func @transform_2(%arg0: i32, %arg1: i32) -> (i32, i32) {
    %c0_i32 = arith.constant 0 : i32
    %c0_i32_0 = arith.constant 0 : i32
    return %c0_i32, %arg1 : i32, i32
  }
  func.func @transform_3(%arg0: i32, %arg1: i32) -> (i32, i32) {
    %c0_i32 = arith.constant 0 : i32
    return %arg0, %arg1 : i32, i32
  }
}

module attributes {stable_mosaic.version = 11 : i64} {
  func.func @_matmul_bias_lrelu_kernel(%arg0: i32, %arg1: i32, %arg2: memref<2x2048xbf16, #tpu.memory_space<vmem>>, %arg3: memref<2048x128xbf16, #tpu.memory_space<vmem>>, %arg4: memref<1x128xf32, #tpu.memory_space<vmem>>, %arg5: memref<2x128xf32, #tpu.memory_space<vmem>>) attributes {dimension_semantics = [#tpu.dimension_semantics<parallel>, #tpu.dimension_semantics<parallel>], iteration_bounds = array<i64: 1, 8>, scalar_prefetch = 0 : i64, scratch_operands = 0 : i64, tpu.core_type = #tpu.core_type<tc>, window_params = [{transform_indices = @transform_0, window_bounds = array<i64: 2, 2048>}, {transform_indices = @transform_1, window_bounds = array<i64: 2048, 128>}, {transform_indices = @transform_2, window_bounds = array<i64: 1, 128>}, {transform_indices = @transform_3, window_bounds = array<i64: 2, 128>}]} {
    %c0 = arith.constant 0 : index
    %c0_0 = arith.constant 0 : index
    %0 = vector.load %arg2[%c0, %c0_0] : memref<2x2048xbf16, #tpu.memory_space<vmem>>, vector<2x2048xbf16>
    %c0_1 = arith.constant 0 : index
    %c0_2 = arith.constant 0 : index
    %1 = vector.load %arg3[%c0_1, %c0_2] : memref<2048x128xbf16, #tpu.memory_space<vmem>>, vector<2048x128xbf16>
    %cst = arith.constant dense<0.000000e+00> : vector<2x128xf32>
    %2 = tpu.matmul %0, %1, %cst {dimension_numbers = #tpu.dot_dimension_numbers<[1], [0], [0], [1], [0, 0, 1, 1], [], []>} : vector<2x2048xbf16>, vector<2048x128xbf16>, vector<2x128xf32> -> vector<2x128xf32>
    %c0_3 = arith.constant 0 : index
    %c0_4 = arith.constant 0 : index
    %3 = vector.load %arg4[%c0_3, %c0_4] : memref<1x128xf32, #tpu.memory_space<vmem>>, vector<1x128xf32>
    %4 = vector.broadcast %3 : vector<1x128xf32> to vector<2x128xf32>
    %5 = arith.addf %2, %4 : vector<2x128xf32>
    %cst_5 = arith.constant 0.000000e+00 : f32
    %6 = vector.broadcast %cst_5 : f32 to vector<2x128xf32>
    %7 = arith.cmpf oge, %5, %6 : vector<2x128xf32>
    %cst_6 = arith.constant 0.00999999977 : f32
    %8 = vector.broadcast %cst_6 : f32 to vector<2x128xf32>
    %9 = arith.mulf %8, %5 : vector<2x128xf32>
    %10 = arith.select %7, %5, %9 : vector<2x128xi1>, vector<2x128xf32>
    %c0_7 = arith.constant 0 : index
    %c0_8 = arith.constant 0 : index
    %11 = vector.load %arg5[%c0_7, %c0_8] : memref<2x128xf32, #tpu.memory_space<vmem>>, vector<2x128xf32>
    tpu.vector_store %arg5[%c0_7, %c0_8], %10 {strides = array<i32>} : memref<2x128xf32, #tpu.memory_space<vmem>>, vector<2x128xf32>,
    return
  }
  func.func @transform_0(%arg0: i32, %arg1: i32) -> (i32, i32) {
    %c0_i32 = arith.constant 0 : i32
    %c0_i32_0 = arith.constant 0 : i32
    return %arg0, %c0_i32 : i32, i32
  }
  func.func @transform_1(%arg0: i32, %arg1: i32) -> (i32, i32) {
    %c0_i32 = arith.constant 0 : i32
    %c0_i32_0 = arith.constant 0 : i32
    return %c0_i32, %arg1 : i32, i32
  }
  func.func @transform_2(%arg0: i32, %arg1: i32) -> (i32, i32) {
    %c0_i32 = arith.constant 0 : i32
    %c0_i32_0 = arith.constant 0 : i32
    return %c0_i32, %arg1 : i32, i32
  }
  func.func @transform_3(%arg0: i32, %arg1: i32) -> (i32, i32) {
    %c0_i32 = arith.constant 0 : i32
    return %arg0, %arg1 : i32, i32
  }
}

module attributes {stable_mosaic.version = 11 : i64} {
  func.func @_matmul_bias_lrelu_kernel(%arg0: i32, %arg1: i32, %arg2: memref<8x2048xbf16, #tpu.memory_space<vmem>>, %arg3: memref<2048x128xbf16, #tpu.memory_space<vmem>>, %arg4: memref<1x128xf32, #tpu.memory_space<vmem>>, %arg5: memref<8x128xf32, #tpu.memory_space<vmem>>) attributes {dimension_semantics = [#tpu.dimension_semantics<parallel>, #tpu.dimension_semantics<parallel>], iteration_bounds = array<i64: 1, 4>, scalar_prefetch = 0 : i64, scratch_operands = 0 : i64, tpu.core_type = #tpu.core_type<tc>, window_params = [{transform_indices = @transform_0, window_bounds = array<i64: 8, 2048>}, {transform_indices = @transform_1, window_bounds = array<i64: 2048, 128>}, {transform_indices = @transform_2, window_bounds = array<i64: 1, 128>}, {transform_indices = @transform_3, window_bounds = array<i64: 8, 128>}]} {
    %c0 = arith.constant 0 : index
    %c0_0 = arith.constant 0 : index
    %0 = vector.load %arg2[%c0, %c0_0] : memref<8x2048xbf16, #tpu.memory_space<vmem>>, vector<8x2048xbf16>
    %c0_1 = arith.constant 0 : index
    %c0_2 = arith.constant 0 : index
    %1 = vector.load %arg3[%c0_1, %c0_2] : memref<2048x128xbf16, #tpu.memory_space<vmem>>, vector<2048x128xbf16>
    %cst = arith.constant dense<0.000000e+00> : vector<8x128xf32>
    %2 = tpu.matmul %0, %1, %cst {dimension_numbers = #tpu.dot_dimension_numbers<[1], [0], [0], [1], [0, 0, 1, 1], [], []>} : vector<8x2048xbf16>, vector<2048x128xbf16>, vector<8x128xf32> -> vector<8x128xf32>
    %c0_3 = arith.constant 0 : index
    %c0_4 = arith.constant 0 : index
    %3 = vector.load %arg4[%c0_3, %c0_4] : memref<1x128xf32, #tpu.memory_space<vmem>>, vector<1x128xf32>
    %4 = vector.broadcast %3 : vector<1x128xf32> to vector<8x128xf32>
    %5 = arith.addf %2, %4 : vector<8x128xf32>
    %cst_5 = arith.constant 0.000000e+00 : f32
    %6 = vector.broadcast %cst_5 : f32 to vector<8x128xf32>
    %7 = arith.cmpf oge, %5, %6 : vector<8x128xf32>
    %cst_6 = arith.constant 0.00999999977 : f32
    %8 = vector.broadcast %cst_6 : f32 to vector<8x128xf32>
    %9 = arith.mulf %8, %5 : vector<8x128xf32>
    %10 = arith.select %7, %5, %9 : vector<8x128xi1>, vector<8x128xf32>
    %c0_7 = arith.constant 0 : index
    %c0_8 = arith.constant 0 : index
    %11 = vector.load %arg5[%c0_7, %c0_8] : memref<8x128xf32, #tpu.memory_space<vmem>>, vector<8x128xf32>
    tpu.vector_store %arg5[%c0_7, %c0_8], %10 {strides = array<i32>} : memref<8x128xf32, #tpu.memory_space<vmem>>, vector<8x128xf32>,
    return
  }
  func.func @transform_0(%arg0: i32, %arg1: i32) -> (i32, i32) {
    %c0_i32 = arith.constant 0 : i32
    %c0_i32_0 = arith.constant 0 : i32
    return %arg0, %c0_i32 : i32, i32
  }
  func.func @transform_1(%arg0: i32, %arg1: i32) -> (i32, i32) {
    %c0_i32 = arith.constant 0 : i32
    %c0_i32_0 = arith.constant 0 : i32
    return %c0_i32, %arg1 : i32, i32
  }
  func.func @transform_2(%arg0: i32, %arg1: i32) -> (i32, i32) {
    %c0_i32 = arith.constant 0 : i32
    %c0_i32_0 = arith.constant 0 : i32
    return %c0_i32, %arg1 : i32, i32
  }
  func.func @transform_3(%arg0: i32, %arg1: i32) -> (i32, i32) {
    %c0_i32 = arith.constant 0 : i32
    return %arg0, %arg1 : i32, i32
  }
}

module attributes {stable_mosaic.version = 11 : i64} {
  func.func @_matmul_bias_lrelu_kernel(%arg0: i32, %arg1: i32, %arg2: memref<32x1024xbf16, #tpu.memory_space<vmem>>, %arg3: memref<1024x128xbf16, #tpu.memory_space<vmem>>, %arg4: memref<1x128xf32, #tpu.memory_space<vmem>>, %arg5: memref<32x128xf32, #tpu.memory_space<vmem>>) attributes {dimension_semantics = [#tpu.dimension_semantics<parallel>, #tpu.dimension_semantics<parallel>], iteration_bounds = array<i64: 1, 2>, scalar_prefetch = 0 : i64, scratch_operands = 0 : i64, tpu.core_type = #tpu.core_type<tc>, window_params = [{transform_indices = @transform_0, window_bounds = array<i64: 32, 1024>}, {transform_indices = @transform_1, window_bounds = array<i64: 1024, 128>}, {transform_indices = @transform_2, window_bounds = array<i64: 1, 128>}, {transform_indices = @transform_3, window_bounds = array<i64: 32, 128>}]} {
    %c0 = arith.constant 0 : index
    %c0_0 = arith.constant 0 : index
    %0 = vector.load %arg2[%c0, %c0_0] : memref<32x1024xbf16, #tpu.memory_space<vmem>>, vector<32x1024xbf16>
    %c0_1 = arith.constant 0 : index
    %c0_2 = arith.constant 0 : index
    %1 = vector.load %arg3[%c0_1, %c0_2] : memref<1024x128xbf16, #tpu.memory_space<vmem>>, vector<1024x128xbf16>
    %cst = arith.constant dense<0.000000e+00> : vector<32x128xf32>
    %2 = tpu.matmul %0, %1, %cst {dimension_numbers = #tpu.dot_dimension_numbers<[1], [0], [0], [1], [0, 0, 1, 1], [], []>} : vector<32x1024xbf16>, vector<1024x128xbf16>, vector<32x128xf32> -> vector<32x128xf32>
    %c0_3 = arith.constant 0 : index
    %c0_4 = arith.constant 0 : index
    %3 = vector.load %arg4[%c0_3, %c0_4] : memref<1x128xf32, #tpu.memory_space<vmem>>, vector<1x128xf32>
    %4 = vector.broadcast %3 : vector<1x128xf32> to vector<32x128xf32>
    %5 = arith.addf %2, %4 : vector<32x128xf32>
    %cst_5 = arith.constant 0.000000e+00 : f32
    %6 = vector.broadcast %cst_5 : f32 to vector<32x128xf32>
    %7 = arith.cmpf oge, %5, %6 : vector<32x128xf32>
    %cst_6 = arith.constant 0.00999999977 : f32
    %8 = vector.broadcast %cst_6 : f32 to vector<32x128xf32>
    %9 = arith.mulf %8, %5 : vector<32x128xf32>
    %10 = arith.select %7, %5, %9 : vector<32x128xi1>, vector<32x128xf32>
    %c0_7 = arith.constant 0 : index
    %c0_8 = arith.constant 0 : index
    %11 = vector.load %arg5[%c0_7, %c0_8] : memref<32x128xf32, #tpu.memory_space<vmem>>, vector<32x128xf32>
    tpu.vector_store %arg5[%c0_7, %c0_8], %10 {strides = array<i32>} : memref<32x128xf32, #tpu.memory_space<vmem>>, vector<32x128xf32>,
    return
  }
  func.func @transform_0(%arg0: i32, %arg1: i32) -> (i32, i32) {
    %c0_i32 = arith.constant 0 : i32
    %c0_i32_0 = arith.constant 0 : i32
    return %arg0, %c0_i32 : i32, i32
  }
  func.func @transform_1(%arg0: i32, %arg1: i32) -> (i32, i32) {
    %c0_i32 = arith.constant 0 : i32
    %c0_i32_0 = arith.constant 0 : i32
    return %c0_i32, %arg1 : i32, i32
  }
  func.func @transform_2(%arg0: i32, %arg1: i32) -> (i32, i32) {
    %c0_i32 = arith.constant 0 : i32
    %c0_i32_0 = arith.constant 0 : i32
    return %c0_i32, %arg1 : i32, i32
  }
  func.func @transform_3(%arg0: i32, %arg1: i32) -> (i32, i32) {
    %c0_i32 = arith.constant 0 : i32
    return %arg0, %arg1 : i32, i32
  }
}

module attributes {stable_mosaic.version = 11 : i64} {
  func.func @_matmul_bias_lrelu_kernel(%arg0: i32, %arg1: i32, %arg2: memref<128x512xbf16, #tpu.memory_space<vmem>>, %arg3: memref<512x128xbf16, #tpu.memory_space<vmem>>, %arg4: memref<1x128xf32, #tpu.memory_space<vmem>>, %arg5: memref<128x128xf32, #tpu.memory_space<vmem>>) attributes {dimension_semantics = [#tpu.dimension_semantics<parallel>, #tpu.dimension_semantics<parallel>], iteration_bounds = array<i64: 1, 1>, scalar_prefetch = 0 : i64, scratch_operands = 0 : i64, tpu.core_type = #tpu.core_type<tc>, window_params = [{transform_indices = @transform_0, window_bounds = array<i64: 128, 512>}, {transform_indices = @transform_1, window_bounds = array<i64: 512, 128>}, {transform_indices = @transform_2, window_bounds = array<i64: 1, 128>}, {transform_indices = @transform_3, window_bounds = array<i64: 128, 128>}]} {
    %c0 = arith.constant 0 : index
    %c0_0 = arith.constant 0 : index
    %0 = vector.load %arg2[%c0, %c0_0] : memref<128x512xbf16, #tpu.memory_space<vmem>>, vector<128x512xbf16>
    %c0_1 = arith.constant 0 : index
    %c0_2 = arith.constant 0 : index
    %1 = vector.load %arg3[%c0_1, %c0_2] : memref<512x128xbf16, #tpu.memory_space<vmem>>, vector<512x128xbf16>
    %cst = arith.constant dense<0.000000e+00> : vector<128x128xf32>
    %2 = tpu.matmul %0, %1, %cst {dimension_numbers = #tpu.dot_dimension_numbers<[1], [0], [0], [1], [0, 0, 1, 1], [], []>} : vector<128x512xbf16>, vector<512x128xbf16>, vector<128x128xf32> -> vector<128x128xf32>
    %c0_3 = arith.constant 0 : index
    %c0_4 = arith.constant 0 : index
    %3 = vector.load %arg4[%c0_3, %c0_4] : memref<1x128xf32, #tpu.memory_space<vmem>>, vector<1x128xf32>
    %4 = vector.broadcast %3 : vector<1x128xf32> to vector<128x128xf32>
    %5 = arith.addf %2, %4 : vector<128x128xf32>
    %cst_5 = arith.constant 0.000000e+00 : f32
    %6 = vector.broadcast %cst_5 : f32 to vector<128x128xf32>
    %7 = arith.cmpf oge, %5, %6 : vector<128x128xf32>
    %cst_6 = arith.constant 0.00999999977 : f32
    %8 = vector.broadcast %cst_6 : f32 to vector<128x128xf32>
    %9 = arith.mulf %8, %5 : vector<128x128xf32>
    %10 = arith.select %7, %5, %9 : vector<128x128xi1>, vector<128x128xf32>
    %c0_7 = arith.constant 0 : index
    %c0_8 = arith.constant 0 : index
    %11 = vector.load %arg5[%c0_7, %c0_8] : memref<128x128xf32, #tpu.memory_space<vmem>>, vector<128x128xf32>
    tpu.vector_store %arg5[%c0_7, %c0_8], %10 {strides = array<i32>} : memref<128x128xf32, #tpu.memory_space<vmem>>, vector<128x128xf32>,
    return
  }
  func.func @transform_0(%arg0: i32, %arg1: i32) -> (i32, i32) {
    %c0_i32 = arith.constant 0 : i32
    %c0_i32_0 = arith.constant 0 : i32
    return %arg0, %c0_i32 : i32, i32
  }
  func.func @transform_1(%arg0: i32, %arg1: i32) -> (i32, i32) {
    %c0_i32 = arith.constant 0 : i32
    %c0_i32_0 = arith.constant 0 : i32
    return %c0_i32, %arg1 : i32, i32
  }
  func.func @transform_2(%arg0: i32, %arg1: i32) -> (i32, i32) {
    %c0_i32 = arith.constant 0 : i32
    %c0_i32_0 = arith.constant 0 : i32
    return %c0_i32, %arg1 : i32, i32
  }
  func.func @transform_3(%arg0: i32, %arg1: i32) -> (i32, i32) {
    %c0_i32 = arith.constant 0 : i32
    return %arg0, %arg1 : i32, i32
  }
}

</mosaic_0001>

<bundles_post_ra>
// kernel: u_net_forward.8
= control target key start
LH: loop header
LB: loop body
LE: loop exit
PB: predicated region body
PF: predicated region fallthrough
CT: control target
= control target key end

     0   :  { %8 = vsyncpa [#allocation3], 0  ;;  %s557_s0 = inlined_call_operand.vmem [shape: bf16[128,72], index: 0, kind: input, shape index: {}]   ;;  %s558_s1 = inlined_call_operand.hbm [shape: bf16[72,128], index: 1, kind: input, shape index: {}]   ;;  %s559_s2 = inlined_call_operand.hbm [shape: f32[1,128], index: 2, kind: input, shape index: {}]   ;;  %s560_s3 = inlined_call_operand.vmem [shape: f32[128,128], index: 3, kind: output, shape index: {}]  }
   0x1   :  { %s16_s14 = sshll.u32 %s558_s1, 4  ;;  %s17_s14 = int_to_ptr.hbm [resolvable:$true] %s16_s14 }
   0x2   :  { %9 = vsyncpa [#allocation5], 0  ;;  %s429_s15 = smov [#allocation2]   ;;  %s30_s19 = sshll.u32 %s559_s2, 4  ;;  %s31_s19 = int_to_ptr.hbm [resolvable:$true] %s30_s19 }
   0x3   :  { %s18_s16 = sshll.u32 %s429_s15, 4  ;;  %s430_s20 = smov 64   ;;  %s19_s16 = int_to_ptr.vmem [resolvable:$true] %s18_s16 }
   0x4   :  { %s431_s21 = smov 4   ;;  %s432_s22 = smov [#allocation4]  }
   0x5   :  { %24 = dma.hbm_to_vmem [thread:$0]  %s17_s14, 576, %s19_s16, [#allocation3], %s430_s20, %s430_s20, %s431_s21  }
   0x6   :  { %s32_s23 = sshll.u32 %s432_s22, 4  ;;  %s33_s23 = int_to_ptr.vmem [resolvable:$true] %s32_s23 }
   0x7   :  { %35 = dma.hbm_to_vmem [thread:$0]  %s31_s19, 16, %s33_s23, [#allocation5]  }
   0x8   :  { %425 = dma.done.wait [#allocation3], 576  }
   0x9   :  { %426 = vsyncadd [#allocation3], 4294966720 }
   0xa   :  { %427 = dma.done.wait [#allocation5], 16  }
   0xb   :  { %428 = vsyncadd [#allocation5], 4294967280  ;;  %v69_v0 = vld [vmem:[#allocation2 + $0x20] sm:$0xf]  ;;  %vm166_vm0 = vcmask 1043456   ;;  %v356_v4 = vld [vmem:[#allocation2 + $0x18] sm:$0xff] }
   0xc   :  { %v131_v1 = vunpack.c.l.b16 %v69_v0  ;;  %v355_v5 = vld [vmem:[#allocation2 + $0x10] sm:$0xff]  ;;  %v354_v6 = vld [vmem:[#allocation2 + $0x8] sm:$0xff]  ;;  %v353_v7 = vld [vmem:[#allocation2] sm:$0xff]  ;;  %vm141_vm1 = vcmask 588800  }
   0xd   :  { %v345_v8 = vld [vmem:[%s557_s0] sm:$0xff]  ;;  %v347_v9 = vld [vmem:[%s557_s0 + $0x10] sm:$0xff]  ;;  %v346_v12 = vld [vmem:[%s557_s0 + $0x8] sm:$0xff] }
   0xe   :  { %v136_v2 = vpack.c.b16 %v131_v1, %v131_v1  ;;  %v349_v10 = vld [vmem:[%s557_s0 + $0x20] sm:$0xff]  ;;  %v351_v11 = vld [vmem:[%s557_s0 + $0x30] sm:$0xff]  ;;  %v348_v13 = vld [vmem:[%s557_s0 + $0x18] sm:$0xff] }
   0xf   :  { %v350_v14 = vld [vmem:[%s557_s0 + $0x28] sm:$0xff]  ;;  %v352_v15 = vld [vmem:[%s557_s0 + $0x38] sm:$0xff]  ;;  %v491_v16 = vld [vmem:[#allocation4] ss:$0 sm:$0xff] }
  0x10   :  { %v168_v3 = vsel %vm166_vm0, %v136_v2, 0 }
  0x11   :  { %173 = vmatpush.bf16.msra.mxu0 %v168_v3  ;;  %357 = vmatpush.bf16.msra.mxu1 %v168_v3 }
  0x12   :  { %358 = vmatpush.bf16.msra.mxu2 %v168_v3  ;;  %359 = vmatpush.bf16.msra.mxu3 %v168_v3 }
  0x15   :  { %174 = vmatpush.bf16.msra.mxu0 %v356_v4  ;;  %360 = vmatpush.bf16.msra.mxu1 %v356_v4 }
  0x16   :  { %361 = vmatpush.bf16.msra.mxu2 %v356_v4  ;;  %362 = vmatpush.bf16.msra.mxu3 %v356_v4 }
  0x19   :  { %175 = vmatpush.bf16.msra.mxu0 %v355_v5  ;;  %363 = vmatpush.bf16.msra.mxu1 %v355_v5 }
  0x1a   :  { %364 = vmatpush.bf16.msra.mxu2 %v355_v5  ;;  %365 = vmatpush.bf16.msra.mxu3 %v355_v5 }
  0x1d   :  { %176 = vmatpush.bf16.msra.mxu0 %v354_v6  ;;  %366 = vmatpush.bf16.msra.mxu1 %v354_v6 }
  0x1e   :  { %367 = vmatpush.bf16.msra.mxu2 %v354_v6  ;;  %368 = vmatpush.bf16.msra.mxu3 %v354_v6 }
  0x21   :  { %177 = vmatpush.bf16.msra.mxu0 %v353_v7  ;;  %369 = vmatpush.bf16.msra.mxu1 %v353_v7 }
  0x22   :  { %370 = vmatpush.bf16.msra.mxu2 %v353_v7  ;;  %371 = vmatpush.bf16.msra.mxu3 %v353_v7 }
  0x24   :  { %337 = vmatmul.msk.bf16.vlgmr.msra.gmra.mxu0 %vm141_vm1, %v345_v8  ;;  %339 = vmatmul.msk.bf16.vlgmr.msra.gmra.mxu1 %vm141_vm1, %v347_v9 }
  0x25   :  { %341 = vmatmul.msk.bf16.vlgmr.msra.gmra.mxu2 %vm141_vm1, %v349_v10  ;;  %343 = vmatmul.msk.bf16.vlgmr.msra.gmra.mxu3 %vm141_vm1, %v351_v11 }
  0x34   :  { %338 = vmatmul.msk.bf16.gmra.mxu0 %vm141_vm1, %v346_v12  ;;  %340 = vmatmul.msk.bf16.gmra.mxu1 %vm141_vm1, %v348_v13 }
  0x35   :  { %342 = vmatmul.msk.bf16.gmra.mxu2 %vm141_vm1, %v350_v14  ;;  %344 = vmatmul.msk.bf16.gmra.mxu3 %vm141_vm1, %v352_v15 }
  0xa1   :  { %v179_v17 = vpop.f32.mrf.mxu0  ;;  %v189_v18 = vpop.f32.mrf.mxu1 }
  0xa2   :  { %v180_v19 = vadd.f32 %v491_v16, %v179_v17  ;;  %v190_v20 = vadd.f32 %v491_v16, %v189_v18 }
  0xa4   :  { %vm219_vm2 = vcmp.ge.f32.partialorder %v180_v19, 0.0  ;;  %v235_v21 = vmul.f32 0.01, %v180_v19  ;;  %vm223_vm3 = vcmp.ge.f32.partialorder %v190_v20, 0.0  ;;  %v239_v22 = vmul.f32 0.01, %v190_v20 }
  0xa6   :  { %v251_v23 = vsel %vm219_vm2, %v180_v19, %v235_v21  ;;  %v255_v24 = vsel %vm223_vm3, %v190_v20, %v239_v22 }
  0xa7   :  { %267 = vst [vmem:[%s560_s3] sm:$0xff] %v251_v23 }
  0xa8   :  { %271 = vst [vmem:[%s560_s3 + $0x20] sm:$0xff] %v255_v24  ;;  %v199_v25 = vpop.f32.mrf.mxu2  ;;  %v209_v26 = vpop.f32.mrf.mxu3 }
  0xa9   :  { %v200_v27 = vadd.f32 %v491_v16, %v199_v25  ;;  %v210_v28 = vadd.f32 %v491_v16, %v209_v26  ;;  %v181_v29 = vpop.f32.mrf.mxu0  ;;  %v191_v30 = vpop.f32.mrf.mxu1 }
  0xaa   :  { %v182_v31 = vadd.f32 %v491_v16, %v181_v29  ;;  %v192_v32 = vadd.f32 %v491_v16, %v191_v30 }
  0xab   :  { %vm227_vm4 = vcmp.ge.f32.partialorder %v200_v27, 0.0  ;;  %v243_v33 = vmul.f32 0.01, %v200_v27  ;;  %vm231_vm5 = vcmp.ge.f32.partialorder %v210_v28, 0.0  ;;  %v247_v34 = vmul.f32 0.01, %v210_v28 }
  0xac   :  { %vm220_vm6 = vcmp.ge.f32.partialorder %v182_v31, 0.0  ;;  %v236_v35 = vmul.f32 0.01, %v182_v31  ;;  %vm224_vm7 = vcmp.ge.f32.partialorder %v192_v32, 0.0  ;;  %v240_v36 = vmul.f32 0.01, %v192_v32 }
  0xad   :  { %v259_v37 = vsel %vm227_vm4, %v200_v27, %v243_v33  ;;  %v263_v38 = vsel %vm231_vm5, %v210_v28, %v247_v34 }
  0xae   :  { %275 = vst [vmem:[%s560_s3 + $0x40] sm:$0xff] %v259_v37  ;;  %v252_v39 = vsel %vm220_vm6, %v182_v31, %v236_v35  ;;  %v256_v40 = vsel %vm224_vm7, %v192_v32, %v240_v36 }
  0xaf   :  { %279 = vst [vmem:[%s560_s3 + $0x60] sm:$0xff] %v263_v38 }
  0xb0   :  { %268 = vst [vmem:[%s560_s3 + $0x8] sm:$0xff] %v252_v39  ;;  %v201_v41 = vpop.f32.mrf.mxu2  ;;  %v211_v42 = vpop.f32.mrf.mxu3 }
  0xb1   :  { %272 = vst [vmem:[%s560_s3 + $0x28] sm:$0xff] %v256_v40  ;;  %v202_v43 = vadd.f32 %v491_v16, %v201_v41  ;;  %v212_v44 = vadd.f32 %v491_v16, %v211_v42  ;;  %v184_v45 = vpop.f32.mrf.mxu0  ;;  %v194_v46 = vpop.f32.mrf.mxu1 }
  0xb2   :  { %v185_v47 = vadd.f32 %v491_v16, %v184_v45  ;;  %v195_v48 = vadd.f32 %v491_v16, %v194_v46 }
  0xb3   :  { %vm228_vm8 = vcmp.ge.f32.partialorder %v202_v43, 0.0  ;;  %v244_v49 = vmul.f32 0.01, %v202_v43  ;;  %vm232_vm9 = vcmp.ge.f32.partialorder %v212_v44, 0.0  ;;  %v248_v50 = vmul.f32 0.01, %v212_v44 }
  0xb4   :  { %vm221_vm10 = vcmp.ge.f32.partialorder %v185_v47, 0.0  ;;  %v237_v51 = vmul.f32 0.01, %v185_v47  ;;  %vm225_vm11 = vcmp.ge.f32.partialorder %v195_v48, 0.0  ;;  %v241_v52 = vmul.f32 0.01, %v195_v48 }
  0xb5   :  { %v260_v53 = vsel %vm228_vm8, %v202_v43, %v244_v49  ;;  %v264_v54 = vsel %vm232_vm9, %v212_v44, %v248_v50 }
  0xb6   :  { %276 = vst [vmem:[%s560_s3 + $0x48] sm:$0xff] %v260_v53  ;;  %v253_v55 = vsel %vm221_vm10, %v185_v47, %v237_v51  ;;  %v257_v56 = vsel %vm225_vm11, %v195_v48, %v241_v52 }
  0xb7   :  { %280 = vst [vmem:[%s560_s3 + $0x68] sm:$0xff] %v264_v54 }
  0xb8   :  { %269 = vst [vmem:[%s560_s3 + $0x10] sm:$0xff] %v253_v55  ;;  %v204_v57 = vpop.f32.mrf.mxu2  ;;  %v214_v58 = vpop.f32.mrf.mxu3 }
  0xb9   :  { %273 = vst [vmem:[%s560_s3 + $0x30] sm:$0xff] %v257_v56  ;;  %v205_v59 = vadd.f32 %v491_v16, %v204_v57  ;;  %v215_v60 = vadd.f32 %v491_v16, %v214_v58  ;;  %v186_v61 = vpop.f32.mrf.mxu0  ;;  %v196_v62 = vpop.f32.mrf.mxu1 }
  0xba   :  { %v187_v63 = vadd.f32 %v491_v16, %v186_v61  ;;  %v197_v0 = vadd.f32 %v491_v16, %v196_v62 }
  0xbb   :  { %vm229_vm12 = vcmp.ge.f32.partialorder %v205_v59, 0.0  ;;  %v245_v1 = vmul.f32 0.01, %v205_v59  ;;  %vm233_vm13 = vcmp.ge.f32.partialorder %v215_v60, 0.0  ;;  %v249_v2 = vmul.f32 0.01, %v215_v60 }
  0xbc   :  { %vm222_vm14 = vcmp.ge.f32.partialorder %v187_v63, 0.0  ;;  %v238_v3 = vmul.f32 0.01, %v187_v63  ;;  %vm226_vm15 = vcmp.ge.f32.partialorder %v197_v0, 0.0  ;;  %v242_v4 = vmul.f32 0.01, %v197_v0 }
  0xbd   :  { %v261_v5 = vsel %vm229_vm12, %v205_v59, %v245_v1  ;;  %v265_v6 = vsel %vm233_vm13, %v215_v60, %v249_v2 }
  0xbe   :  { %277 = vst [vmem:[%s560_s3 + $0x50] sm:$0xff] %v261_v5  ;;  %v254_v7 = vsel %vm222_vm14, %v187_v63, %v238_v3  ;;  %v258_v8 = vsel %vm226_vm15, %v197_v0, %v242_v4 }
  0xbf   :  { %281 = vst [vmem:[%s560_s3 + $0x70] sm:$0xff] %v265_v6 }
  0xc0   :  { %270 = vst [vmem:[%s560_s3 + $0x18] sm:$0xff] %v254_v7  ;;  %v206_v9 = vpop.f32.mrf.mxu2  ;;  %v216_v10 = vpop.f32.mrf.mxu3 }
  0xc1   :  { %274 = vst [vmem:[%s560_s3 + $0x38] sm:$0xff] %v258_v8  ;;  %v207_v11 = vadd.f32 %v491_v16, %v206_v9  ;;  %v217_v12 = vadd.f32 %v491_v16, %v216_v10 }
  0xc3   :  { %vm230_vm0 = vcmp.ge.f32.partialorder %v207_v11, 0.0  ;;  %v246_v13 = vmul.f32 0.01, %v207_v11  ;;  %vm234_vm1 = vcmp.ge.f32.partialorder %v217_v12, 0.0  ;;  %v250_v14 = vmul.f32 0.01, %v217_v12 }
  0xc5   :  { %v262_v15 = vsel %vm230_vm0, %v207_v11, %v246_v13  ;;  %v266_v17 = vsel %vm234_vm1, %v217_v12, %v250_v14 }
  0xc6   :  { %278 = vst [vmem:[%s560_s3 + $0x58] sm:$0xff] %v262_v15 }
  0xc7   :  { %282 = vst [vmem:[%s560_s3 + $0x78] sm:$0xff] %v266_v17 }
  0xc8   :  { %287 = vsyncpa [#allocation3], 1 }
  0xc9   :  { %288 = vsyncpa [#allocation5], 1 }

// kernel: u_net_forward.9
= control target key start
LH: loop header
LB: loop body
LE: loop exit
PB: predicated region body
PF: predicated region fallthrough
CT: control target
= control target key end

     0   :  { %8 = vsyncpa [#allocation3], 0  ;;  %s918_s0 = inlined_call_operand.vmem [shape: bf16[32,576], index: 0, kind: input, shape index: {}]   ;;  %s919_s1 = inlined_call_operand.hbm [shape: bf16[576,128], index: 1, kind: input, shape index: {}]   ;;  %s920_s2 = inlined_call_operand.hbm [shape: f32[1,128], index: 2, kind: input, shape index: {}]   ;;  %s921_s3 = inlined_call_operand.vmem [shape: f32[32,128], index: 3, kind: output, shape index: {}]  }
   0x1   :  { %s16_s14 = sshll.u32 %s919_s1, 4  ;;  %s17_s14 = int_to_ptr.hbm [resolvable:$true] %s16_s14 }
   0x2   :  { %9 = vsyncpa [#allocation5], 0  ;;  %s816_s15 = smov [#allocation2]   ;;  %s30_s19 = sshll.u32 %s920_s2, 4  ;;  %s31_s19 = int_to_ptr.hbm [resolvable:$true] %s30_s19 }
   0x3   :  { %s18_s16 = sshll.u32 %s816_s15, 4  ;;  %s817_s20 = smov 64   ;;  %s19_s16 = int_to_ptr.vmem [resolvable:$true] %s18_s16 }
   0x4   :  { %s818_s21 = smov 4   ;;  %s819_s22 = smov [#allocation4]  }
   0x5   :  { %24 = dma.hbm_to_vmem [thread:$0]  %s17_s14, 4608, %s19_s16, [#allocation3], %s817_s20, %s817_s20, %s818_s21  }
   0x6   :  { %s32_s23 = sshll.u32 %s819_s22, 4  ;;  %s33_s23 = int_to_ptr.vmem [resolvable:$true] %s32_s23 }
   0x7   :  { %35 = dma.hbm_to_vmem [thread:$0]  %s31_s19, 16, %s33_s23, [#allocation5]  }
   0x8   :  { %812 = dma.done.wait [#allocation3], 4608  }
   0x9   :  { %813 = vsyncadd [#allocation3], 4294962688 }
   0xa   :  { %814 = dma.done.wait [#allocation5], 16  }
   0xb   :  { %815 = vsyncadd [#allocation5], 4294967280  ;;  %v726_v0 = vld [vmem:[#allocation2 + $0x38] sm:$0xff]  ;;  %v725_v4 = vld [vmem:[#allocation2 + $0x30] sm:$0xff]  ;;  %vm399_vm0 = vcmask 523264  }
   0xc   :  { %v734_v1 = vld [vmem:[#allocation2 + $0x78] sm:$0xff]  ;;  %406 = vmatpush.bf16.msra.mxu0 %v726_v0  ;;  %v733_v5 = vld [vmem:[#allocation2 + $0x70] sm:$0xff]  ;;  %v724_v8 = vld [vmem:[#allocation2 + $0x28] sm:$0xff] }
   0xd   :  { %v742_v2 = vld [vmem:[#allocation2 + $0xb8] sm:$0xff]  ;;  %425 = vmatpush.bf16.msra.mxu1 %v734_v1  ;;  %v741_v6 = vld [vmem:[#allocation2 + $0xb0] sm:$0xff]  ;;  %v732_v9 = vld [vmem:[#allocation2 + $0x68] sm:$0xff] }
   0xe   :  { %v750_v3 = vld [vmem:[#allocation2 + $0xf8] sm:$0xff]  ;;  %444 = vmatpush.bf16.msra.mxu2 %v742_v2  ;;  %v749_v7 = vld [vmem:[#allocation2 + $0xf0] sm:$0xff]  ;;  %v740_v10 = vld [vmem:[#allocation2 + $0xa8] sm:$0xff] }
   0xf   :  { %463 = vmatpush.bf16.msra.mxu3 %v750_v3  ;;  %v748_v11 = vld [vmem:[#allocation2 + $0xe8] sm:$0xff]  ;;  %v723_v12 = vld [vmem:[#allocation2 + $0x20] sm:$0xff]  ;;  %v722_v16 = vld [vmem:[#allocation2 + $0x18] sm:$0xff] }
  0x10   :  { %407 = vmatpush.bf16.msra.mxu0 %v725_v4  ;;  %v731_v13 = vld [vmem:[#allocation2 + $0x60] sm:$0xff]  ;;  %v730_v17 = vld [vmem:[#allocation2 + $0x58] sm:$0xff]  ;;  %v721_v20 = vld [vmem:[#allocation2 + $0x10] sm:$0xff] }
  0x11   :  { %426 = vmatpush.bf16.msra.mxu1 %v733_v5  ;;  %v739_v14 = vld [vmem:[#allocation2 + $0xa0] sm:$0xff]  ;;  %v738_v18 = vld [vmem:[#allocation2 + $0x98] sm:$0xff]  ;;  %v729_v21 = vld [vmem:[#allocation2 + $0x50] sm:$0xff] }
  0x12   :  { %445 = vmatpush.bf16.msra.mxu2 %v741_v6  ;;  %v747_v15 = vld [vmem:[#allocation2 + $0xe0] sm:$0xff]  ;;  %v746_v19 = vld [vmem:[#allocation2 + $0xd8] sm:$0xff]  ;;  %v737_v22 = vld [vmem:[#allocation2 + $0x90] sm:$0xff] }
  0x13   :  { %464 = vmatpush.bf16.msra.mxu3 %v749_v7  ;;  %v745_v23 = vld [vmem:[#allocation2 + $0xd0] sm:$0xff]  ;;  %v720_v24 = vld [vmem:[#allocation2 + $0x8] sm:$0xff]  ;;  %v719_v28 = vld [vmem:[#allocation2] sm:$0xff] }
  0x14   :  { %408 = vmatpush.bf16.msra.mxu0 %v724_v8  ;;  %v728_v25 = vld [vmem:[#allocation2 + $0x48] sm:$0xff]  ;;  %v727_v29 = vld [vmem:[#allocation2 + $0x40] sm:$0xff]  ;;  %v711_v33 = vld [vmem:[%s918_s0 + $0x10] sm:$0xf0] }
  0x15   :  { %427 = vmatpush.bf16.msra.mxu1 %v732_v9  ;;  %v736_v26 = vld [vmem:[#allocation2 + $0x88] sm:$0xff]  ;;  %v735_v30 = vld [vmem:[#allocation2 + $0x80] sm:$0xff]  ;;  %v527_v35 = vld [vmem:[%s918_s0 + $0x14] sm:$0xf0] }
  0x16   :  { %446 = vmatpush.bf16.msra.mxu2 %v740_v10  ;;  %v744_v27 = vld [vmem:[#allocation2 + $0xc8] sm:$0xff]  ;;  %v743_v31 = vld [vmem:[#allocation2 + $0xc0] sm:$0xff]  ;;  %v712_v37 = vld [vmem:[%s918_s0 + $0x18] sm:$0xf0] }
  0x17   :  { %465 = vmatpush.bf16.msra.mxu3 %v748_v11  ;;  %v525_v32 = vld [vmem:[%s918_s0] sm:$0xf]  ;;  %v709_v34 = vld [vmem:[%s918_s0 + $0x4] sm:$0xf]  ;;  %v533_v36 = vld [vmem:[%s918_s0 + $0x8] sm:$0xf] }
  0x18   :  { %409 = vmatpush.bf16.msra.mxu0 %v723_v12  ;;  %v710_v38 = vld [vmem:[%s918_s0 + $0xc] sm:$0xf]  ;;  %v535_v39 = vld [vmem:[%s918_s0 + $0x1c] sm:$0xf0]  ;;  %v754_v40 = vld [vmem:[#allocation2 + $0x118] sm:$0xff]  ;;  %v526_v41 = vor.u32 %v711_v33, %v525_v32  ;;  %v530_v42 = vor.u32 %v709_v34, %v527_v35  ;;  %v534_v43 = vor.u32 %v712_v37, %v533_v36 }
  0x19   :  { %428 = vmatpush.bf16.msra.mxu1 %v731_v13  ;;  %v538_v44 = vor.u32 %v710_v38, %v535_v39  ;;  %v753_v45 = vld [vmem:[#allocation2 + $0x110] sm:$0xff]  ;;  %v752_v46 = vld [vmem:[#allocation2 + $0x108] sm:$0xff]  ;;  %v751_v47 = vld [vmem:[#allocation2 + $0x100] sm:$0xff] }
  0x1a   :  { %447 = vmatpush.bf16.msra.mxu2 %v739_v14  ;;  %v545_v48 = vld [vmem:[%s918_s0 + $0x28] sm:$0xf]  ;;  %v716_v49 = vld [vmem:[%s918_s0 + $0x38] sm:$0xf0]  ;;  %v714_v50 = vld [vmem:[%s918_s0 + $0x2c] sm:$0xf] }
  0x1b   :  { %466 = vmatpush.bf16.msra.mxu3 %v747_v15  ;;  %v547_v51 = vld [vmem:[%s918_s0 + $0x3c] sm:$0xf0]  ;;  %v553_v52 = vld [vmem:[%s918_s0 + $0x30] sm:$0xf]  ;;  %v717_v53 = vld [vmem:[%s918_s0 + $0x40] sm:$0xf0]  ;;  %v546_v56 = vor.u32 %v716_v49, %v545_v48 }
  0x1c   :  { %410 = vmatpush.bf16.msra.mxu0 %v722_v16  ;;  %v715_v54 = vld [vmem:[%s918_s0 + $0x34] sm:$0xf]  ;;  %v555_v55 = vld [vmem:[%s918_s0 + $0x44] sm:$0xf0]  ;;  %v550_v57 = vor.u32 %v714_v50, %v547_v51  ;;  %v554_v58 = vor.u32 %v717_v53, %v553_v52  ;;  %v541_v60 = vld [vmem:[%s918_s0 + $0x10] sm:$0xf] }
  0x1d   :  { %429 = vmatpush.bf16.msra.mxu1 %v730_v17  ;;  %v558_v59 = vor.u32 %v715_v54, %v555_v55  ;;  %v713_v61 = vld [vmem:[%s918_s0 + $0x20] sm:$0xf0]  ;;  %v561_v62 = vld [vmem:[%s918_s0 + $0x38] sm:$0xf]  ;;  %v718_v63 = vld [vmem:[%s918_s0 + $0x48] sm:$0xf0] }
  0x1e   :  { %448 = vmatpush.bf16.msra.mxu2 %v738_v18  ;;  %v542_v0 = vor.u32 %v713_v61, %v541_v60  ;;  %v562_v1 = vor.u32 %v718_v63, %v561_v62  ;;  %v763_v11 = vld [vmem:[#allocation4] ss:$0 sm:$0xff] }
  0x1f   :  { %467 = vmatpush.bf16.msra.mxu3 %v746_v19 }
  0x20   :  { %411 = vmatpush.bf16.msra.mxu0 %v721_v20 }
  0x21   :  { %430 = vmatpush.bf16.msra.mxu1 %v729_v21 }
  0x22   :  { %449 = vmatpush.bf16.msra.mxu2 %v737_v22 }
  0x23   :  { %468 = vmatpush.bf16.msra.mxu3 %v745_v23 }
  0x24   :  { %412 = vmatpush.bf16.msra.mxu0 %v720_v24 }
  0x25   :  { %431 = vmatpush.bf16.msra.mxu1 %v728_v25 }
  0x26   :  { %450 = vmatpush.bf16.msra.mxu2 %v736_v26 }
  0x27   :  { %469 = vmatpush.bf16.msra.mxu3 %v744_v27 }
  0x28   :  { %413 = vmatpush.bf16.msra.mxu0 %v719_v28 }
  0x29   :  { %432 = vmatpush.bf16.msra.mxu1 %v727_v29 }
  0x2a   :  { %451 = vmatpush.bf16.msra.mxu2 %v735_v30 }
  0x2b   :  { %470 = vmatpush.bf16.msra.mxu3 %v743_v31  ;;  %414 = vmatmul.bf16.vlgmr.msra.gmra.mxu0 %v526_v41 }
  0x2c   :  { %486 = vmatpush.bf16.msrb.mxu0 %v754_v40  ;;  %433 = vmatmul.bf16.vlgmr.msra.gmra.mxu1 %v530_v42 }
  0x2d   :  { %755 = vmatpush.bf16.msrb.mxu1 %v754_v40  ;;  %452 = vmatmul.bf16.vlgmr.msra.gmra.mxu2 %v534_v43 }
  0x2e   :  { %471 = vmatmul.bf16.vlgmr.msra.gmra.mxu3 %v538_v44 }
  0x30   :  { %487 = vmatpush.bf16.msrb.mxu0 %v753_v45 }
  0x31   :  { %756 = vmatpush.bf16.msrb.mxu1 %v753_v45 }
  0x34   :  { %488 = vmatpush.bf16.msrb.mxu0 %v752_v46 }
  0x35   :  { %757 = vmatpush.bf16.msrb.mxu1 %v752_v46 }
  0x38   :  { %489 = vmatpush.bf16.msrb.mxu0 %v751_v47 }
  0x39   :  { %758 = vmatpush.bf16.msrb.mxu1 %v751_v47 }
  0x3b   :  { %419 = vmatmul.bf16.gmra.mxu0 %v546_v56 }
  0x3c   :  { %438 = vmatmul.bf16.gmra.mxu1 %v550_v57 }
  0x3d   :  { %457 = vmatmul.bf16.gmra.mxu2 %v554_v58 }
  0x3e   :  { %476 = vmatmul.bf16.gmra.mxu3 %v558_v59 }
  0x4b   :  { %707 = vmatmul.msk.bf16.vlgmr.msrb.gmra.mxu0 %vm399_vm0, %v542_v0 }
  0x4c   :  { %708 = vmatmul.msk.bf16.vlgmr.msrb.gmra.mxu1 %vm399_vm0, %v562_v1 }
  0xa8   :  { %v415_v2 = vpop.f32.mrf.mxu0 }
  0xa9   :  { %v434_v3 = vpop.f32.mrf.mxu1  ;;  %v416_v13 = vadd.f32 %v763_v11, %v415_v2 }
  0xab   :  { %v435_v18 = vadd.f32 %v434_v3, %v416_v13 }
  0xb0   :  { %v453_v4 = vpop.f32.mrf.mxu2  ;;  %v417_v6 = vpop.f32.mrf.mxu0 }
  0xb1   :  { %v472_v5 = vpop.f32.mrf.mxu3  ;;  %v436_v7 = vpop.f32.mrf.mxu1  ;;  %v454_v20 = vadd.f32 %v453_v4, %v435_v18  ;;  %v418_v22 = vadd.f32 %v763_v11, %v417_v6 }
  0xb3   :  { %v473_v25 = vadd.f32 %v472_v5, %v454_v20  ;;  %v437_v28 = vadd.f32 %v436_v7, %v418_v22 }
  0xb8   :  { %v455_v8 = vpop.f32.mrf.mxu2  ;;  %v420_v9 = vpop.f32.mrf.mxu0 }
  0xb9   :  { %v439_v10 = vpop.f32.mrf.mxu1  ;;  %v474_v12 = vpop.f32.mrf.mxu3  ;;  %v421_v14 = vadd.f32 %v763_v11, %v420_v9  ;;  %v456_v34 = vadd.f32 %v455_v8, %v437_v28 }
  0xbb   :  { %v440_v19 = vadd.f32 %v439_v10, %v421_v14  ;;  %v475_v41 = vadd.f32 %v474_v12, %v456_v34 }
  0xc0   :  { %v458_v15 = vpop.f32.mrf.mxu2  ;;  %v422_v16 = vpop.f32.mrf.mxu0 }
  0xc1   :  { %v441_v17 = vpop.f32.mrf.mxu1  ;;  %v459_v21 = vadd.f32 %v458_v15, %v440_v19  ;;  %v477_v23 = vpop.f32.mrf.mxu3  ;;  %v423_v24 = vadd.f32 %v763_v11, %v422_v16 }
  0xc3   :  { %v478_v26 = vadd.f32 %v477_v23, %v459_v21  ;;  %v442_v29 = vadd.f32 %v441_v17, %v423_v24 }
  0xc8   :  { %v460_v27 = vpop.f32.mrf.mxu2  ;;  %v491_v30 = vpop.f32.mrf.mxu0 }
  0xc9   :  { %v496_v31 = vpop.f32.mrf.mxu1  ;;  %v492_v32 = vadd.f32 %v491_v30, %v473_v25  ;;  %v461_v35 = vadd.f32 %v460_v27, %v442_v29  ;;  %v479_v40 = vpop.f32.mrf.mxu3 }
  0xca   :  { %v497_v33 = vadd.f32 %v496_v31, %v478_v26 }
  0xcb   :  { %vm501_vm1 = vcmp.ge.f32.partialorder %v492_v32, 0.0  ;;  %v505_v36 = vmul.f32 0.01, %v492_v32  ;;  %v480_v42 = vadd.f32 %v479_v40, %v461_v35 }
  0xcc   :  { %vm503_vm2 = vcmp.ge.f32.partialorder %v497_v33, 0.0  ;;  %v507_v37 = vmul.f32 0.01, %v497_v33 }
  0xcd   :  { %v509_v38 = vsel %vm501_vm1, %v492_v32, %v505_v36 }
  0xce   :  { %v511_v39 = vsel %vm503_vm2, %v497_v33, %v507_v37  ;;  %513 = vst [vmem:[%s921_s3] sm:$0xff] %v509_v38 }
  0xcf   :  { %515 = vst [vmem:[%s921_s3 + $0x10] sm:$0xff] %v511_v39 }
  0xd0   :  { %v493_v43 = vpop.f32.mrf.mxu0 }
  0xd1   :  { %v498_v44 = vpop.f32.mrf.mxu1  ;;  %v494_v45 = vadd.f32 %v493_v43, %v475_v41 }
  0xd2   :  { %v499_v46 = vadd.f32 %v498_v44, %v480_v42 }
  0xd3   :  { %vm502_vm3 = vcmp.ge.f32.partialorder %v494_v45, 0.0  ;;  %v506_v47 = vmul.f32 0.01, %v494_v45 }
  0xd4   :  { %vm504_vm4 = vcmp.ge.f32.partialorder %v499_v46, 0.0  ;;  %v508_v48 = vmul.f32 0.01, %v499_v46 }
  0xd5   :  { %v510_v49 = vsel %vm502_vm3, %v494_v45, %v506_v47 }
  0xd6   :  { %v512_v50 = vsel %vm504_vm4, %v499_v46, %v508_v48  ;;  %514 = vst [vmem:[%s921_s3 + $0x8] sm:$0xff] %v510_v49 }
  0xd7   :  { %516 = vst [vmem:[%s921_s3 + $0x18] sm:$0xff] %v512_v50 }
  0xd8   :  { %521 = vsyncpa [#allocation3], 1 }
  0xd9   :  { %522 = vsyncpa [#allocation5], 1 }

// kernel: u_net_forward.10
= control target key start
LH: loop header
LB: loop body
LE: loop exit
PB: predicated region body
PF: predicated region fallthrough
CT: control target
= control target key end

     0   :  { %8 = vsyncpa [#allocation3], 0  ;;  %s1898_s0 = inlined_call_operand.vmem [shape: bf16[8,1152], index: 0, kind: input, shape index: {}]   ;;  %s1899_s1 = inlined_call_operand.hbm [shape: bf16[1152,256], index: 1, kind: input, shape index: {}]   ;;  %s1900_s2 = inlined_call_operand.hbm [shape: f32[1,256], index: 2, kind: input, shape index: {}]   ;;  %s1901_s3 = inlined_call_operand.vmem [shape: f32[8,256], index: 3, kind: output, shape index: {}]  }
   0x1   :  { %10 = vsyncpa [#allocation3 + $0x1], 0 }
   0x2   :  { %11 = vsyncpa [#allocation5], 0 }
   0x3   :  { %13 = vsyncpa [#allocation5 + $0x1], 0  ;;  %s1703_s12 = smov 0   ;;  %s1705_s13 = smov 0  }
   0x4   :  { %s1707_s14 = smov 0   ;;  %s1709_s15 = smov 0  }
   0x5   :  { %s1711_s16 = smov 0   ;;  %s1713_s17 = smov 0  }
   0x6 LB: > { %s1128_s18 = sadd.s32 4294967295, %s1678_s17   ;;  %s28_s19 = sadd.s32 1, %s1674_s16  ;;  %s1678_s17 = sphi %s1713_s17, %s19_s17   ;;  %s1674_s16 = sphi %s1711_s16, %s1908_s16   ;;  %s1670_s15 = sphi %s1709_s15, %s1907_s15   ;;  %s1666_s14 = sphi %s1707_s14, %s1906_s14   ;;  %s1662_s13 = sphi %s1705_s13, %s1905_s13   ;;  %s1658_s12 = sphi %s1703_s12, %s1904_s12  }
   0x7   : > { %p29_p0 = scmp.ge.s32.totalorder %s28_s19, 2  ;;  %s64_s20 = sadd.s32 1, %s1666_s14 }
   0x8   : > { %p71_p1 = scmp.ne.s32.totalorder %s1666_s14, %s1662_s13  ;;  %p72_p2 = scmp.eq.s32.totalorder %s1678_s17, 0 }
   0x9   : > { %s1910_s19 = smov (%p29_p0, %s28_s19), 0  ;;  %p77_p4 = scmp.ne.s32.totalorder %s1662_s13, %s1658_s12 }
   0xa   : > { %p73_p3 = por %p72_p2, %p71_p1  ;;  %s61_s21 = ssub.s32 %s1674_s16, %s1910_s19 }
   0xb   : > { %p78_p5 = scmp.eq.s32.totalorder %s1128_s18, 0  ;;  %p62_p6 = scmp.eq.s32.totalorder %s61_s21, 0 }
   0xc   : > { %p1511_p8 = scmp.lt.s32.totalorder %s1678_s17, 2  ;;  %s163_s24 = sand.u32 1, %s1666_s14  }
   0xd   : > { %p1742_p7 = por %p78_p5, %p77_p4  ;;  %s1133_s25 = sshll.u32 %s1674_s16, 2 }
   0xe   : > { %s1748_s23 = scalar_select %p62_p6, %s1666_s14, %s64_s20  }
   0xf   : > { %s1498_s26 = smul.u32 576, %s163_s24  ;;  %s171_s29 = scalar_lea.hbm %s1899_s1, %s1133_s25 }
  0x10   : > { %p1755_p9 = pnand %p1511_p8, %p73_p3  ;;  %s172_s4 = sshll.u32 %s171_s29, 4  ;;  %s173_s4 = int_to_ptr.hbm [resolvable:$true] %s172_s4 }
  0x11   : > { %s167_s5 = scalar_lea.vmem [#allocation2], %s1498_s26  ;;  %p1134_p10 = scmp.ge.s32.totalorder %s1678_s17, 1 }
  0x12   : > { %s174_s6 = sshll.u32 %s167_s5, 4  ;;  %s164_s7 = scalar_lea.sflag [#allocation3], %s163_s24  ;;  %s175_s6 = int_to_ptr.vmem [resolvable:$true] %s174_s6 }
  0x13   : > { %s1680_s8 = smov 128   ;;  %s1681_s9 = smov 64  }
  0x14   : > { %s1682_s10 = smov 4   ;;  %p199_p11 = scmp.lt.s32.totalorder %s1678_s17, 3 }
  0x15   : > { %1507 = dma.hbm_to_vmem [thread:$0]  (!%p1755_p9), %s173_s4, 9216, %s175_s6, %s164_s7, %s1680_s8, %s1681_s9, %s1682_s10  }
  0x16   : > { %s190_s18 = scalar_lea.hbm %s1900_s2, %s1674_s16  ;;  %p200_p12 = pnand %p1134_p10, %p199_p11 }
  0x17   : > { %s192_s20 = sshll.u32 %s190_s18, 4  ;;  %s187_s21 = scalar_lea.vmem [#allocation4], %s163_s24  ;;  %s193_s20 = int_to_ptr.hbm [resolvable:$true] %s192_s20 }
  0x18   : > { %s194_s25 = sshll.u32 %s187_s21, 4  ;;  %s185_s26 = scalar_lea.sflag [#allocation5], %s163_s24  ;;  %s195_s25 = int_to_ptr.vmem [resolvable:$true] %s194_s25 }
  0x19   : > { %1510 = dma.hbm_to_vmem [thread:$0]  (!%p1755_p9), %s193_s20, 16, %s195_s25, %s185_s26  }
  0x1a   : > { %203 = sbr.rel (%p200_p12) target bundleno = 264 (0x108), region = 32  ;;  %s1770_s27 = sand.u32 (!%p200_p12), 1, %s1662_s13  }
  0x1b   : > { %s1499_s28 = smul.u32 (!%p200_p12), 576, %s1770_s27  ;;  %s206_s29 = scalar_lea.sflag (!%p200_p12), [#allocation3], %s1770_s27 }
  0x1d   : > { %s1774_s4 = scalar_lea.vmem (!%p200_p12), [#allocation2], %s1499_s28 }
  0x1f   : > { %1649 = dma.done.wait (%p1742_p7), %s206_s29, 9216  }
  0x20   : > { %1651 = vsyncadd (%p1742_p7), %s206_s29, 4294958080  ;;  %s216_s24 = scalar_lea.sflag [#allocation5], %s1770_s27  ;;  %s218_s30 = scalar_lea.vmem [#allocation4], %s1770_s27 }
  0x21   : > { %1653 = dma.done.wait (%p1742_p7), %s216_s24, 16  }
  0x22   : > { %1655 = vsyncadd (%p1742_p7), %s216_s24, 4294967280  ;;  %v1433_v0 = vld [vmem:[%s1774_s4 + $0x38] sm:$0xff]  ;;  %v1432_v4 = vld [vmem:[%s1774_s4 + $0x30] sm:$0xff]  ;;  %p261_p13 = scmp.lt.s32.totalorder %s1670_s15, 1 }
  0x23   : > { %v1449_v1 = vld [vmem:[%s1774_s4 + $0xb8] sm:$0xff]  ;;  %884 = vmatpush.bf16.msra.mxu0 %v1433_v0  ;;  %v1448_v5 = vld [vmem:[%s1774_s4 + $0xb0] sm:$0xff]  ;;  %v1431_v8 = vld [vmem:[%s1774_s4 + $0x28] sm:$0xff] }
  0x24   : > { %v1457_v2 = vld [vmem:[%s1774_s4 + $0xf8] sm:$0xff]  ;;  %910 = vmatpush.bf16.msra.mxu2 %v1449_v1  ;;  %v1456_v6 = vld [vmem:[%s1774_s4 + $0xf0] sm:$0xff]  ;;  %v1447_v9 = vld [vmem:[%s1774_s4 + $0xa8] sm:$0xff]  ;;  %s1912_s15 = smov (!%p261_p13, %s1670_s15), 1 }
  0x25   : > { %v1441_v3 = vld [vmem:[%s1774_s4 + $0x78] sm:$0xff]  ;;  %923 = vmatpush.bf16.msra.mxu3 %v1457_v2  ;;  %v1440_v7 = vld [vmem:[%s1774_s4 + $0x70] sm:$0xff]  ;;  %v1455_v10 = vld [vmem:[%s1774_s4 + $0xe8] sm:$0xff]  ;;  %s1135_s20 = sshll.u32 %s1912_s15, 3 }
  0x26   : > { %897 = vmatpush.bf16.msra.mxu1 %v1441_v3  ;;  %v1439_v11 = vld [vmem:[%s1774_s4 + $0x68] sm:$0xff]  ;;  %v1430_v12 = vld [vmem:[%s1774_s4 + $0x20] sm:$0xff]  ;;  %v1429_v16 = vld [vmem:[%s1774_s4 + $0x18] sm:$0xff]  ;;  %s266_s26 = scalar_lea.vmem %s1901_s3, %s1135_s20 }
  0x27   : > { %885 = vmatpush.bf16.msra.mxu0 %v1432_v4  ;;  %v1446_v13 = vld [vmem:[%s1774_s4 + $0xa0] sm:$0xff]  ;;  %v1445_v17 = vld [vmem:[%s1774_s4 + $0x98] sm:$0xff]  ;;  %v1428_v20 = vld [vmem:[%s1774_s4 + $0x10] sm:$0xff] }
  0x28   : > { %911 = vmatpush.bf16.msra.mxu2 %v1448_v5  ;;  %v1454_v14 = vld [vmem:[%s1774_s4 + $0xe0] sm:$0xff]  ;;  %v1453_v18 = vld [vmem:[%s1774_s4 + $0xd8] sm:$0xff]  ;;  %v1444_v21 = vld [vmem:[%s1774_s4 + $0x90] sm:$0xff] }
  0x29   : > { %924 = vmatpush.bf16.msra.mxu3 %v1456_v6  ;;  %v1438_v15 = vld [vmem:[%s1774_s4 + $0x60] sm:$0xff]  ;;  %v1437_v19 = vld [vmem:[%s1774_s4 + $0x58] sm:$0xff]  ;;  %v1452_v22 = vld [vmem:[%s1774_s4 + $0xd0] sm:$0xff] }
  0x2a   : > { %898 = vmatpush.bf16.msra.mxu1 %v1440_v7  ;;  %v1436_v23 = vld [vmem:[%s1774_s4 + $0x50] sm:$0xff]  ;;  %v1427_v24 = vld [vmem:[%s1774_s4 + $0x8] sm:$0xff]  ;;  %v267_v29 = vld [vmem:[%s1898_s0] sm:$0xff] }
  0x2b   : > { %886 = vmatpush.bf16.msra.mxu0 %v1431_v8  ;;  %v1443_v25 = vld [vmem:[%s1774_s4 + $0x88] sm:$0xff]  ;;  %v1426_v30 = vld [vmem:[%s1774_s4] sm:$0xff]  ;;  %v425_v33 = vunpack.c.l.b16 %v267_v29  ;;  %v1465_v34 = vld [vmem:[%s1774_s4 + $0x138] sm:$0xff]  ;;  %v426_v39 = vunpack.c.h.b16 %v267_v29 }
  0x2c   : > { %912 = vmatpush.bf16.msra.mxu2 %v1447_v9  ;;  %v1451_v26 = vld [vmem:[%s1774_s4 + $0xc8] sm:$0xff]  ;;  %v1442_v31 = vld [vmem:[%s1774_s4 + $0x80] sm:$0xff]  ;;  %v1481_v35 = vld [vmem:[%s1774_s4 + $0x1b8] sm:$0xff] }
  0x2d   : > { %925 = vmatpush.bf16.msra.mxu3 %v1455_v10  ;;  %v1435_v27 = vld [vmem:[%s1774_s4 + $0x48] sm:$0xff]  ;;  %v1450_v36 = vld [vmem:[%s1774_s4 + $0xc0] sm:$0xff]  ;;  %v1489_v40 = vld [vmem:[%s1774_s4 + $0x1f8] sm:$0xff]  ;;  %v434_v43 = vpack.c.b16 %v425_v33, %v425_v33  ;;  %v435_v47 = vpack.c.b16 %v426_v39, %v426_v39 }
  0x2e   : > { %899 = vmatpush.bf16.msra.mxu1 %v1439_v11  ;;  %v268_v28 = vld [vmem:[%s1898_s0 + $0x8] sm:$0xff]  ;;  %v1434_v37 = vld [vmem:[%s1774_s4 + $0x40] sm:$0xff]  ;;  %v1473_v41 = vld [vmem:[%s1774_s4 + $0x178] sm:$0xff] }
  0x2f   : > { %887 = vmatpush.bf16.msra.mxu0 %v1430_v12  ;;  %v427_v32 = vunpack.c.l.b16 %v268_v28  ;;  %v428_v38 = vunpack.c.h.b16 %v268_v28  ;;  %v1464_v44 = vld [vmem:[%s1774_s4 + $0x130] sm:$0xff]  ;;  %v1463_v50 = vld [vmem:[%s1774_s4 + $0x128] sm:$0xff]  ;;  %v1462_v54 = vld [vmem:[%s1774_s4 + $0x120] sm:$0xff] }
  0x30   : > { %913 = vmatpush.bf16.msra.mxu2 %v1446_v13  ;;  %v1480_v45 = vld [vmem:[%s1774_s4 + $0x1b0] sm:$0xff]  ;;  %v1479_v51 = vld [vmem:[%s1774_s4 + $0x1a8] sm:$0xff]  ;;  %v1478_v55 = vld [vmem:[%s1774_s4 + $0x1a0] sm:$0xff] }
  0x31   : > { %926 = vmatpush.bf16.msra.mxu3 %v1454_v14  ;;  %v436_v42 = vpack.c.b16 %v427_v32, %v427_v32  ;;  %v437_v46 = vpack.c.b16 %v428_v38, %v428_v38  ;;  %v1488_v48 = vld [vmem:[%s1774_s4 + $0x1f0] sm:$0xff]  ;;  %v1487_v52 = vld [vmem:[%s1774_s4 + $0x1e8] sm:$0xff]  ;;  %v1486_v56 = vld [vmem:[%s1774_s4 + $0x1e0] sm:$0xff] }
  0x32   : > { %900 = vmatpush.bf16.msra.mxu1 %v1438_v15  ;;  %v1472_v49 = vld [vmem:[%s1774_s4 + $0x170] sm:$0xff]  ;;  %v1471_v53 = vld [vmem:[%s1774_s4 + $0x168] sm:$0xff]  ;;  %v1470_v57 = vld [vmem:[%s1774_s4 + $0x160] sm:$0xff] }
  0x33   : > { %888 = vmatpush.bf16.msra.mxu0 %v1429_v16  ;;  %v1461_v58 = vld [vmem:[%s1774_s4 + $0x118] sm:$0xff]  ;;  %v1460_v62 = vld [vmem:[%s1774_s4 + $0x110] sm:$0xff]  ;;  %v1459_v2 = vld [vmem:[%s1774_s4 + $0x108] sm:$0xff] }
  0x34   : > { %914 = vmatpush.bf16.msra.mxu2 %v1445_v17  ;;  %v1477_v59 = vld [vmem:[%s1774_s4 + $0x198] sm:$0xff]  ;;  %v1476_v63 = vld [vmem:[%s1774_s4 + $0x190] sm:$0xff]  ;;  %v1475_v3 = vld [vmem:[%s1774_s4 + $0x188] sm:$0xff] }
  0x35   : > { %927 = vmatpush.bf16.msra.mxu3 %v1453_v18  ;;  %v1485_v60 = vld [vmem:[%s1774_s4 + $0x1d8] sm:$0xff]  ;;  %v1484_v0 = vld [vmem:[%s1774_s4 + $0x1d0] sm:$0xff]  ;;  %v1483_v6 = vld [vmem:[%s1774_s4 + $0x1c8] sm:$0xff] }
  0x36   : > { %901 = vmatpush.bf16.msra.mxu1 %v1437_v19  ;;  %v1469_v61 = vld [vmem:[%s1774_s4 + $0x158] sm:$0xff]  ;;  %v1468_v1 = vld [vmem:[%s1774_s4 + $0x150] sm:$0xff]  ;;  %v1467_v7 = vld [vmem:[%s1774_s4 + $0x148] sm:$0xff] }
  0x37   : > { %889 = vmatpush.bf16.msra.mxu0 %v1428_v20  ;;  %v270_v4 = vld [vmem:[%s1898_s0 + $0x18] sm:$0xff]  ;;  %v269_v5 = vld [vmem:[%s1898_s0 + $0x10] sm:$0xff]  ;;  %v1458_v10 = vld [vmem:[%s1774_s4 + $0x100] sm:$0xff] }
  0x38   : > { %915 = vmatpush.bf16.msra.mxu2 %v1444_v21  ;;  %v431_v8 = vunpack.c.l.b16 %v270_v4  ;;  %v429_v9 = vunpack.c.l.b16 %v269_v5  ;;  %v1474_v11 = vld [vmem:[%s1774_s4 + $0x180] sm:$0xff]  ;;  %v1497_v12 = vld [vmem:[%s1774_s4 + $0x238] sm:$0xff]  ;;  %v432_v13 = vunpack.c.h.b16 %v270_v4  ;;  %v430_v16 = vunpack.c.h.b16 %v269_v5  ;;  %v1496_v19 = vld [vmem:[%s1774_s4 + $0x230] sm:$0xff] }
  0x39   : > { %928 = vmatpush.bf16.msra.mxu3 %v1452_v22  ;;  %v1482_v14 = vld [vmem:[%s1774_s4 + $0x1c0] sm:$0xff]  ;;  %v1495_v22 = vld [vmem:[%s1774_s4 + $0x228] sm:$0xff] }
  0x3a   : > { %902 = vmatpush.bf16.msra.mxu1 %v1436_v23  ;;  %v1466_v15 = vld [vmem:[%s1774_s4 + $0x140] sm:$0xff]  ;;  %v440_v17 = vpack.c.b16 %v431_v8, %v431_v8  ;;  %v438_v18 = vpack.c.b16 %v429_v9, %v429_v9  ;;  %v441_v20 = vpack.c.b16 %v432_v13, %v432_v13  ;;  %v439_v21 = vpack.c.b16 %v430_v16, %v430_v16 }
  0x3b   : > { %890 = vmatpush.bf16.msra.mxu0 %v1427_v24  ;;  %v1494_v23 = vld [vmem:[%s1774_s4 + $0x220] sm:$0xff]  ;;  %v1493_v24 = vld [vmem:[%s1774_s4 + $0x218] sm:$0xff] }
  0x3c   : > { %916 = vmatpush.bf16.msra.mxu2 %v1443_v25  ;;  %v1492_v25 = vld [vmem:[%s1774_s4 + $0x210] sm:$0xff]  ;;  %v1490_v29 = vld [vmem:[%s1774_s4 + $0x200] sm:$0xff] }
  0x3d   : > { %929 = vmatpush.bf16.msra.mxu3 %v1451_v26  ;;  %v1491_v26 = vld [vmem:[%s1774_s4 + $0x208] sm:$0xff]  ;;  %v1563_v39 = vld [vmem:[%s218_s30] ss:$0 sm:$0xff] }
  0x3e   : > { %903 = vmatpush.bf16.msra.mxu1 %v1435_v27  ;;  %v271_v27 = vld [vmem:[%s1898_s0 + $0x20] sm:$0xf] }
  0x3f   : > { %891 = vmatpush.bf16.msra.mxu0 %v1426_v30  ;;  %v433_v28 = vunpack.c.l.b16 %v271_v27 }
  0x40   : > { %917 = vmatpush.bf16.msra.mxu2 %v1442_v31 }
  0x41   : > { %930 = vmatpush.bf16.msra.mxu3 %v1450_v36  ;;  %v442_v30 = vpack.c.b16 %v433_v28, %v433_v28 }
  0x42   : > { %904 = vmatpush.bf16.msra.mxu1 %v1434_v37  ;;  %892 = vmatmul.bf16.vlgmr.msra.gmra.mxu0 %v434_v43 }
  0x43   : > { %936 = vmatpush.bf16.msrb.mxu0 %v1465_v34  ;;  %918 = vmatmul.bf16.vlgmr.msra.gmra.mxu2 %v436_v42 }
  0x44   : > { %962 = vmatpush.bf16.msrb.mxu2 %v1481_v35  ;;  %931 = vmatmul.bf16.vlgmr.msra.gmra.mxu3 %v437_v46 }
  0x45   : > { %975 = vmatpush.bf16.msrb.mxu3 %v1489_v40  ;;  %905 = vmatmul.bf16.vlgmr.msra.gmra.mxu1 %v435_v47 }
  0x46   : > { %949 = vmatpush.bf16.msrb.mxu1 %v1473_v41 }
  0x47   : > { %937 = vmatpush.bf16.msrb.mxu0 %v1464_v44 }
  0x48   : > { %963 = vmatpush.bf16.msrb.mxu2 %v1480_v45 }
  0x49   : > { %976 = vmatpush.bf16.msrb.mxu3 %v1488_v48 }
  0x4a   : > { %950 = vmatpush.bf16.msrb.mxu1 %v1472_v49 }
  0x4b   : > { %938 = vmatpush.bf16.msrb.mxu0 %v1463_v50 }
  0x4c   : > { %964 = vmatpush.bf16.msrb.mxu2 %v1479_v51 }
  0x4d   : > { %977 = vmatpush.bf16.msrb.mxu3 %v1487_v52 }
  0x4e   : > { %951 = vmatpush.bf16.msrb.mxu1 %v1471_v53 }
  0x4f   : > { %939 = vmatpush.bf16.msrb.mxu0 %v1462_v54 }
  0x50   : > { %965 = vmatpush.bf16.msrb.mxu2 %v1478_v55 }
  0x51   : > { %978 = vmatpush.bf16.msrb.mxu3 %v1486_v56 }
  0x52   : > { %952 = vmatpush.bf16.msrb.mxu1 %v1470_v57 }
  0x53   : > { %940 = vmatpush.bf16.msrb.mxu0 %v1461_v58 }
  0x54   : > { %966 = vmatpush.bf16.msrb.mxu2 %v1477_v59 }
  0x55   : > { %979 = vmatpush.bf16.msrb.mxu3 %v1485_v60 }
  0x56   : > { %953 = vmatpush.bf16.msrb.mxu1 %v1469_v61 }
  0x57   : > { %941 = vmatpush.bf16.msrb.mxu0 %v1460_v62 }
  0x58   : > { %967 = vmatpush.bf16.msrb.mxu2 %v1476_v63 }
  0x59   : > { %980 = vmatpush.bf16.msrb.mxu3 %v1484_v0 }
  0x5a   : > { %954 = vmatpush.bf16.msrb.mxu1 %v1468_v1 }
  0x5b   : > { %942 = vmatpush.bf16.msrb.mxu0 %v1459_v2 }
  0x5c   : > { %968 = vmatpush.bf16.msrb.mxu2 %v1475_v3 }
  0x5d   : > { %981 = vmatpush.bf16.msrb.mxu3 %v1483_v6 }
  0x5e   : > { %955 = vmatpush.bf16.msrb.mxu1 %v1467_v7 }
  0x5f   : > { %943 = vmatpush.bf16.msrb.mxu0 %v1458_v10 }
  0x60   : > { %969 = vmatpush.bf16.msrb.mxu2 %v1474_v11 }
  0x61   : > { %982 = vmatpush.bf16.msrb.mxu3 %v1482_v14 }
  0x62   : > { %956 = vmatpush.bf16.msrb.mxu1 %v1466_v15  ;;  %944 = vmatmul.bf16.vlgmr.msrb.gmra.mxu0 %v438_v18 }
  0x63   : > { %988 = vmatpush.bf16.msra.mxu0 %v1497_v12  ;;  %970 = vmatmul.bf16.vlgmr.msrb.gmra.mxu2 %v440_v17 }
  0x64   : > { %983 = vmatmul.bf16.vlgmr.msrb.gmra.mxu3 %v441_v20 }
  0x65   : > { %957 = vmatmul.bf16.vlgmr.msrb.gmra.mxu1 %v439_v21 }
  0x67   : > { %989 = vmatpush.bf16.msra.mxu0 %v1496_v19 }
  0x6b   : > { %990 = vmatpush.bf16.msra.mxu0 %v1495_v22 }
  0x6f   : > { %991 = vmatpush.bf16.msra.mxu0 %v1494_v23 }
  0x73   : > { %992 = vmatpush.bf16.msra.mxu0 %v1493_v24 }
  0x77   : > { %993 = vmatpush.bf16.msra.mxu0 %v1492_v25 }
  0x7b   : > { %994 = vmatpush.bf16.msra.mxu0 %v1491_v26 }
  0x7f   : > { %995 = vmatpush.bf16.msra.mxu0 %v1490_v29 }
  0x82   : > { %996 = vmatmul.bf16.vlgmr.msra.gmra.mxu0 %v442_v30 }
  0xbf   : > { %v893_v31 = vpop.f32.mrf.mxu0 }
  0xc0   : > { %v894_v40 = vadd.f32 %v1563_v39, %v893_v31 }
  0xc2   : > { %v906_v32 = vpop.f32.mrf.mxu1 }
  0xc3   : > { %v907_v43 = vadd.f32 %v906_v32, %v894_v40 }
  0xc6   : > { %v919_v33 = vpop.f32.mrf.mxu2 }
  0xc7   : > { %v932_v34 = vpop.f32.mrf.mxu3  ;;  %v895_v35 = vpop.f32.mrf.mxu0  ;;  %v920_v45 = vadd.f32 %v919_v33, %v907_v43 }
  0xc9   : > { %v933_v49 = vadd.f32 %v932_v34, %v920_v45 }
  0xca   : > { %v908_v36 = vpop.f32.mrf.mxu1 }
  0xce   : > { %v921_v37 = vpop.f32.mrf.mxu2 }
  0xcf   : > { %v934_v38 = vpop.f32.mrf.mxu3 }
  0xdf   : > { %v945_v41 = vpop.f32.mrf.mxu0 }
  0xe0   : > { %v946_v51 = vadd.f32 %v945_v41, %v933_v49 }
  0xe2   : > { %v958_v42 = vpop.f32.mrf.mxu1 }
  0xe3   : > { %v959_v53 = vadd.f32 %v958_v42, %v946_v51 }
  0xe6   : > { %v971_v44 = vpop.f32.mrf.mxu2 }
  0xe7   : > { %v984_v46 = vpop.f32.mrf.mxu3  ;;  %v947_v47 = vpop.f32.mrf.mxu0  ;;  %v972_v54 = vadd.f32 %v971_v44, %v959_v53 }
  0xe9   : > { %v985_v55 = vadd.f32 %v984_v46, %v972_v54 }
  0xea   : > { %v960_v48 = vpop.f32.mrf.mxu1 }
  0xee   : > { %v973_v50 = vpop.f32.mrf.mxu2 }
  0xef   : > { %v986_v52 = vpop.f32.mrf.mxu3 }
  0xff   : > { %v997_v56 = vpop.f32.mrf.mxu0 }
 0x100   : > { %v998_v57 = vadd.f32 %v997_v56, %v985_v55 }
 0x102   : > { %vm1001_vm0 = vcmp.ge.f32.partialorder %v998_v57, 0.0  ;;  %v1002_v58 = vmul.f32 0.01, %v998_v57 }
 0x104   : > { %v1003_v59 = vsel %vm1001_vm0, %v998_v57, %v1002_v58 }
 0x105   : > { %1004 = vst [vmem:[%s266_s26] sm:$0xff] %v1003_v59 }
 0x107   : > { %v999_v60 = vpop.f32.mrf.mxu0 }
 0x108 PF: > { %s19_s17 = sadd.s32 1, %s1678_s17   ;;  %s1904_s12 = smov %s1662_s13 }
 0x109   : > { %p16_p0 = scmp.ge.s32.totalorder %s19_s17, 4   ;;  %s1905_s13 = smov %s1666_s14 }
 0x10a   : > { %s1906_s14 = smov %s1748_s23  ;;  %s1907_s15 = smov %s1674_s16 }
 0x10b   : > { %s1908_s16 = smov %s1910_s19  ;;  %18 = sbr.rel (!%p16_p0) target bundleno = 6 (0x6), region = 88 }
 0x110   :  { %1032 = vsyncpa [#allocation3], 1 }
 0x111   :  { %1034 = vsyncpa [#allocation3 + $0x1], 1 }
 0x112   :  { %1035 = vsyncpa [#allocation5], 1 }
 0x113   :  { %1037 = vsyncpa [#allocation5 + $0x1], 1 }

// kernel: u_net_forward.12
= control target key start
LH: loop header
LB: loop body
LE: loop exit
PB: predicated region body
PF: predicated region fallthrough
CT: control target
= control target key end

     0   :  { %8 = vsyncpa [#allocation3], 0  ;;  %s2686_s0 = inlined_call_operand.vmem [shape: bf16[2,2048], index: 0, kind: input, shape index: {}]   ;;  %s2687_s1 = inlined_call_operand.hbm [shape: bf16[2048,1024], index: 1, kind: input, shape index: {}]   ;;  %s2688_s2 = inlined_call_operand.vmem [shape: f32[1,1024], index: 2, kind: input, shape index: {}]   ;;  %s2689_s3 = inlined_call_operand.vmem [shape: f32[2,1024], index: 3, kind: output, shape index: {}]  }
   0x1   :  { %10 = vsyncpa [#allocation3 + $0x1], 0  ;;  %s2450_s12 = smov 0   ;;  %s2452_s13 = smov 0  }
   0x2   :  { %s2454_s14 = smov 0   ;;  %s2456_s15 = smov 0  }
   0x3   :  { %s2458_s16 = smov 0   ;;  %s2460_s17 = smov 0  }
   0x4 LB: > { %s1634_s18 = sadd.s32 4294967295, %s2425_s17   ;;  %s25_s19 = sadd.s32 1, %s2421_s16  ;;  %s2425_s17 = sphi %s2460_s17, %s16_s17   ;;  %s2421_s16 = sphi %s2458_s16, %s2696_s16   ;;  %s2417_s15 = sphi %s2456_s15, %s2695_s15   ;;  %s2413_s14 = sphi %s2454_s14, %s2694_s14   ;;  %s2409_s13 = sphi %s2452_s13, %s2693_s13   ;;  %s2405_s12 = sphi %s2450_s12, %s2692_s12  }
   0x5   : > { %p26_p0 = scmp.ge.s32.totalorder %s25_s19, 8  ;;  %s61_s20 = sadd.s32 1, %s2413_s14 }
   0x6   : > { %p68_p1 = scmp.ne.s32.totalorder %s2413_s14, %s2409_s13  ;;  %p69_p2 = scmp.eq.s32.totalorder %s2425_s17, 0 }
   0x7   : > { %s2698_s19 = smov (%p26_p0, %s25_s19), 0  ;;  %p74_p4 = scmp.ne.s32.totalorder %s2409_s13, %s2405_s12 }
   0x8   : > { %p2486_p3 = por %p69_p2, %p68_p1  ;;  %s58_s22 = ssub.s32 %s2421_s16, %s2698_s19 }
   0x9   : > { %p75_p5 = scmp.eq.s32.totalorder %s1634_s18, 0  ;;  %p59_p6 = scmp.eq.s32.totalorder %s58_s22, 0 }
   0xa   : > { %p2292_p8 = scmp.lt.s32.totalorder %s2425_s17, 8  ;;  %s159_s25 = sand.u32 1, %s2413_s14  }
   0xb   : > { %p2493_p7 = por %p75_p5, %p74_p4  ;;  %s1640_s26 = sshll.u32 %s2421_s16, 2 }
   0xc   : > { %s2499_s24 = scalar_select %p59_p6, %s2413_s14, %s61_s20  }
   0xd   : > { %s1639_s27 = sshll.u32 %s159_s25, 10  ;;  %s167_s30 = scalar_lea.hbm %s2687_s1, %s1640_s26 }
   0xe   : > { %s168_s4 = sshll.u32 %s167_s30, 4  ;;  %s163_s5 = scalar_lea.vmem [#allocation2], %s1639_s27  ;;  %s169_s4 = int_to_ptr.hbm [resolvable:$true] %s168_s4 }
   0xf   : > { %s170_s6 = sshll.u32 %s163_s5, 4  ;;  %p2289_p9 = pnand %p2292_p8, %p2486_p3  ;;  %s171_s6 = int_to_ptr.vmem [resolvable:$true] %s170_s6 }
  0x10   : > { %p1641_p10 = scmp.ge.s32.totalorder %s2425_s17, 1  ;;  %s160_s7 = scalar_lea.sflag [#allocation3], %s159_s25 }
  0x11   : > { %s2427_s8 = smov 512   ;;  %s2428_s9 = smov 64  }
  0x12   : > { %s2429_s10 = smov 4   ;;  %p184_p11 = scmp.lt.s32.totalorder %s2425_s17, 9 }
  0x13   : > { %2291 = dma.hbm_to_vmem [thread:$0]  (!%p2289_p9), %s169_s4, 16384, %s171_s6, %s160_s7, %s2427_s8, %s2428_s9, %s2429_s10  }
  0x14   : > { %p185_p12 = pnand %p1641_p10, %p184_p11 }
  0x15   : > { %s190_s11 = sand.u32 (!%p185_p12), 1, %s2409_s13  }
  0x16   : > { %188 = sbr.rel (%p185_p12) target bundleno = 299 (0x12b), region = 32  ;;  %s1642_s12 = sshll.u32 (!%p185_p12), %s190_s11, 10 }
  0x17   : > { %s191_s18 = scalar_lea.sflag (!%p185_p12), [#allocation3], %s190_s11  ;;  %s2511_s20 = scalar_lea.vmem (!%p185_p12), [#allocation2], %s1642_s12 }
  0x1b   : > { %2400 = dma.done.wait (%p2493_p7), %s191_s18, 16384  }
  0x1c   : > { %2402 = vsyncadd (%p2493_p7), %s191_s18, 4294950912  ;;  %v2165_v0 = vld [vmem:[%s2511_s20 + $0x38] sm:$0xff]  ;;  %v2164_v4 = vld [vmem:[%s2511_s20 + $0x30] sm:$0xff]  ;;  %p232_p13 = scmp.lt.s32.totalorder %s2417_s15, 7 }
  0x1d   : > { %v2173_v1 = vld [vmem:[%s2511_s20 + $0x78] sm:$0xff]  ;;  %1309 = vmatpush.bf16.msra.mxu0 %v2165_v0  ;;  %v2172_v5 = vld [vmem:[%s2511_s20 + $0x70] sm:$0xff]  ;;  %v2163_v8 = vld [vmem:[%s2511_s20 + $0x28] sm:$0xff] }
  0x1e   : > { %v2181_v2 = vld [vmem:[%s2511_s20 + $0xb8] sm:$0xff]  ;;  %1322 = vmatpush.bf16.msra.mxu1 %v2173_v1  ;;  %v2180_v6 = vld [vmem:[%s2511_s20 + $0xb0] sm:$0xff]  ;;  %v2171_v9 = vld [vmem:[%s2511_s20 + $0x68] sm:$0xff]  ;;  %s2700_s15 = smov (!%p232_p13, %s2417_s15), 7 }
  0x1f   : > { %v2189_v3 = vld [vmem:[%s2511_s20 + $0xf8] sm:$0xff]  ;;  %1335 = vmatpush.bf16.msra.mxu2 %v2181_v2  ;;  %v2188_v7 = vld [vmem:[%s2511_s20 + $0xf0] sm:$0xff]  ;;  %v2179_v10 = vld [vmem:[%s2511_s20 + $0xa8] sm:$0xff]  ;;  %s234_s26 = scalar_lea.vmem %s2688_s2, %s2700_s15  ;;  %s1643_s4 = sshll.u32 %s2700_s15, 1 }
  0x20   : > { %1348 = vmatpush.bf16.msra.mxu3 %v2189_v3  ;;  %v2187_v11 = vld [vmem:[%s2511_s20 + $0xe8] sm:$0xff]  ;;  %v2162_v12 = vld [vmem:[%s2511_s20 + $0x20] sm:$0xff]  ;;  %v2161_v16 = vld [vmem:[%s2511_s20 + $0x18] sm:$0xff]  ;;  %s242_s7 = scalar_lea.vmem %s2689_s3, %s1643_s4 }
  0x21   : > { %1310 = vmatpush.bf16.msra.mxu0 %v2164_v4  ;;  %v2170_v13 = vld [vmem:[%s2511_s20 + $0x60] sm:$0xff]  ;;  %v2169_v17 = vld [vmem:[%s2511_s20 + $0x58] sm:$0xff]  ;;  %v2160_v21 = vld [vmem:[%s2511_s20 + $0x10] sm:$0xff] }
  0x22   : > { %1323 = vmatpush.bf16.msra.mxu1 %v2172_v5  ;;  %v2178_v14 = vld [vmem:[%s2511_s20 + $0xa0] sm:$0xff]  ;;  %v2177_v18 = vld [vmem:[%s2511_s20 + $0x98] sm:$0xff]  ;;  %v2168_v22 = vld [vmem:[%s2511_s20 + $0x50] sm:$0xff] }
  0x23   : > { %1336 = vmatpush.bf16.msra.mxu2 %v2180_v6  ;;  %v2186_v15 = vld [vmem:[%s2511_s20 + $0xe0] sm:$0xff]  ;;  %v2185_v19 = vld [vmem:[%s2511_s20 + $0xd8] sm:$0xff]  ;;  %v2176_v23 = vld [vmem:[%s2511_s20 + $0x90] sm:$0xff] }
  0x24   : > { %1349 = vmatpush.bf16.msra.mxu3 %v2188_v7  ;;  %v243_v20 = vld [vmem:[%s2686_s0] sm:$0xff]  ;;  %v2184_v24 = vld [vmem:[%s2511_s20 + $0xd0] sm:$0xff]  ;;  %v2159_v25 = vld [vmem:[%s2511_s20 + $0x8] sm:$0xff] }
  0x25   : > { %1311 = vmatpush.bf16.msra.mxu0 %v2163_v8  ;;  %506 = vst [vmem:[#allocation1] ss:$9 sm:$0xff] %v243_v20  ;;  %v2167_v26 = vld [vmem:[%s2511_s20 + $0x48] sm:$0xff]  ;;  %v2158_v29 = vld [vmem:[%s2511_s20] sm:$0xff]  ;;  %v2197_v33 = vld [vmem:[%s2511_s20 + $0x138] sm:$0xff] }
  0x26   : > { %1324 = vmatpush.bf16.msra.mxu1 %v2171_v9  ;;  %v2175_v27 = vld [vmem:[%s2511_s20 + $0x88] sm:$0xff]  ;;  %v2166_v30 = vld [vmem:[%s2511_s20 + $0x40] sm:$0xff]  ;;  %v2205_v34 = vld [vmem:[%s2511_s20 + $0x178] sm:$0xff] }
  0x27   : > { %1337 = vmatpush.bf16.msra.mxu2 %v2179_v10  ;;  %v2183_v28 = vld [vmem:[%s2511_s20 + $0xc8] sm:$0xff]  ;;  %v2174_v31 = vld [vmem:[%s2511_s20 + $0x80] sm:$0xff]  ;;  %v2213_v35 = vld [vmem:[%s2511_s20 + $0x1b8] sm:$0xff] }
  0x28   : > { %1350 = vmatpush.bf16.msra.mxu3 %v2187_v11  ;;  %v2182_v32 = vld [vmem:[%s2511_s20 + $0xc0] sm:$0xff]  ;;  %v2221_v36 = vld [vmem:[%s2511_s20 + $0x1f8] sm:$0xff]  ;;  %v2196_v37 = vld [vmem:[%s2511_s20 + $0x130] sm:$0xff] }
  0x29   : > { %1312 = vmatpush.bf16.msra.mxu0 %v2162_v12  ;;  %v2204_v40 = vld [vmem:[%s2511_s20 + $0x170] sm:$0xff]  ;;  %v2195_v45 = vld [vmem:[%s2511_s20 + $0x128] sm:$0xff]  ;;  %v244_v52 = vld [vmem:[%s2686_s0 + $0x8] sm:$0xff] }
  0x2a   : > { %1325 = vmatpush.bf16.msra.mxu1 %v2170_v13  ;;  %v2212_v43 = vld [vmem:[%s2511_s20 + $0x1b0] sm:$0xff]  ;;  %v2203_v46 = vld [vmem:[%s2511_s20 + $0x168] sm:$0xff]  ;;  %v2194_v54 = vld [vmem:[%s2511_s20 + $0x120] sm:$0xff] }
  0x2b   : > { %1338 = vmatpush.bf16.msra.mxu2 %v2178_v14  ;;  %v2220_v44 = vld [vmem:[%s2511_s20 + $0x1f0] sm:$0xff]  ;;  %v2211_v47 = vld [vmem:[%s2511_s20 + $0x1a8] sm:$0xff]  ;;  %v2202_v55 = vld [vmem:[%s2511_s20 + $0x160] sm:$0xff] }
  0x2c   : > { %1351 = vmatpush.bf16.msra.mxu3 %v2186_v15  ;;  %v509_v38 = vld [vmem:[#allocation1 + $0x12] sm:$0xff]  ;;  %v507_v39 = vld [vmem:[#allocation1] sm:$0xff]  ;;  %v508_v42 = vld [vmem:[#allocation1 + $0x9] sm:$0xff] }
  0x2d   : > { %1313 = vmatpush.bf16.msra.mxu0 %v2161_v16  ;;  %v510_v41 = vld [vmem:[#allocation1 + $0x1b] sm:$0xff]  ;;  %v2219_v48 = vld [vmem:[%s2511_s20 + $0x1e8] sm:$0xff]  ;;  %v511_v50 = vld [vmem:[#allocation1 + $0x24] sm:$0xff] }
  0x2e   : > { %1326 = vmatpush.bf16.msra.mxu1 %v2169_v17  ;;  %v513_v49 = vld [vmem:[#allocation1 + $0x36] sm:$0xff]  ;;  %v514_v51 = vld [vmem:[#allocation1 + $0x3f] sm:$0xff]  ;;  %v512_v53 = vld [vmem:[#allocation1 + $0x2d] sm:$0xff] }
  0x2f   : > { %1339 = vmatpush.bf16.msra.mxu2 %v2177_v18  ;;  %516 = vst [vmem:[#allocation1] ss:$9 sm:$0xff] %v244_v52  ;;  %v2210_v56 = vld [vmem:[%s2511_s20 + $0x1a0] sm:$0xff]  ;;  %v2193_v58 = vld [vmem:[%s2511_s20 + $0x118] sm:$0xff]  ;;  %v2192_v62 = vld [vmem:[%s2511_s20 + $0x110] sm:$0xff] }
  0x30   : > { %1352 = vmatpush.bf16.msra.mxu3 %v2185_v19  ;;  %v2218_v57 = vld [vmem:[%s2511_s20 + $0x1e0] sm:$0xff]  ;;  %v2201_v59 = vld [vmem:[%s2511_s20 + $0x158] sm:$0xff]  ;;  %v2200_v63 = vld [vmem:[%s2511_s20 + $0x150] sm:$0xff] }
  0x31   : > { %1314 = vmatpush.bf16.msra.mxu0 %v2160_v21  ;;  %v2209_v60 = vld [vmem:[%s2511_s20 + $0x198] sm:$0xff]  ;;  %v2208_v0 = vld [vmem:[%s2511_s20 + $0x190] sm:$0xff]  ;;  %v2191_v2 = vld [vmem:[%s2511_s20 + $0x108] sm:$0xff] }
  0x32   : > { %1327 = vmatpush.bf16.msra.mxu1 %v2168_v22  ;;  %v2217_v61 = vld [vmem:[%s2511_s20 + $0x1d8] sm:$0xff]  ;;  %v2216_v1 = vld [vmem:[%s2511_s20 + $0x1d0] sm:$0xff]  ;;  %v2199_v3 = vld [vmem:[%s2511_s20 + $0x148] sm:$0xff] }
  0x33   : > { %1340 = vmatpush.bf16.msra.mxu2 %v2176_v23  ;;  %v2207_v4 = vld [vmem:[%s2511_s20 + $0x188] sm:$0xff]  ;;  %v2190_v6 = vld [vmem:[%s2511_s20 + $0x100] sm:$0xff]  ;;  %v2229_v10 = vld [vmem:[%s2511_s20 + $0x238] sm:$0xff] }
  0x34   : > { %1353 = vmatpush.bf16.msra.mxu3 %v2184_v24  ;;  %v2215_v5 = vld [vmem:[%s2511_s20 + $0x1c8] sm:$0xff]  ;;  %v2198_v7 = vld [vmem:[%s2511_s20 + $0x140] sm:$0xff]  ;;  %v2237_v11 = vld [vmem:[%s2511_s20 + $0x278] sm:$0xff] }
  0x35   : > { %1315 = vmatpush.bf16.msra.mxu0 %v2159_v25  ;;  %v2206_v8 = vld [vmem:[%s2511_s20 + $0x180] sm:$0xff]  ;;  %v2245_v12 = vld [vmem:[%s2511_s20 + $0x2b8] sm:$0xff]  ;;  %v2228_v14 = vld [vmem:[%s2511_s20 + $0x230] sm:$0xff] }
  0x36   : > { %1328 = vmatpush.bf16.msra.mxu1 %v2167_v26  ;;  %v2214_v9 = vld [vmem:[%s2511_s20 + $0x1c0] sm:$0xff]  ;;  %v2253_v13 = vld [vmem:[%s2511_s20 + $0x2f8] sm:$0xff]  ;;  %v2236_v15 = vld [vmem:[%s2511_s20 + $0x270] sm:$0xff] }
  0x37   : > { %1341 = vmatpush.bf16.msra.mxu2 %v2175_v27  ;;  %v2244_v16 = vld [vmem:[%s2511_s20 + $0x2b0] sm:$0xff]  ;;  %v2227_v18 = vld [vmem:[%s2511_s20 + $0x228] sm:$0xff]  ;;  %v2226_v22 = vld [vmem:[%s2511_s20 + $0x220] sm:$0xff] }
  0x38   : > { %1354 = vmatpush.bf16.msra.mxu3 %v2183_v28  ;;  %v2252_v17 = vld [vmem:[%s2511_s20 + $0x2f0] sm:$0xff]  ;;  %v2235_v19 = vld [vmem:[%s2511_s20 + $0x268] sm:$0xff]  ;;  %v2234_v23 = vld [vmem:[%s2511_s20 + $0x260] sm:$0xff] }
  0x39   : > { %1316 = vmatpush.bf16.msra.mxu0 %v2158_v29  ;;  %v2243_v20 = vld [vmem:[%s2511_s20 + $0x2a8] sm:$0xff]  ;;  %v2242_v24 = vld [vmem:[%s2511_s20 + $0x2a0] sm:$0xff]  ;;  %v2225_v26 = vld [vmem:[%s2511_s20 + $0x218] sm:$0xff] }
  0x3a   : > { %1329 = vmatpush.bf16.msra.mxu1 %v2166_v30  ;;  %v2251_v21 = vld [vmem:[%s2511_s20 + $0x2e8] sm:$0xff]  ;;  %v2250_v25 = vld [vmem:[%s2511_s20 + $0x2e0] sm:$0xff]  ;;  %v2233_v27 = vld [vmem:[%s2511_s20 + $0x258] sm:$0xff] }
  0x3b   : > { %1342 = vmatpush.bf16.msra.mxu2 %v2174_v31  ;;  %v2241_v28 = vld [vmem:[%s2511_s20 + $0x298] sm:$0xff]  ;;  %v2224_v30 = vld [vmem:[%s2511_s20 + $0x210] sm:$0xff] }
  0x3c   : > { %1355 = vmatpush.bf16.msra.mxu3 %v2182_v32  ;;  %1317 = vmatmul.bf16.vlgmr.msra.gmra.mxu0 %v507_v39  ;;  %v2249_v29 = vld [vmem:[%s2511_s20 + $0x2d8] sm:$0xff]  ;;  %v2232_v31 = vld [vmem:[%s2511_s20 + $0x250] sm:$0xff]  ;;  %v2230_v39 = vld [vmem:[%s2511_s20 + $0x240] sm:$0xff] }
  0x3d   : > { %1361 = vmatpush.bf16.msrb.mxu0 %v2197_v33  ;;  %1330 = vmatmul.bf16.vlgmr.msra.gmra.mxu1 %v508_v42  ;;  %v2240_v32 = vld [vmem:[%s2511_s20 + $0x290] sm:$0xff]  ;;  %v2261_v42 = vld [vmem:[%s2511_s20 + $0x338] sm:$0xff] }
  0x3e   : > { %1374 = vmatpush.bf16.msrb.mxu1 %v2205_v34  ;;  %1343 = vmatmul.bf16.vlgmr.msra.gmra.mxu2 %v509_v38  ;;  %v2248_v33 = vld [vmem:[%s2511_s20 + $0x2d0] sm:$0xff]  ;;  %v2223_v34 = vld [vmem:[%s2511_s20 + $0x208] sm:$0xff]  ;;  %v2222_v38 = vld [vmem:[%s2511_s20 + $0x200] sm:$0xff] }
  0x3f   : > { %1387 = vmatpush.bf16.msrb.mxu2 %v2213_v35  ;;  %1356 = vmatmul.bf16.vlgmr.msra.gmra.mxu3 %v510_v41  ;;  %v2231_v35 = vld [vmem:[%s2511_s20 + $0x248] sm:$0xff]  ;;  %v2246_v41 = vld [vmem:[%s2511_s20 + $0x2c0] sm:$0xff]  ;;  %v2276_v52 = vld [vmem:[%s2511_s20 + $0x3b0] sm:$0xff] }
  0x40   : > { %1400 = vmatpush.bf16.msrb.mxu3 %v2221_v36  ;;  %v2239_v36 = vld [vmem:[%s2511_s20 + $0x288] sm:$0xff] }
  0x41   : > { %1362 = vmatpush.bf16.msrb.mxu0 %v2196_v37  ;;  %v2247_v37 = vld [vmem:[%s2511_s20 + $0x2c8] sm:$0xff] }
  0x42   : > { %1375 = vmatpush.bf16.msrb.mxu1 %v2204_v40  ;;  %v2238_v40 = vld [vmem:[%s2511_s20 + $0x280] sm:$0xff] }
  0x43   : > { %1388 = vmatpush.bf16.msrb.mxu2 %v2212_v43  ;;  %v2269_v43 = vld [vmem:[%s2511_s20 + $0x378] sm:$0xff] }
  0x44   : > { %1401 = vmatpush.bf16.msrb.mxu3 %v2220_v44  ;;  %v2277_v44 = vld [vmem:[%s2511_s20 + $0x3b8] sm:$0xff] }
  0x45   : > { %1363 = vmatpush.bf16.msrb.mxu0 %v2195_v45  ;;  %v2285_v45 = vld [vmem:[%s2511_s20 + $0x3f8] sm:$0xff] }
  0x46   : > { %1376 = vmatpush.bf16.msrb.mxu1 %v2203_v46  ;;  %v517_v46 = vld [vmem:[#allocation1] sm:$0xff] }
  0x47   : > { %1389 = vmatpush.bf16.msrb.mxu2 %v2211_v47  ;;  %v519_v47 = vld [vmem:[#allocation1 + $0x12] sm:$0xff] }
  0x48   : > { %1402 = vmatpush.bf16.msrb.mxu3 %v2219_v48  ;;  %v518_v48 = vld [vmem:[#allocation1 + $0x9] sm:$0xff] }
  0x49   : > { %1364 = vmatpush.bf16.msrb.mxu0 %v2194_v54  ;;  %v2259_v54 = vld [vmem:[%s2511_s20 + $0x328] sm:$0xff] }
  0x4a   : > { %1377 = vmatpush.bf16.msrb.mxu1 %v2202_v55  ;;  %v2267_v55 = vld [vmem:[%s2511_s20 + $0x368] sm:$0xff] }
  0x4b   : > { %1390 = vmatpush.bf16.msrb.mxu2 %v2210_v56  ;;  %v2275_v56 = vld [vmem:[%s2511_s20 + $0x3a8] sm:$0xff] }
  0x4c   : > { %1403 = vmatpush.bf16.msrb.mxu3 %v2218_v57  ;;  %v2283_v57 = vld [vmem:[%s2511_s20 + $0x3e8] sm:$0xff] }
  0x4d   : > { %1365 = vmatpush.bf16.msrb.mxu0 %v2193_v58  ;;  %v2258_v58 = vld [vmem:[%s2511_s20 + $0x320] sm:$0xff] }
  0x4e   : > { %1378 = vmatpush.bf16.msrb.mxu1 %v2201_v59  ;;  %v2266_v59 = vld [vmem:[%s2511_s20 + $0x360] sm:$0xff] }
  0x4f   : > { %1391 = vmatpush.bf16.msrb.mxu2 %v2209_v60  ;;  %v2274_v60 = vld [vmem:[%s2511_s20 + $0x3a0] sm:$0xff] }
  0x50   : > { %1404 = vmatpush.bf16.msrb.mxu3 %v2217_v61  ;;  %v2282_v61 = vld [vmem:[%s2511_s20 + $0x3e0] sm:$0xff] }
  0x51   : > { %1366 = vmatpush.bf16.msrb.mxu0 %v2192_v62  ;;  %v2257_v62 = vld [vmem:[%s2511_s20 + $0x318] sm:$0xff] }
  0x52   : > { %1379 = vmatpush.bf16.msrb.mxu1 %v2200_v63  ;;  %v2265_v63 = vld [vmem:[%s2511_s20 + $0x358] sm:$0xff] }
  0x53   : > { %1392 = vmatpush.bf16.msrb.mxu2 %v2208_v0  ;;  %v2273_v0 = vld [vmem:[%s2511_s20 + $0x398] sm:$0xff] }
  0x54   : > { %1405 = vmatpush.bf16.msrb.mxu3 %v2216_v1  ;;  %v2281_v1 = vld [vmem:[%s2511_s20 + $0x3d8] sm:$0xff] }
  0x55   : > { %1367 = vmatpush.bf16.msrb.mxu0 %v2191_v2  ;;  %v2256_v2 = vld [vmem:[%s2511_s20 + $0x310] sm:$0xff] }
  0x56   : > { %1380 = vmatpush.bf16.msrb.mxu1 %v2199_v3  ;;  %v2264_v3 = vld [vmem:[%s2511_s20 + $0x350] sm:$0xff] }
  0x57   : > { %1393 = vmatpush.bf16.msrb.mxu2 %v2207_v4  ;;  %v2272_v4 = vld [vmem:[%s2511_s20 + $0x390] sm:$0xff] }
  0x58   : > { %1406 = vmatpush.bf16.msrb.mxu3 %v2215_v5  ;;  %v2280_v5 = vld [vmem:[%s2511_s20 + $0x3d0] sm:$0xff] }
  0x59   : > { %1368 = vmatpush.bf16.msrb.mxu0 %v2190_v6  ;;  %v2255_v6 = vld [vmem:[%s2511_s20 + $0x308] sm:$0xff] }
  0x5a   : > { %1381 = vmatpush.bf16.msrb.mxu1 %v2198_v7  ;;  %v2263_v7 = vld [vmem:[%s2511_s20 + $0x348] sm:$0xff] }
  0x5b   : > { %1394 = vmatpush.bf16.msrb.mxu2 %v2206_v8  ;;  %v2271_v8 = vld [vmem:[%s2511_s20 + $0x388] sm:$0xff] }
  0x5c   : > { %1407 = vmatpush.bf16.msrb.mxu3 %v2214_v9  ;;  %1369 = vmatmul.bf16.vlgmr.msrb.gmra.mxu0 %v511_v50  ;;  %v2260_v50 = vld [vmem:[%s2511_s20 + $0x330] sm:$0xff]  ;;  %v2279_v9 = vld [vmem:[%s2511_s20 + $0x3c8] sm:$0xff] }
  0x5d   : > { %1413 = vmatpush.bf16.msra.mxu0 %v2229_v10  ;;  %1382 = vmatmul.bf16.vlgmr.msrb.gmra.mxu1 %v512_v53  ;;  %v2284_v53 = vld [vmem:[%s2511_s20 + $0x3f0] sm:$0xff]  ;;  %v2254_v10 = vld [vmem:[%s2511_s20 + $0x300] sm:$0xff] }
  0x5e   : > { %1426 = vmatpush.bf16.msra.mxu1 %v2237_v11  ;;  %1395 = vmatmul.bf16.vlgmr.msrb.gmra.mxu2 %v513_v49  ;;  %v520_v49 = vld [vmem:[#allocation1 + $0x1b] sm:$0xff]  ;;  %v2262_v11 = vld [vmem:[%s2511_s20 + $0x340] sm:$0xff] }
  0x5f   : > { %1439 = vmatpush.bf16.msra.mxu2 %v2245_v12  ;;  %1408 = vmatmul.bf16.vlgmr.msrb.gmra.mxu3 %v514_v51  ;;  %v2268_v51 = vld [vmem:[%s2511_s20 + $0x370] sm:$0xff]  ;;  %v2270_v12 = vld [vmem:[%s2511_s20 + $0x380] sm:$0xff] }
  0x60   : > { %1452 = vmatpush.bf16.msra.mxu3 %v2253_v13  ;;  %v2278_v13 = vld [vmem:[%s2511_s20 + $0x3c0] sm:$0xff] }
  0x61   : > { %1414 = vmatpush.bf16.msra.mxu0 %v2228_v14  ;;  %v521_v14 = vld [vmem:[#allocation1 + $0x24] sm:$0xff] }
  0x62   : > { %1427 = vmatpush.bf16.msra.mxu1 %v2236_v15  ;;  %v522_v15 = vld [vmem:[#allocation1 + $0x2d] sm:$0xff] }
  0x63   : > { %1440 = vmatpush.bf16.msra.mxu2 %v2244_v16  ;;  %v523_v16 = vld [vmem:[#allocation1 + $0x36] sm:$0xff] }
  0x64   : > { %1453 = vmatpush.bf16.msra.mxu3 %v2252_v17  ;;  %v524_v17 = vld [vmem:[#allocation1 + $0x3f] sm:$0xff] }
  0x65   : > { %1415 = vmatpush.bf16.msra.mxu0 %v2227_v18  ;;  %v2344_v18 = vld [vmem:[%s234_s26] ss:$0 sm:$0xff] }
  0x66   : > { %1428 = vmatpush.bf16.msra.mxu1 %v2235_v19 }
  0x67   : > { %1441 = vmatpush.bf16.msra.mxu2 %v2243_v20 }
  0x68   : > { %1454 = vmatpush.bf16.msra.mxu3 %v2251_v21 }
  0x69   : > { %1416 = vmatpush.bf16.msra.mxu0 %v2226_v22 }
  0x6a   : > { %1429 = vmatpush.bf16.msra.mxu1 %v2234_v23 }
  0x6b   : > { %1442 = vmatpush.bf16.msra.mxu2 %v2242_v24 }
  0x6c   : > { %1455 = vmatpush.bf16.msra.mxu3 %v2250_v25 }
  0x6d   : > { %1417 = vmatpush.bf16.msra.mxu0 %v2225_v26 }
  0x6e   : > { %1430 = vmatpush.bf16.msra.mxu1 %v2233_v27 }
  0x6f   : > { %1443 = vmatpush.bf16.msra.mxu2 %v2241_v28 }
  0x70   : > { %1456 = vmatpush.bf16.msra.mxu3 %v2249_v29 }
  0x71   : > { %1418 = vmatpush.bf16.msra.mxu0 %v2224_v30 }
  0x72   : > { %1431 = vmatpush.bf16.msra.mxu1 %v2232_v31 }
  0x73   : > { %1444 = vmatpush.bf16.msra.mxu2 %v2240_v32 }
  0x74   : > { %1457 = vmatpush.bf16.msra.mxu3 %v2248_v33 }
  0x75   : > { %1419 = vmatpush.bf16.msra.mxu0 %v2223_v34 }
  0x76   : > { %1432 = vmatpush.bf16.msra.mxu1 %v2231_v35 }
  0x77   : > { %1445 = vmatpush.bf16.msra.mxu2 %v2239_v36 }
  0x78   : > { %1458 = vmatpush.bf16.msra.mxu3 %v2247_v37 }
  0x79   : > { %1420 = vmatpush.bf16.msra.mxu0 %v2222_v38 }
  0x7a   : > { %1433 = vmatpush.bf16.msra.mxu1 %v2230_v39 }
  0x7b   : > { %1446 = vmatpush.bf16.msra.mxu2 %v2238_v40 }
  0x7c   : > { %1459 = vmatpush.bf16.msra.mxu3 %v2246_v41  ;;  %1421 = vmatmul.bf16.vlgmr.msra.gmra.mxu0 %v517_v46 }
  0x7d   : > { %1465 = vmatpush.bf16.msrb.mxu0 %v2261_v42  ;;  %1434 = vmatmul.bf16.vlgmr.msra.gmra.mxu1 %v518_v48 }
  0x7e   : > { %1478 = vmatpush.bf16.msrb.mxu1 %v2269_v43  ;;  %1447 = vmatmul.bf16.vlgmr.msra.gmra.mxu2 %v519_v47 }
  0x7f   : > { %1491 = vmatpush.bf16.msrb.mxu2 %v2277_v44  ;;  %1460 = vmatmul.bf16.vlgmr.msra.gmra.mxu3 %v520_v49 }
  0x80   : > { %1504 = vmatpush.bf16.msrb.mxu3 %v2285_v45 }
  0x81   : > { %1466 = vmatpush.bf16.msrb.mxu0 %v2260_v50 }
  0x82   : > { %1479 = vmatpush.bf16.msrb.mxu1 %v2268_v51 }
  0x83   : > { %1492 = vmatpush.bf16.msrb.mxu2 %v2276_v52 }
  0x84   : > { %1505 = vmatpush.bf16.msrb.mxu3 %v2284_v53 }
  0x85   : > { %1467 = vmatpush.bf16.msrb.mxu0 %v2259_v54 }
  0x86   : > { %1480 = vmatpush.bf16.msrb.mxu1 %v2267_v55 }
  0x87   : > { %1493 = vmatpush.bf16.msrb.mxu2 %v2275_v56 }
  0x88   : > { %1506 = vmatpush.bf16.msrb.mxu3 %v2283_v57 }
  0x89   : > { %1468 = vmatpush.bf16.msrb.mxu0 %v2258_v58 }
  0x8a   : > { %1481 = vmatpush.bf16.msrb.mxu1 %v2266_v59 }
  0x8b   : > { %1494 = vmatpush.bf16.msrb.mxu2 %v2274_v60 }
  0x8c   : > { %1507 = vmatpush.bf16.msrb.mxu3 %v2282_v61 }
  0x8d   : > { %1469 = vmatpush.bf16.msrb.mxu0 %v2257_v62 }
  0x8e   : > { %1482 = vmatpush.bf16.msrb.mxu1 %v2265_v63 }
  0x8f   : > { %1495 = vmatpush.bf16.msrb.mxu2 %v2273_v0 }
  0x90   : > { %1508 = vmatpush.bf16.msrb.mxu3 %v2281_v1 }
  0x91   : > { %1470 = vmatpush.bf16.msrb.mxu0 %v2256_v2 }
  0x92   : > { %1483 = vmatpush.bf16.msrb.mxu1 %v2264_v3 }
  0x93   : > { %1496 = vmatpush.bf16.msrb.mxu2 %v2272_v4 }
  0x94   : > { %1509 = vmatpush.bf16.msrb.mxu3 %v2280_v5 }
  0x95   : > { %1471 = vmatpush.bf16.msrb.mxu0 %v2255_v6 }
  0x96   : > { %1484 = vmatpush.bf16.msrb.mxu1 %v2263_v7 }
  0x97   : > { %1497 = vmatpush.bf16.msrb.mxu2 %v2271_v8 }
  0x98   : > { %1510 = vmatpush.bf16.msrb.mxu3 %v2279_v9 }
  0x99   : > { %1472 = vmatpush.bf16.msrb.mxu0 %v2254_v10 }
  0x9a   : > { %1485 = vmatpush.bf16.msrb.mxu1 %v2262_v11 }
  0x9b   : > { %1498 = vmatpush.bf16.msrb.mxu2 %v2270_v12 }
  0x9c   : > { %1511 = vmatpush.bf16.msrb.mxu3 %v2278_v13  ;;  %1473 = vmatmul.bf16.vlgmr.msrb.gmra.mxu0 %v521_v14 }
  0x9d   : > { %1486 = vmatmul.bf16.vlgmr.msrb.gmra.mxu1 %v522_v15 }
  0x9e   : > { %1499 = vmatmul.bf16.vlgmr.msrb.gmra.mxu2 %v523_v16 }
  0x9f   : > { %1512 = vmatmul.bf16.vlgmr.msrb.gmra.mxu3 %v524_v17 }
  0xb9   : > { %v1318_v19 = vpop.f32.mrf.mxu0 }
  0xba   : > { %v1319_v20 = vadd.f32 %v2344_v18, %v1318_v19  ;;  %v1331_v21 = vpop.f32.mrf.mxu1 }
  0xbc   : > { %v1332_v22 = vadd.f32 %v1331_v21, %v1319_v20 }
  0xc1   : > { %v1344_v23 = vpop.f32.mrf.mxu2  ;;  %v1320_v26 = vpop.f32.mrf.mxu0 }
  0xc2   : > { %v1345_v24 = vadd.f32 %v1344_v23, %v1332_v22  ;;  %v1357_v25 = vpop.f32.mrf.mxu3  ;;  %v1333_v28 = vpop.f32.mrf.mxu1 }
  0xc4   : > { %v1358_v27 = vadd.f32 %v1357_v25, %v1345_v24 }
  0xc9   : > { %v1346_v29 = vpop.f32.mrf.mxu2 }
  0xca   : > { %v1359_v30 = vpop.f32.mrf.mxu3 }
  0xd9   : > { %v1370_v31 = vpop.f32.mrf.mxu0 }
  0xda   : > { %v1383_v32 = vpop.f32.mrf.mxu1  ;;  %v1371_v41 = vadd.f32 %v1370_v31, %v1358_v27 }
  0xdc   : > { %v1384_v45 = vadd.f32 %v1383_v32, %v1371_v41 }
  0xe1   : > { %v1396_v33 = vpop.f32.mrf.mxu2  ;;  %v1372_v35 = vpop.f32.mrf.mxu0 }
  0xe2   : > { %v1409_v34 = vpop.f32.mrf.mxu3  ;;  %v1385_v36 = vpop.f32.mrf.mxu1  ;;  %v1397_v47 = vadd.f32 %v1396_v33, %v1384_v45 }
  0xe4   : > { %v1410_v50 = vadd.f32 %v1409_v34, %v1397_v47 }
  0xe9   : > { %v1398_v37 = vpop.f32.mrf.mxu2 }
  0xea   : > { %v1411_v38 = vpop.f32.mrf.mxu3 }
  0xf9   : > { %v1422_v39 = vpop.f32.mrf.mxu0 }
  0xfa   : > { %v1435_v40 = vpop.f32.mrf.mxu1  ;;  %v1423_v51 = vadd.f32 %v1422_v39, %v1410_v50 }
  0xfc   : > { %v1436_v52 = vadd.f32 %v1435_v40, %v1423_v51 }
 0x101   : > { %v1448_v42 = vpop.f32.mrf.mxu2  ;;  %v1424_v44 = vpop.f32.mrf.mxu0 }
 0x102   : > { %v1461_v43 = vpop.f32.mrf.mxu3  ;;  %v1437_v46 = vpop.f32.mrf.mxu1  ;;  %v1449_v53 = vadd.f32 %v1448_v42, %v1436_v52 }
 0x104   : > { %v1462_v54 = vadd.f32 %v1461_v43, %v1449_v53 }
 0x109   : > { %v1450_v48 = vpop.f32.mrf.mxu2 }
 0x10a   : > { %v1463_v49 = vpop.f32.mrf.mxu3 }
 0x119   : > { %v1474_v55 = vpop.f32.mrf.mxu0 }
 0x11a   : > { %v1487_v56 = vpop.f32.mrf.mxu1  ;;  %v1475_v57 = vadd.f32 %v1474_v55, %v1462_v54 }
 0x11c   : > { %v1488_v58 = vadd.f32 %v1487_v56, %v1475_v57 }
 0x121   : > { %v1500_v59 = vpop.f32.mrf.mxu2  ;;  %v1476_v62 = vpop.f32.mrf.mxu0 }
 0x122   : > { %v1513_v60 = vpop.f32.mrf.mxu3  ;;  %v1501_v61 = vadd.f32 %v1500_v59, %v1488_v58  ;;  %v1489_v63 = vpop.f32.mrf.mxu1 }
 0x124   : > { %v1514_v0 = vadd.f32 %v1513_v60, %v1501_v61 }
 0x126   : > { %vm1517_vm0 = vcmp.ge.f32.partialorder %v1514_v0, 0.0  ;;  %v1518_v1 = vmul.f32 0.01, %v1514_v0 }
 0x128   : > { %v1519_v2 = vsel %vm1517_vm0, %v1514_v0, %v1518_v1 }
 0x129   : > { %1520 = vst [vmem:[%s242_s7] sm:$0x3] %v1519_v2  ;;  %v1502_v3 = vpop.f32.mrf.mxu2 }
 0x12a   : > { %v1515_v4 = vpop.f32.mrf.mxu3 }
 0x12b PF: > { %s16_s17 = sadd.s32 1, %s2425_s17   ;;  %s2692_s12 = smov %s2409_s13 }
 0x12c   : > { %p13_p0 = scmp.ge.s32.totalorder %s16_s17, 10   ;;  %s2693_s13 = smov %s2413_s14 }
 0x12d   : > { %s2694_s14 = smov %s2499_s24  ;;  %s2695_s15 = smov %s2421_s16 }
 0x12e   : > { %s2696_s16 = smov %s2698_s19  ;;  %15 = sbr.rel (!%p13_p0) target bundleno = 4 (0x4), region = 78 }
 0x133   :  { %1548 = vsyncpa [#allocation3], 1 }
 0x134   :  { %1550 = vsyncpa [#allocation3 + $0x1], 1 }

// kernel: u_net_forward.11
= control target key start
LH: loop header
LB: loop body
LE: loop exit
PB: predicated region body
PF: predicated region fallthrough
CT: control target
= control target key end

     0   :  { %s4979_s12 = smov 0   ;;  %s4981_s13 = smov 0   ;;  %s5804_s0 = inlined_call_operand.vmem [shape: bf16[2,2304], index: 0, kind: input, shape index: {}]   ;;  %s5805_s1 = inlined_call_operand.vmem [shape: bf16[2304,512], index: 1, kind: input, shape index: {}]   ;;  %s5806_s2 = inlined_call_operand.vmem [shape: f32[1,512], index: 2, kind: input, shape index: {}]   ;;  %s5807_s3 = inlined_call_operand.vmem [shape: f32[2,512], index: 3, kind: output, shape index: {}]  }
   0x1   :  { %s4983_s14 = smov 0   ;;  %s4985_s15 = smov 0  }
   0x2   :  { %s4987_s16 = smov 0  }
   0x3 LB: > { %s22_s17 = sadd.s32 1, %s4953_s15  ;;  %p65_p1 = scmp.ne.s32.totalorder %s4945_s13, %s4941_s12  ;;  %s4957_s16 = sphi %s4987_s16, %s13_s16   ;;  %s4953_s15 = sphi %s4985_s15, %s5811_s15   ;;  %s4949_s14 = sphi %s4983_s14, %s5810_s14   ;;  %s4945_s13 = sphi %s4981_s13, %s5809_s13   ;;  %s4941_s12 = sphi %s4979_s12, %s5808_s12  }
   0x4   : > { %p23_p0 = scmp.ge.s32.totalorder %s22_s17, 4  ;;  %p66_p2 = scmp.eq.s32.totalorder %s4957_s16, 0 }
   0x5   : > { %s58_s19 = sadd.s32 1, %s4945_s13  ;;  %p4150_p5 = scmp.ge.s32.totalorder %s4957_s16, 4 }
   0x6   : > { %s5813_s17 = smov (%p23_p0, %s22_s17), 0  ;;  %p67_p3 = por %p66_p2, %p65_p1 }
   0x7   : > { %s55_s18 = ssub.s32 %s4953_s15, %s5813_s17  ;;  %152 = sbr.rel (%p4150_p5) target bundleno = 304 (0x130), region = 20 }
   0x8   : > { %p56_p4 = scmp.eq.s32.totalorder %s55_s18, 0 }
   0xa   : > { %s5014_s20 = scalar_select %p56_p4, %s4945_s13, %s58_s19  }
   0xc   : > { %155 = sbr.rel (!%p67_p3) target bundleno = 304 (0x130), region = 24  ;;  %s157_s21 = sand.u32 (%p67_p3), 1, %s4945_s13  }
   0xd   : > { %s4151_s22 = sshll.u32 (%p67_p3), %s4953_s15, 2  ;;  %s4876_s23 = smul.u32 (%p67_p3), 1152, %s157_s21 }
   0xe   : > { %s5022_s26 = scalar_lea.vmem (%p67_p3), %s5805_s1, %s4151_s22 }
   0xf   : > { %v178_v0 = vld [vmem:[%s5022_s26] sm:$0xf] (%p67_p3)  ;;  %v180_v1 = vld [vmem:[%s5022_s26 + $0x10] sm:$0xf] (%p67_p3)  ;;  %s5027_s27 = scalar_lea.vmem (%p67_p3), [#allocation2], %s4876_s23 }
  0x10   : > { %v182_v2 = vld [vmem:[%s5022_s26 + $0x20] sm:$0xf] (%p67_p3)  ;;  %179 = vst [vmem:[%s5027_s27] sm:$0xf] (%p67_p3), %v178_v0  ;;  %v184_v3 = vld [vmem:[%s5022_s26 + $0x30] sm:$0xf] (%p67_p3) }
  0x11   : > { %181 = vst [vmem:[%s5027_s27 + $0x4] sm:$0xf] %v180_v1  ;;  %v186_v4 = vld [vmem:[%s5022_s26 + $0x40] sm:$0xf]  ;;  %v188_v5 = vld [vmem:[%s5022_s26 + $0x50] sm:$0xf] }
  0x12   : > { %183 = vst [vmem:[%s5027_s27 + $0x8] sm:$0xf] %v182_v2  ;;  %v190_v6 = vld [vmem:[%s5022_s26 + $0x60] sm:$0xf]  ;;  %v192_v7 = vld [vmem:[%s5022_s26 + $0x70] sm:$0xf] }
  0x13   : > { %185 = vst [vmem:[%s5027_s27 + $0xc] sm:$0xf] %v184_v3  ;;  %v194_v8 = vld [vmem:[%s5022_s26 + $0x80] sm:$0xf]  ;;  %v196_v9 = vld [vmem:[%s5022_s26 + $0x90] sm:$0xf] }
  0x14   : > { %187 = vst [vmem:[%s5027_s27 + $0x10] sm:$0xf] %v186_v4  ;;  %v198_v10 = vld [vmem:[%s5022_s26 + $0xa0] sm:$0xf]  ;;  %v200_v11 = vld [vmem:[%s5022_s26 + $0xb0] sm:$0xf] }
  0x15   : > { %189 = vst [vmem:[%s5027_s27 + $0x14] sm:$0xf] %v188_v5  ;;  %v202_v12 = vld [vmem:[%s5022_s26 + $0xc0] sm:$0xf]  ;;  %v204_v13 = vld [vmem:[%s5022_s26 + $0xd0] sm:$0xf] }
  0x16   : > { %191 = vst [vmem:[%s5027_s27 + $0x18] sm:$0xf] %v190_v6  ;;  %v206_v14 = vld [vmem:[%s5022_s26 + $0xe0] sm:$0xf]  ;;  %v208_v15 = vld [vmem:[%s5022_s26 + $0xf0] sm:$0xf] }
  0x17   : > { %193 = vst [vmem:[%s5027_s27 + $0x1c] sm:$0xf] %v192_v7  ;;  %v210_v16 = vld [vmem:[%s5022_s26 + $0x100] sm:$0xf]  ;;  %v212_v17 = vld [vmem:[%s5022_s26 + $0x110] sm:$0xf] }
  0x18   : > { %195 = vst [vmem:[%s5027_s27 + $0x20] sm:$0xf] %v194_v8  ;;  %v214_v18 = vld [vmem:[%s5022_s26 + $0x120] sm:$0xf]  ;;  %v216_v19 = vld [vmem:[%s5022_s26 + $0x130] sm:$0xf] }
  0x19   : > { %197 = vst [vmem:[%s5027_s27 + $0x24] sm:$0xf] %v196_v9  ;;  %v218_v20 = vld [vmem:[%s5022_s26 + $0x140] sm:$0xf]  ;;  %v220_v21 = vld [vmem:[%s5022_s26 + $0x150] sm:$0xf] }
  0x1a   : > { %199 = vst [vmem:[%s5027_s27 + $0x28] sm:$0xf] %v198_v10  ;;  %v222_v22 = vld [vmem:[%s5022_s26 + $0x160] sm:$0xf]  ;;  %v224_v23 = vld [vmem:[%s5022_s26 + $0x170] sm:$0xf] }
  0x1b   : > { %201 = vst [vmem:[%s5027_s27 + $0x2c] sm:$0xf] %v200_v11  ;;  %v226_v24 = vld [vmem:[%s5022_s26 + $0x180] sm:$0xf]  ;;  %v228_v25 = vld [vmem:[%s5022_s26 + $0x190] sm:$0xf] }
  0x1c   : > { %203 = vst [vmem:[%s5027_s27 + $0x30] sm:$0xf] %v202_v12  ;;  %v230_v26 = vld [vmem:[%s5022_s26 + $0x1a0] sm:$0xf]  ;;  %v232_v27 = vld [vmem:[%s5022_s26 + $0x1b0] sm:$0xf] }
  0x1d   : > { %205 = vst [vmem:[%s5027_s27 + $0x34] sm:$0xf] %v204_v13  ;;  %v234_v28 = vld [vmem:[%s5022_s26 + $0x1c0] sm:$0xf]  ;;  %v236_v29 = vld [vmem:[%s5022_s26 + $0x1d0] sm:$0xf] }
  0x1e   : > { %207 = vst [vmem:[%s5027_s27 + $0x38] sm:$0xf] %v206_v14  ;;  %v238_v30 = vld [vmem:[%s5022_s26 + $0x1e0] sm:$0xf]  ;;  %v240_v31 = vld [vmem:[%s5022_s26 + $0x1f0] sm:$0xf] }
  0x1f   : > { %209 = vst [vmem:[%s5027_s27 + $0x3c] sm:$0xf] %v208_v15  ;;  %v242_v32 = vld [vmem:[%s5022_s26 + $0x200] sm:$0xf]  ;;  %v244_v33 = vld [vmem:[%s5022_s26 + $0x210] sm:$0xf] }
  0x20   : > { %211 = vst [vmem:[%s5027_s27 + $0x40] sm:$0xf] %v210_v16  ;;  %v246_v34 = vld [vmem:[%s5022_s26 + $0x220] sm:$0xf]  ;;  %v248_v35 = vld [vmem:[%s5022_s26 + $0x230] sm:$0xf] }
  0x21   : > { %213 = vst [vmem:[%s5027_s27 + $0x44] sm:$0xf] %v212_v17  ;;  %v250_v36 = vld [vmem:[%s5022_s26 + $0x240] sm:$0xf]  ;;  %v252_v37 = vld [vmem:[%s5022_s26 + $0x250] sm:$0xf] }
  0x22   : > { %215 = vst [vmem:[%s5027_s27 + $0x48] sm:$0xf] %v214_v18  ;;  %v254_v38 = vld [vmem:[%s5022_s26 + $0x260] sm:$0xf]  ;;  %v256_v39 = vld [vmem:[%s5022_s26 + $0x270] sm:$0xf] }
  0x23   : > { %217 = vst [vmem:[%s5027_s27 + $0x4c] sm:$0xf] %v216_v19  ;;  %v258_v40 = vld [vmem:[%s5022_s26 + $0x280] sm:$0xf]  ;;  %v260_v41 = vld [vmem:[%s5022_s26 + $0x290] sm:$0xf] }
  0x24   : > { %219 = vst [vmem:[%s5027_s27 + $0x50] sm:$0xf] %v218_v20  ;;  %v262_v42 = vld [vmem:[%s5022_s26 + $0x2a0] sm:$0xf]  ;;  %v264_v43 = vld [vmem:[%s5022_s26 + $0x2b0] sm:$0xf] }
  0x25   : > { %221 = vst [vmem:[%s5027_s27 + $0x54] sm:$0xf] %v220_v21  ;;  %v266_v44 = vld [vmem:[%s5022_s26 + $0x2c0] sm:$0xf]  ;;  %v268_v45 = vld [vmem:[%s5022_s26 + $0x2d0] sm:$0xf] }
  0x26   : > { %223 = vst [vmem:[%s5027_s27 + $0x58] sm:$0xf] %v222_v22  ;;  %v270_v46 = vld [vmem:[%s5022_s26 + $0x2e0] sm:$0xf]  ;;  %v272_v47 = vld [vmem:[%s5022_s26 + $0x2f0] sm:$0xf] }
  0x27   : > { %225 = vst [vmem:[%s5027_s27 + $0x5c] sm:$0xf] %v224_v23  ;;  %v274_v48 = vld [vmem:[%s5022_s26 + $0x300] sm:$0xf]  ;;  %v276_v49 = vld [vmem:[%s5022_s26 + $0x310] sm:$0xf] }
  0x28   : > { %227 = vst [vmem:[%s5027_s27 + $0x60] sm:$0xf] %v226_v24  ;;  %v278_v50 = vld [vmem:[%s5022_s26 + $0x320] sm:$0xf]  ;;  %v280_v51 = vld [vmem:[%s5022_s26 + $0x330] sm:$0xf] }
  0x29   : > { %229 = vst [vmem:[%s5027_s27 + $0x64] sm:$0xf] %v228_v25  ;;  %v282_v52 = vld [vmem:[%s5022_s26 + $0x340] sm:$0xf]  ;;  %v284_v53 = vld [vmem:[%s5022_s26 + $0x350] sm:$0xf] }
  0x2a   : > { %231 = vst [vmem:[%s5027_s27 + $0x68] sm:$0xf] %v230_v26  ;;  %v286_v54 = vld [vmem:[%s5022_s26 + $0x360] sm:$0xf]  ;;  %v288_v55 = vld [vmem:[%s5022_s26 + $0x370] sm:$0xf] }
  0x2b   : > { %233 = vst [vmem:[%s5027_s27 + $0x6c] sm:$0xf] %v232_v27  ;;  %v290_v56 = vld [vmem:[%s5022_s26 + $0x380] sm:$0xf]  ;;  %v292_v57 = vld [vmem:[%s5022_s26 + $0x390] sm:$0xf] }
  0x2c   : > { %235 = vst [vmem:[%s5027_s27 + $0x70] sm:$0xf] %v234_v28  ;;  %v294_v58 = vld [vmem:[%s5022_s26 + $0x3a0] sm:$0xf]  ;;  %v296_v59 = vld [vmem:[%s5022_s26 + $0x3b0] sm:$0xf] }
  0x2d   : > { %237 = vst [vmem:[%s5027_s27 + $0x74] sm:$0xf] %v236_v29  ;;  %v298_v60 = vld [vmem:[%s5022_s26 + $0x3c0] sm:$0xf]  ;;  %v300_v61 = vld [vmem:[%s5022_s26 + $0x3d0] sm:$0xf] }
  0x2e   : > { %239 = vst [vmem:[%s5027_s27 + $0x78] sm:$0xf] %v238_v30  ;;  %v302_v62 = vld [vmem:[%s5022_s26 + $0x3e0] sm:$0xf]  ;;  %v304_v63 = vld [vmem:[%s5022_s26 + $0x3f0] sm:$0xf] }
  0x2f   : > { %241 = vst [vmem:[%s5027_s27 + $0x7c] sm:$0xf] %v240_v31  ;;  %v306_v0 = vld [vmem:[%s5022_s26 + $0x400] sm:$0xf]  ;;  %v308_v1 = vld [vmem:[%s5022_s26 + $0x410] sm:$0xf] }
  0x30   : > { %243 = vst [vmem:[%s5027_s27 + $0x80] sm:$0xf] %v242_v32  ;;  %v310_v2 = vld [vmem:[%s5022_s26 + $0x420] sm:$0xf]  ;;  %v312_v3 = vld [vmem:[%s5022_s26 + $0x430] sm:$0xf] }
  0x31   : > { %245 = vst [vmem:[%s5027_s27 + $0x84] sm:$0xf] %v244_v33  ;;  %v314_v4 = vld [vmem:[%s5022_s26 + $0x440] sm:$0xf]  ;;  %v316_v5 = vld [vmem:[%s5022_s26 + $0x450] sm:$0xf] }
  0x32   : > { %247 = vst [vmem:[%s5027_s27 + $0x88] sm:$0xf] %v246_v34  ;;  %v318_v6 = vld [vmem:[%s5022_s26 + $0x460] sm:$0xf]  ;;  %v320_v7 = vld [vmem:[%s5022_s26 + $0x470] sm:$0xf] }
  0x33   : > { %249 = vst [vmem:[%s5027_s27 + $0x8c] sm:$0xf] %v248_v35  ;;  %v322_v8 = vld [vmem:[%s5022_s26 + $0x480] sm:$0xf]  ;;  %v324_v9 = vld [vmem:[%s5022_s26 + $0x490] sm:$0xf] }
  0x34   : > { %251 = vst [vmem:[%s5027_s27 + $0x90] sm:$0xf] %v250_v36  ;;  %v326_v10 = vld [vmem:[%s5022_s26 + $0x4a0] sm:$0xf]  ;;  %v328_v11 = vld [vmem:[%s5022_s26 + $0x4b0] sm:$0xf] }
  0x35   : > { %253 = vst [vmem:[%s5027_s27 + $0x94] sm:$0xf] %v252_v37  ;;  %v330_v12 = vld [vmem:[%s5022_s26 + $0x4c0] sm:$0xf]  ;;  %v332_v13 = vld [vmem:[%s5022_s26 + $0x4d0] sm:$0xf] }
  0x36   : > { %255 = vst [vmem:[%s5027_s27 + $0x98] sm:$0xf] %v254_v38  ;;  %v334_v14 = vld [vmem:[%s5022_s26 + $0x4e0] sm:$0xf]  ;;  %v336_v15 = vld [vmem:[%s5022_s26 + $0x4f0] sm:$0xf] }
  0x37   : > { %257 = vst [vmem:[%s5027_s27 + $0x9c] sm:$0xf] %v256_v39  ;;  %v338_v16 = vld [vmem:[%s5022_s26 + $0x500] sm:$0xf]  ;;  %v340_v17 = vld [vmem:[%s5022_s26 + $0x510] sm:$0xf] }
  0x38   : > { %259 = vst [vmem:[%s5027_s27 + $0xa0] sm:$0xf] %v258_v40  ;;  %v342_v18 = vld [vmem:[%s5022_s26 + $0x520] sm:$0xf]  ;;  %v344_v19 = vld [vmem:[%s5022_s26 + $0x530] sm:$0xf] }
  0x39   : > { %261 = vst [vmem:[%s5027_s27 + $0xa4] sm:$0xf] %v260_v41  ;;  %v346_v20 = vld [vmem:[%s5022_s26 + $0x540] sm:$0xf]  ;;  %v348_v21 = vld [vmem:[%s5022_s26 + $0x550] sm:$0xf] }
  0x3a   : > { %263 = vst [vmem:[%s5027_s27 + $0xa8] sm:$0xf] %v262_v42  ;;  %v350_v22 = vld [vmem:[%s5022_s26 + $0x560] sm:$0xf]  ;;  %v352_v23 = vld [vmem:[%s5022_s26 + $0x570] sm:$0xf] }
  0x3b   : > { %265 = vst [vmem:[%s5027_s27 + $0xac] sm:$0xf] %v264_v43  ;;  %v354_v24 = vld [vmem:[%s5022_s26 + $0x580] sm:$0xf]  ;;  %v356_v25 = vld [vmem:[%s5022_s26 + $0x590] sm:$0xf] }
  0x3c   : > { %267 = vst [vmem:[%s5027_s27 + $0xb0] sm:$0xf] %v266_v44  ;;  %v358_v26 = vld [vmem:[%s5022_s26 + $0x5a0] sm:$0xf]  ;;  %v360_v27 = vld [vmem:[%s5022_s26 + $0x5b0] sm:$0xf] }
  0x3d   : > { %269 = vst [vmem:[%s5027_s27 + $0xb4] sm:$0xf] %v268_v45  ;;  %v362_v28 = vld [vmem:[%s5022_s26 + $0x5c0] sm:$0xf]  ;;  %v364_v29 = vld [vmem:[%s5022_s26 + $0x5d0] sm:$0xf] }
  0x3e   : > { %271 = vst [vmem:[%s5027_s27 + $0xb8] sm:$0xf] %v270_v46  ;;  %v366_v30 = vld [vmem:[%s5022_s26 + $0x5e0] sm:$0xf]  ;;  %v368_v31 = vld [vmem:[%s5022_s26 + $0x5f0] sm:$0xf] }
  0x3f   : > { %273 = vst [vmem:[%s5027_s27 + $0xbc] sm:$0xf] %v272_v47  ;;  %v370_v32 = vld [vmem:[%s5022_s26 + $0x600] sm:$0xf]  ;;  %v372_v33 = vld [vmem:[%s5022_s26 + $0x610] sm:$0xf] }
  0x40   : > { %275 = vst [vmem:[%s5027_s27 + $0xc0] sm:$0xf] %v274_v48  ;;  %v374_v34 = vld [vmem:[%s5022_s26 + $0x620] sm:$0xf]  ;;  %v376_v35 = vld [vmem:[%s5022_s26 + $0x630] sm:$0xf] }
  0x41   : > { %277 = vst [vmem:[%s5027_s27 + $0xc4] sm:$0xf] %v276_v49  ;;  %v378_v36 = vld [vmem:[%s5022_s26 + $0x640] sm:$0xf]  ;;  %v380_v37 = vld [vmem:[%s5022_s26 + $0x650] sm:$0xf] }
  0x42   : > { %279 = vst [vmem:[%s5027_s27 + $0xc8] sm:$0xf] %v278_v50  ;;  %v382_v38 = vld [vmem:[%s5022_s26 + $0x660] sm:$0xf]  ;;  %v384_v39 = vld [vmem:[%s5022_s26 + $0x670] sm:$0xf] }
  0x43   : > { %281 = vst [vmem:[%s5027_s27 + $0xcc] sm:$0xf] %v280_v51  ;;  %v386_v40 = vld [vmem:[%s5022_s26 + $0x680] sm:$0xf]  ;;  %v388_v41 = vld [vmem:[%s5022_s26 + $0x690] sm:$0xf] }
  0x44   : > { %283 = vst [vmem:[%s5027_s27 + $0xd0] sm:$0xf] %v282_v52  ;;  %v390_v42 = vld [vmem:[%s5022_s26 + $0x6a0] sm:$0xf]  ;;  %v392_v43 = vld [vmem:[%s5022_s26 + $0x6b0] sm:$0xf] }
  0x45   : > { %285 = vst [vmem:[%s5027_s27 + $0xd4] sm:$0xf] %v284_v53  ;;  %v394_v44 = vld [vmem:[%s5022_s26 + $0x6c0] sm:$0xf]  ;;  %v396_v45 = vld [vmem:[%s5022_s26 + $0x6d0] sm:$0xf] }
  0x46   : > { %287 = vst [vmem:[%s5027_s27 + $0xd8] sm:$0xf] %v286_v54  ;;  %v398_v46 = vld [vmem:[%s5022_s26 + $0x6e0] sm:$0xf]  ;;  %v400_v47 = vld [vmem:[%s5022_s26 + $0x6f0] sm:$0xf] }
  0x47   : > { %289 = vst [vmem:[%s5027_s27 + $0xdc] sm:$0xf] %v288_v55  ;;  %v402_v48 = vld [vmem:[%s5022_s26 + $0x700] sm:$0xf]  ;;  %v404_v49 = vld [vmem:[%s5022_s26 + $0x710] sm:$0xf] }
  0x48   : > { %291 = vst [vmem:[%s5027_s27 + $0xe0] sm:$0xf] %v290_v56  ;;  %v406_v50 = vld [vmem:[%s5022_s26 + $0x720] sm:$0xf]  ;;  %v408_v51 = vld [vmem:[%s5022_s26 + $0x730] sm:$0xf] }
  0x49   : > { %293 = vst [vmem:[%s5027_s27 + $0xe4] sm:$0xf] %v292_v57  ;;  %v410_v52 = vld [vmem:[%s5022_s26 + $0x740] sm:$0xf]  ;;  %v412_v53 = vld [vmem:[%s5022_s26 + $0x750] sm:$0xf] }
  0x4a   : > { %295 = vst [vmem:[%s5027_s27 + $0xe8] sm:$0xf] %v294_v58  ;;  %v414_v54 = vld [vmem:[%s5022_s26 + $0x760] sm:$0xf]  ;;  %v416_v55 = vld [vmem:[%s5022_s26 + $0x770] sm:$0xf] }
  0x4b   : > { %297 = vst [vmem:[%s5027_s27 + $0xec] sm:$0xf] %v296_v59  ;;  %v418_v56 = vld [vmem:[%s5022_s26 + $0x780] sm:$0xf]  ;;  %v420_v57 = vld [vmem:[%s5022_s26 + $0x790] sm:$0xf] }
  0x4c   : > { %299 = vst [vmem:[%s5027_s27 + $0xf0] sm:$0xf] %v298_v60  ;;  %v422_v58 = vld [vmem:[%s5022_s26 + $0x7a0] sm:$0xf]  ;;  %v424_v59 = vld [vmem:[%s5022_s26 + $0x7b0] sm:$0xf] }
  0x4d   : > { %301 = vst [vmem:[%s5027_s27 + $0xf4] sm:$0xf] %v300_v61  ;;  %v426_v60 = vld [vmem:[%s5022_s26 + $0x7c0] sm:$0xf]  ;;  %v428_v61 = vld [vmem:[%s5022_s26 + $0x7d0] sm:$0xf] }
  0x4e   : > { %303 = vst [vmem:[%s5027_s27 + $0xf8] sm:$0xf] %v302_v62  ;;  %v430_v62 = vld [vmem:[%s5022_s26 + $0x7e0] sm:$0xf] }
  0x4f   : > { %305 = vst [vmem:[%s5027_s27 + $0xfc] sm:$0xf] %v304_v63  ;;  %v432_v63 = vld [vmem:[%s5022_s26 + $0x7f0] sm:$0xf] }
  0x50   : > { %307 = vst [vmem:[%s5027_s27 + $0x100] sm:$0xf] %v306_v0  ;;  %v434_v0 = vld [vmem:[%s5022_s26 + $0x800] sm:$0xf] }
  0x51   : > { %309 = vst [vmem:[%s5027_s27 + $0x104] sm:$0xf] %v308_v1  ;;  %v436_v1 = vld [vmem:[%s5022_s26 + $0x810] sm:$0xf] }
  0x52   : > { %311 = vst [vmem:[%s5027_s27 + $0x108] sm:$0xf] %v310_v2  ;;  %v438_v2 = vld [vmem:[%s5022_s26 + $0x820] sm:$0xf] }
  0x53   : > { %313 = vst [vmem:[%s5027_s27 + $0x10c] sm:$0xf] %v312_v3  ;;  %v440_v3 = vld [vmem:[%s5022_s26 + $0x830] sm:$0xf] }
  0x54   : > { %315 = vst [vmem:[%s5027_s27 + $0x110] sm:$0xf] %v314_v4  ;;  %v442_v4 = vld [vmem:[%s5022_s26 + $0x840] sm:$0xf] }
  0x55   : > { %317 = vst [vmem:[%s5027_s27 + $0x114] sm:$0xf] %v316_v5  ;;  %v444_v5 = vld [vmem:[%s5022_s26 + $0x850] sm:$0xf] }
  0x56   : > { %319 = vst [vmem:[%s5027_s27 + $0x118] sm:$0xf] %v318_v6  ;;  %v446_v6 = vld [vmem:[%s5022_s26 + $0x860] sm:$0xf] }
  0x57   : > { %321 = vst [vmem:[%s5027_s27 + $0x11c] sm:$0xf] %v320_v7  ;;  %v448_v7 = vld [vmem:[%s5022_s26 + $0x870] sm:$0xf] }
  0x58   : > { %323 = vst [vmem:[%s5027_s27 + $0x120] sm:$0xf] %v322_v8  ;;  %v450_v8 = vld [vmem:[%s5022_s26 + $0x880] sm:$0xf] }
  0x59   : > { %325 = vst [vmem:[%s5027_s27 + $0x124] sm:$0xf] %v324_v9  ;;  %v452_v9 = vld [vmem:[%s5022_s26 + $0x890] sm:$0xf] }
  0x5a   : > { %327 = vst [vmem:[%s5027_s27 + $0x128] sm:$0xf] %v326_v10  ;;  %v454_v10 = vld [vmem:[%s5022_s26 + $0x8a0] sm:$0xf] }
  0x5b   : > { %329 = vst [vmem:[%s5027_s27 + $0x12c] sm:$0xf] %v328_v11  ;;  %v456_v11 = vld [vmem:[%s5022_s26 + $0x8b0] sm:$0xf] }
  0x5c   : > { %331 = vst [vmem:[%s5027_s27 + $0x130] sm:$0xf] %v330_v12  ;;  %v458_v12 = vld [vmem:[%s5022_s26 + $0x8c0] sm:$0xf] }
  0x5d   : > { %333 = vst [vmem:[%s5027_s27 + $0x134] sm:$0xf] %v332_v13  ;;  %v460_v13 = vld [vmem:[%s5022_s26 + $0x8d0] sm:$0xf] }
  0x5e   : > { %335 = vst [vmem:[%s5027_s27 + $0x138] sm:$0xf] %v334_v14  ;;  %v462_v14 = vld [vmem:[%s5022_s26 + $0x8e0] sm:$0xf] }
  0x5f   : > { %337 = vst [vmem:[%s5027_s27 + $0x13c] sm:$0xf] %v336_v15  ;;  %v464_v15 = vld [vmem:[%s5022_s26 + $0x8f0] sm:$0xf] }
  0x60   : > { %339 = vst [vmem:[%s5027_s27 + $0x140] sm:$0xf] %v338_v16  ;;  %v466_v16 = vld [vmem:[%s5022_s26 + $0x900] sm:$0xf] }
  0x61   : > { %341 = vst [vmem:[%s5027_s27 + $0x144] sm:$0xf] %v340_v17  ;;  %v468_v17 = vld [vmem:[%s5022_s26 + $0x910] sm:$0xf] }
  0x62   : > { %343 = vst [vmem:[%s5027_s27 + $0x148] sm:$0xf] %v342_v18  ;;  %v470_v18 = vld [vmem:[%s5022_s26 + $0x920] sm:$0xf] }
  0x63   : > { %345 = vst [vmem:[%s5027_s27 + $0x14c] sm:$0xf] %v344_v19  ;;  %v472_v19 = vld [vmem:[%s5022_s26 + $0x930] sm:$0xf] }
  0x64   : > { %347 = vst [vmem:[%s5027_s27 + $0x150] sm:$0xf] %v346_v20  ;;  %v474_v20 = vld [vmem:[%s5022_s26 + $0x940] sm:$0xf] }
  0x65   : > { %349 = vst [vmem:[%s5027_s27 + $0x154] sm:$0xf] %v348_v21  ;;  %v476_v21 = vld [vmem:[%s5022_s26 + $0x950] sm:$0xf] }
  0x66   : > { %351 = vst [vmem:[%s5027_s27 + $0x158] sm:$0xf] %v350_v22  ;;  %v478_v22 = vld [vmem:[%s5022_s26 + $0x960] sm:$0xf] }
  0x67   : > { %353 = vst [vmem:[%s5027_s27 + $0x15c] sm:$0xf] %v352_v23  ;;  %v480_v23 = vld [vmem:[%s5022_s26 + $0x970] sm:$0xf] }
  0x68   : > { %355 = vst [vmem:[%s5027_s27 + $0x160] sm:$0xf] %v354_v24  ;;  %v482_v24 = vld [vmem:[%s5022_s26 + $0x980] sm:$0xf] }
  0x69   : > { %357 = vst [vmem:[%s5027_s27 + $0x164] sm:$0xf] %v356_v25  ;;  %v484_v25 = vld [vmem:[%s5022_s26 + $0x990] sm:$0xf] }
  0x6a   : > { %359 = vst [vmem:[%s5027_s27 + $0x168] sm:$0xf] %v358_v26  ;;  %v486_v26 = vld [vmem:[%s5022_s26 + $0x9a0] sm:$0xf] }
  0x6b   : > { %361 = vst [vmem:[%s5027_s27 + $0x16c] sm:$0xf] %v360_v27  ;;  %v488_v27 = vld [vmem:[%s5022_s26 + $0x9b0] sm:$0xf] }
  0x6c   : > { %363 = vst [vmem:[%s5027_s27 + $0x170] sm:$0xf] %v362_v28  ;;  %v490_v28 = vld [vmem:[%s5022_s26 + $0x9c0] sm:$0xf] }
  0x6d   : > { %365 = vst [vmem:[%s5027_s27 + $0x174] sm:$0xf] %v364_v29  ;;  %v492_v29 = vld [vmem:[%s5022_s26 + $0x9d0] sm:$0xf] }
  0x6e   : > { %367 = vst [vmem:[%s5027_s27 + $0x178] sm:$0xf] %v366_v30  ;;  %v494_v30 = vld [vmem:[%s5022_s26 + $0x9e0] sm:$0xf] }
  0x6f   : > { %369 = vst [vmem:[%s5027_s27 + $0x17c] sm:$0xf] %v368_v31  ;;  %v496_v31 = vld [vmem:[%s5022_s26 + $0x9f0] sm:$0xf] }
  0x70   : > { %371 = vst [vmem:[%s5027_s27 + $0x180] sm:$0xf] %v370_v32  ;;  %v498_v32 = vld [vmem:[%s5022_s26 + $0xa00] sm:$0xf] }
  0x71   : > { %373 = vst [vmem:[%s5027_s27 + $0x184] sm:$0xf] %v372_v33  ;;  %v500_v33 = vld [vmem:[%s5022_s26 + $0xa10] sm:$0xf] }
  0x72   : > { %375 = vst [vmem:[%s5027_s27 + $0x188] sm:$0xf] %v374_v34  ;;  %v502_v34 = vld [vmem:[%s5022_s26 + $0xa20] sm:$0xf] }
  0x73   : > { %377 = vst [vmem:[%s5027_s27 + $0x18c] sm:$0xf] %v376_v35  ;;  %v504_v35 = vld [vmem:[%s5022_s26 + $0xa30] sm:$0xf] }
  0x74   : > { %379 = vst [vmem:[%s5027_s27 + $0x190] sm:$0xf] %v378_v36  ;;  %v506_v36 = vld [vmem:[%s5022_s26 + $0xa40] sm:$0xf] }
  0x75   : > { %381 = vst [vmem:[%s5027_s27 + $0x194] sm:$0xf] %v380_v37  ;;  %v508_v37 = vld [vmem:[%s5022_s26 + $0xa50] sm:$0xf] }
  0x76   : > { %383 = vst [vmem:[%s5027_s27 + $0x198] sm:$0xf] %v382_v38  ;;  %v510_v38 = vld [vmem:[%s5022_s26 + $0xa60] sm:$0xf] }
  0x77   : > { %385 = vst [vmem:[%s5027_s27 + $0x19c] sm:$0xf] %v384_v39  ;;  %v512_v39 = vld [vmem:[%s5022_s26 + $0xa70] sm:$0xf] }
  0x78   : > { %387 = vst [vmem:[%s5027_s27 + $0x1a0] sm:$0xf] %v386_v40  ;;  %v514_v40 = vld [vmem:[%s5022_s26 + $0xa80] sm:$0xf] }
  0x79   : > { %389 = vst [vmem:[%s5027_s27 + $0x1a4] sm:$0xf] %v388_v41  ;;  %v516_v41 = vld [vmem:[%s5022_s26 + $0xa90] sm:$0xf] }
  0x7a   : > { %391 = vst [vmem:[%s5027_s27 + $0x1a8] sm:$0xf] %v390_v42  ;;  %v518_v42 = vld [vmem:[%s5022_s26 + $0xaa0] sm:$0xf] }
  0x7b   : > { %393 = vst [vmem:[%s5027_s27 + $0x1ac] sm:$0xf] %v392_v43  ;;  %v520_v43 = vld [vmem:[%s5022_s26 + $0xab0] sm:$0xf] }
  0x7c   : > { %395 = vst [vmem:[%s5027_s27 + $0x1b0] sm:$0xf] %v394_v44  ;;  %v522_v44 = vld [vmem:[%s5022_s26 + $0xac0] sm:$0xf] }
  0x7d   : > { %397 = vst [vmem:[%s5027_s27 + $0x1b4] sm:$0xf] %v396_v45  ;;  %v524_v45 = vld [vmem:[%s5022_s26 + $0xad0] sm:$0xf] }
  0x7e   : > { %399 = vst [vmem:[%s5027_s27 + $0x1b8] sm:$0xf] %v398_v46  ;;  %v526_v46 = vld [vmem:[%s5022_s26 + $0xae0] sm:$0xf] }
  0x7f   : > { %401 = vst [vmem:[%s5027_s27 + $0x1bc] sm:$0xf] %v400_v47  ;;  %v528_v47 = vld [vmem:[%s5022_s26 + $0xaf0] sm:$0xf] }
  0x80   : > { %403 = vst [vmem:[%s5027_s27 + $0x1c0] sm:$0xf] %v402_v48  ;;  %v530_v48 = vld [vmem:[%s5022_s26 + $0xb00] sm:$0xf] }
  0x81   : > { %405 = vst [vmem:[%s5027_s27 + $0x1c4] sm:$0xf] %v404_v49  ;;  %v532_v49 = vld [vmem:[%s5022_s26 + $0xb10] sm:$0xf] }
  0x82   : > { %407 = vst [vmem:[%s5027_s27 + $0x1c8] sm:$0xf] %v406_v50  ;;  %v534_v50 = vld [vmem:[%s5022_s26 + $0xb20] sm:$0xf] }
  0x83   : > { %409 = vst [vmem:[%s5027_s27 + $0x1cc] sm:$0xf] %v408_v51  ;;  %v536_v51 = vld [vmem:[%s5022_s26 + $0xb30] sm:$0xf] }
  0x84   : > { %411 = vst [vmem:[%s5027_s27 + $0x1d0] sm:$0xf] %v410_v52  ;;  %v538_v52 = vld [vmem:[%s5022_s26 + $0xb40] sm:$0xf] }
  0x85   : > { %413 = vst [vmem:[%s5027_s27 + $0x1d4] sm:$0xf] %v412_v53  ;;  %v540_v53 = vld [vmem:[%s5022_s26 + $0xb50] sm:$0xf] }
  0x86   : > { %415 = vst [vmem:[%s5027_s27 + $0x1d8] sm:$0xf] %v414_v54  ;;  %v542_v54 = vld [vmem:[%s5022_s26 + $0xb60] sm:$0xf] }
  0x87   : > { %417 = vst [vmem:[%s5027_s27 + $0x1dc] sm:$0xf] %v416_v55  ;;  %v544_v55 = vld [vmem:[%s5022_s26 + $0xb70] sm:$0xf] }
  0x88   : > { %419 = vst [vmem:[%s5027_s27 + $0x1e0] sm:$0xf] %v418_v56  ;;  %v546_v56 = vld [vmem:[%s5022_s26 + $0xb80] sm:$0xf] }
  0x89   : > { %421 = vst [vmem:[%s5027_s27 + $0x1e4] sm:$0xf] %v420_v57  ;;  %v548_v57 = vld [vmem:[%s5022_s26 + $0xb90] sm:$0xf] }
  0x8a   : > { %423 = vst [vmem:[%s5027_s27 + $0x1e8] sm:$0xf] %v422_v58  ;;  %v550_v58 = vld [vmem:[%s5022_s26 + $0xba0] sm:$0xf] }
  0x8b   : > { %425 = vst [vmem:[%s5027_s27 + $0x1ec] sm:$0xf] %v424_v59  ;;  %v552_v59 = vld [vmem:[%s5022_s26 + $0xbb0] sm:$0xf] }
  0x8c   : > { %427 = vst [vmem:[%s5027_s27 + $0x1f0] sm:$0xf] %v426_v60  ;;  %v554_v60 = vld [vmem:[%s5022_s26 + $0xbc0] sm:$0xf] }
  0x8d   : > { %429 = vst [vmem:[%s5027_s27 + $0x1f4] sm:$0xf] %v428_v61  ;;  %v556_v61 = vld [vmem:[%s5022_s26 + $0xbd0] sm:$0xf] }
  0x8e   : > { %431 = vst [vmem:[%s5027_s27 + $0x1f8] sm:$0xf] %v430_v62  ;;  %v558_v62 = vld [vmem:[%s5022_s26 + $0xbe0] sm:$0xf] }
  0x8f   : > { %433 = vst [vmem:[%s5027_s27 + $0x1fc] sm:$0xf] %v432_v63  ;;  %v560_v63 = vld [vmem:[%s5022_s26 + $0xbf0] sm:$0xf] }
  0x90   : > { %435 = vst [vmem:[%s5027_s27 + $0x200] sm:$0xf] %v434_v0  ;;  %v562_v0 = vld [vmem:[%s5022_s26 + $0xc00] sm:$0xf] }
  0x91   : > { %437 = vst [vmem:[%s5027_s27 + $0x204] sm:$0xf] %v436_v1  ;;  %v564_v1 = vld [vmem:[%s5022_s26 + $0xc10] sm:$0xf] }
  0x92   : > { %439 = vst [vmem:[%s5027_s27 + $0x208] sm:$0xf] %v438_v2  ;;  %v566_v2 = vld [vmem:[%s5022_s26 + $0xc20] sm:$0xf] }
  0x93   : > { %441 = vst [vmem:[%s5027_s27 + $0x20c] sm:$0xf] %v440_v3  ;;  %v568_v3 = vld [vmem:[%s5022_s26 + $0xc30] sm:$0xf] }
  0x94   : > { %443 = vst [vmem:[%s5027_s27 + $0x210] sm:$0xf] %v442_v4  ;;  %v570_v4 = vld [vmem:[%s5022_s26 + $0xc40] sm:$0xf] }
  0x95   : > { %445 = vst [vmem:[%s5027_s27 + $0x214] sm:$0xf] %v444_v5  ;;  %v572_v5 = vld [vmem:[%s5022_s26 + $0xc50] sm:$0xf] }
  0x96   : > { %447 = vst [vmem:[%s5027_s27 + $0x218] sm:$0xf] %v446_v6  ;;  %v574_v6 = vld [vmem:[%s5022_s26 + $0xc60] sm:$0xf] }
  0x97   : > { %449 = vst [vmem:[%s5027_s27 + $0x21c] sm:$0xf] %v448_v7  ;;  %v576_v7 = vld [vmem:[%s5022_s26 + $0xc70] sm:$0xf] }
  0x98   : > { %451 = vst [vmem:[%s5027_s27 + $0x220] sm:$0xf] %v450_v8  ;;  %v578_v8 = vld [vmem:[%s5022_s26 + $0xc80] sm:$0xf] }
  0x99   : > { %453 = vst [vmem:[%s5027_s27 + $0x224] sm:$0xf] %v452_v9  ;;  %v580_v9 = vld [vmem:[%s5022_s26 + $0xc90] sm:$0xf] }
  0x9a   : > { %455 = vst [vmem:[%s5027_s27 + $0x228] sm:$0xf] %v454_v10  ;;  %v582_v10 = vld [vmem:[%s5022_s26 + $0xca0] sm:$0xf] }
  0x9b   : > { %457 = vst [vmem:[%s5027_s27 + $0x22c] sm:$0xf] %v456_v11  ;;  %v584_v11 = vld [vmem:[%s5022_s26 + $0xcb0] sm:$0xf] }
  0x9c   : > { %459 = vst [vmem:[%s5027_s27 + $0x230] sm:$0xf] %v458_v12  ;;  %v586_v12 = vld [vmem:[%s5022_s26 + $0xcc0] sm:$0xf] }
  0x9d   : > { %461 = vst [vmem:[%s5027_s27 + $0x234] sm:$0xf] %v460_v13  ;;  %v588_v13 = vld [vmem:[%s5022_s26 + $0xcd0] sm:$0xf] }
  0x9e   : > { %463 = vst [vmem:[%s5027_s27 + $0x238] sm:$0xf] %v462_v14  ;;  %v590_v14 = vld [vmem:[%s5022_s26 + $0xce0] sm:$0xf] }
  0x9f   : > { %465 = vst [vmem:[%s5027_s27 + $0x23c] sm:$0xf] %v464_v15  ;;  %v592_v15 = vld [vmem:[%s5022_s26 + $0xcf0] sm:$0xf] }
  0xa0   : > { %467 = vst [vmem:[%s5027_s27 + $0x240] sm:$0xf] %v466_v16  ;;  %v594_v16 = vld [vmem:[%s5022_s26 + $0xd00] sm:$0xf] }
  0xa1   : > { %469 = vst [vmem:[%s5027_s27 + $0x244] sm:$0xf] %v468_v17  ;;  %v596_v17 = vld [vmem:[%s5022_s26 + $0xd10] sm:$0xf] }
  0xa2   : > { %471 = vst [vmem:[%s5027_s27 + $0x248] sm:$0xf] %v470_v18  ;;  %v598_v18 = vld [vmem:[%s5022_s26 + $0xd20] sm:$0xf] }
  0xa3   : > { %473 = vst [vmem:[%s5027_s27 + $0x24c] sm:$0xf] %v472_v19  ;;  %v600_v19 = vld [vmem:[%s5022_s26 + $0xd30] sm:$0xf] }
  0xa4   : > { %475 = vst [vmem:[%s5027_s27 + $0x250] sm:$0xf] %v474_v20  ;;  %v602_v20 = vld [vmem:[%s5022_s26 + $0xd40] sm:$0xf] }
  0xa5   : > { %477 = vst [vmem:[%s5027_s27 + $0x254] sm:$0xf] %v476_v21  ;;  %v604_v21 = vld [vmem:[%s5022_s26 + $0xd50] sm:$0xf] }
  0xa6   : > { %479 = vst [vmem:[%s5027_s27 + $0x258] sm:$0xf] %v478_v22  ;;  %v606_v22 = vld [vmem:[%s5022_s26 + $0xd60] sm:$0xf] }
  0xa7   : > { %481 = vst [vmem:[%s5027_s27 + $0x25c] sm:$0xf] %v480_v23  ;;  %v608_v23 = vld [vmem:[%s5022_s26 + $0xd70] sm:$0xf] }
  0xa8   : > { %483 = vst [vmem:[%s5027_s27 + $0x260] sm:$0xf] %v482_v24  ;;  %v610_v24 = vld [vmem:[%s5022_s26 + $0xd80] sm:$0xf] }
  0xa9   : > { %485 = vst [vmem:[%s5027_s27 + $0x264] sm:$0xf] %v484_v25  ;;  %v612_v25 = vld [vmem:[%s5022_s26 + $0xd90] sm:$0xf] }
  0xaa   : > { %487 = vst [vmem:[%s5027_s27 + $0x268] sm:$0xf] %v486_v26  ;;  %v614_v26 = vld [vmem:[%s5022_s26 + $0xda0] sm:$0xf] }
  0xab   : > { %489 = vst [vmem:[%s5027_s27 + $0x26c] sm:$0xf] %v488_v27  ;;  %v616_v27 = vld [vmem:[%s5022_s26 + $0xdb0] sm:$0xf] }
  0xac   : > { %491 = vst [vmem:[%s5027_s27 + $0x270] sm:$0xf] %v490_v28  ;;  %v618_v28 = vld [vmem:[%s5022_s26 + $0xdc0] sm:$0xf] }
  0xad   : > { %493 = vst [vmem:[%s5027_s27 + $0x274] sm:$0xf] %v492_v29  ;;  %v620_v29 = vld [vmem:[%s5022_s26 + $0xdd0] sm:$0xf] }
  0xae   : > { %495 = vst [vmem:[%s5027_s27 + $0x278] sm:$0xf] %v494_v30  ;;  %v622_v30 = vld [vmem:[%s5022_s26 + $0xde0] sm:$0xf] }
  0xaf   : > { %497 = vst [vmem:[%s5027_s27 + $0x27c] sm:$0xf] %v496_v31  ;;  %v624_v31 = vld [vmem:[%s5022_s26 + $0xdf0] sm:$0xf] }
  0xb0   : > { %499 = vst [vmem:[%s5027_s27 + $0x280] sm:$0xf] %v498_v32  ;;  %v626_v32 = vld [vmem:[%s5022_s26 + $0xe00] sm:$0xf] }
  0xb1   : > { %501 = vst [vmem:[%s5027_s27 + $0x284] sm:$0xf] %v500_v33  ;;  %v628_v33 = vld [vmem:[%s5022_s26 + $0xe10] sm:$0xf] }
  0xb2   : > { %503 = vst [vmem:[%s5027_s27 + $0x288] sm:$0xf] %v502_v34  ;;  %v630_v34 = vld [vmem:[%s5022_s26 + $0xe20] sm:$0xf] }
  0xb3   : > { %505 = vst [vmem:[%s5027_s27 + $0x28c] sm:$0xf] %v504_v35  ;;  %v632_v35 = vld [vmem:[%s5022_s26 + $0xe30] sm:$0xf] }
  0xb4   : > { %507 = vst [vmem:[%s5027_s27 + $0x290] sm:$0xf] %v506_v36  ;;  %v634_v36 = vld [vmem:[%s5022_s26 + $0xe40] sm:$0xf] }
  0xb5   : > { %509 = vst [vmem:[%s5027_s27 + $0x294] sm:$0xf] %v508_v37  ;;  %v636_v37 = vld [vmem:[%s5022_s26 + $0xe50] sm:$0xf] }
  0xb6   : > { %511 = vst [vmem:[%s5027_s27 + $0x298] sm:$0xf] %v510_v38  ;;  %v638_v38 = vld [vmem:[%s5022_s26 + $0xe60] sm:$0xf] }
  0xb7   : > { %513 = vst [vmem:[%s5027_s27 + $0x29c] sm:$0xf] %v512_v39  ;;  %v640_v39 = vld [vmem:[%s5022_s26 + $0xe70] sm:$0xf] }
  0xb8   : > { %515 = vst [vmem:[%s5027_s27 + $0x2a0] sm:$0xf] %v514_v40  ;;  %v642_v40 = vld [vmem:[%s5022_s26 + $0xe80] sm:$0xf] }
  0xb9   : > { %517 = vst [vmem:[%s5027_s27 + $0x2a4] sm:$0xf] %v516_v41  ;;  %v644_v41 = vld [vmem:[%s5022_s26 + $0xe90] sm:$0xf] }
  0xba   : > { %519 = vst [vmem:[%s5027_s27 + $0x2a8] sm:$0xf] %v518_v42  ;;  %v646_v42 = vld [vmem:[%s5022_s26 + $0xea0] sm:$0xf] }
  0xbb   : > { %521 = vst [vmem:[%s5027_s27 + $0x2ac] sm:$0xf] %v520_v43  ;;  %v648_v43 = vld [vmem:[%s5022_s26 + $0xeb0] sm:$0xf] }
  0xbc   : > { %523 = vst [vmem:[%s5027_s27 + $0x2b0] sm:$0xf] %v522_v44  ;;  %v650_v44 = vld [vmem:[%s5022_s26 + $0xec0] sm:$0xf] }
  0xbd   : > { %525 = vst [vmem:[%s5027_s27 + $0x2b4] sm:$0xf] %v524_v45  ;;  %v652_v45 = vld [vmem:[%s5022_s26 + $0xed0] sm:$0xf] }
  0xbe   : > { %527 = vst [vmem:[%s5027_s27 + $0x2b8] sm:$0xf] %v526_v46  ;;  %v654_v46 = vld [vmem:[%s5022_s26 + $0xee0] sm:$0xf] }
  0xbf   : > { %529 = vst [vmem:[%s5027_s27 + $0x2bc] sm:$0xf] %v528_v47  ;;  %v656_v47 = vld [vmem:[%s5022_s26 + $0xef0] sm:$0xf] }
  0xc0   : > { %531 = vst [vmem:[%s5027_s27 + $0x2c0] sm:$0xf] %v530_v48  ;;  %v658_v48 = vld [vmem:[%s5022_s26 + $0xf00] sm:$0xf] }
  0xc1   : > { %533 = vst [vmem:[%s5027_s27 + $0x2c4] sm:$0xf] %v532_v49  ;;  %v660_v49 = vld [vmem:[%s5022_s26 + $0xf10] sm:$0xf] }
  0xc2   : > { %535 = vst [vmem:[%s5027_s27 + $0x2c8] sm:$0xf] %v534_v50  ;;  %v662_v50 = vld [vmem:[%s5022_s26 + $0xf20] sm:$0xf] }
  0xc3   : > { %537 = vst [vmem:[%s5027_s27 + $0x2cc] sm:$0xf] %v536_v51  ;;  %v664_v51 = vld [vmem:[%s5022_s26 + $0xf30] sm:$0xf] }
  0xc4   : > { %539 = vst [vmem:[%s5027_s27 + $0x2d0] sm:$0xf] %v538_v52  ;;  %v666_v52 = vld [vmem:[%s5022_s26 + $0xf40] sm:$0xf] }
  0xc5   : > { %541 = vst [vmem:[%s5027_s27 + $0x2d4] sm:$0xf] %v540_v53  ;;  %v668_v53 = vld [vmem:[%s5022_s26 + $0xf50] sm:$0xf] }
  0xc6   : > { %543 = vst [vmem:[%s5027_s27 + $0x2d8] sm:$0xf] %v542_v54  ;;  %v670_v54 = vld [vmem:[%s5022_s26 + $0xf60] sm:$0xf] }
  0xc7   : > { %545 = vst [vmem:[%s5027_s27 + $0x2dc] sm:$0xf] %v544_v55  ;;  %v672_v55 = vld [vmem:[%s5022_s26 + $0xf70] sm:$0xf] }
  0xc8   : > { %547 = vst [vmem:[%s5027_s27 + $0x2e0] sm:$0xf] %v546_v56  ;;  %v674_v56 = vld [vmem:[%s5022_s26 + $0xf80] sm:$0xf] }
  0xc9   : > { %549 = vst [vmem:[%s5027_s27 + $0x2e4] sm:$0xf] %v548_v57  ;;  %v676_v57 = vld [vmem:[%s5022_s26 + $0xf90] sm:$0xf] }
  0xca   : > { %551 = vst [vmem:[%s5027_s27 + $0x2e8] sm:$0xf] %v550_v58  ;;  %v678_v58 = vld [vmem:[%s5022_s26 + $0xfa0] sm:$0xf] }
  0xcb   : > { %553 = vst [vmem:[%s5027_s27 + $0x2ec] sm:$0xf] %v552_v59  ;;  %v680_v59 = vld [vmem:[%s5022_s26 + $0xfb0] sm:$0xf] }
  0xcc   : > { %555 = vst [vmem:[%s5027_s27 + $0x2f0] sm:$0xf] %v554_v60  ;;  %v682_v60 = vld [vmem:[%s5022_s26 + $0xfc0] sm:$0xf] }
  0xcd   : > { %557 = vst [vmem:[%s5027_s27 + $0x2f4] sm:$0xf] %v556_v61  ;;  %v684_v61 = vld [vmem:[%s5022_s26 + $0xfd0] sm:$0xf] }
  0xce   : > { %559 = vst [vmem:[%s5027_s27 + $0x2f8] sm:$0xf] %v558_v62  ;;  %v686_v62 = vld [vmem:[%s5022_s26 + $0xfe0] sm:$0xf] }
  0xcf   : > { %561 = vst [vmem:[%s5027_s27 + $0x2fc] sm:$0xf] %v560_v63  ;;  %v688_v63 = vld [vmem:[%s5022_s26 + $0xff0] sm:$0xf] }
  0xd0   : > { %563 = vst [vmem:[%s5027_s27 + $0x300] sm:$0xf] %v562_v0  ;;  %v690_v0 = vld [vmem:[%s5022_s26 + $0x1000] sm:$0xf] }
  0xd1   : > { %565 = vst [vmem:[%s5027_s27 + $0x304] sm:$0xf] %v564_v1  ;;  %v692_v1 = vld [vmem:[%s5022_s26 + $0x1010] sm:$0xf] }
  0xd2   : > { %567 = vst [vmem:[%s5027_s27 + $0x308] sm:$0xf] %v566_v2  ;;  %v694_v2 = vld [vmem:[%s5022_s26 + $0x1020] sm:$0xf] }
  0xd3   : > { %569 = vst [vmem:[%s5027_s27 + $0x30c] sm:$0xf] %v568_v3  ;;  %v696_v3 = vld [vmem:[%s5022_s26 + $0x1030] sm:$0xf] }
  0xd4   : > { %571 = vst [vmem:[%s5027_s27 + $0x310] sm:$0xf] %v570_v4  ;;  %v698_v4 = vld [vmem:[%s5022_s26 + $0x1040] sm:$0xf] }
  0xd5   : > { %573 = vst [vmem:[%s5027_s27 + $0x314] sm:$0xf] %v572_v5  ;;  %v700_v5 = vld [vmem:[%s5022_s26 + $0x1050] sm:$0xf] }
  0xd6   : > { %575 = vst [vmem:[%s5027_s27 + $0x318] sm:$0xf] %v574_v6  ;;  %v702_v6 = vld [vmem:[%s5022_s26 + $0x1060] sm:$0xf] }
  0xd7   : > { %577 = vst [vmem:[%s5027_s27 + $0x31c] sm:$0xf] %v576_v7  ;;  %v704_v7 = vld [vmem:[%s5022_s26 + $0x1070] sm:$0xf] }
  0xd8   : > { %579 = vst [vmem:[%s5027_s27 + $0x320] sm:$0xf] %v578_v8  ;;  %v706_v8 = vld [vmem:[%s5022_s26 + $0x1080] sm:$0xf] }
  0xd9   : > { %581 = vst [vmem:[%s5027_s27 + $0x324] sm:$0xf] %v580_v9  ;;  %v708_v9 = vld [vmem:[%s5022_s26 + $0x1090] sm:$0xf] }
  0xda   : > { %583 = vst [vmem:[%s5027_s27 + $0x328] sm:$0xf] %v582_v10  ;;  %v710_v10 = vld [vmem:[%s5022_s26 + $0x10a0] sm:$0xf] }
  0xdb   : > { %585 = vst [vmem:[%s5027_s27 + $0x32c] sm:$0xf] %v584_v11  ;;  %v712_v11 = vld [vmem:[%s5022_s26 + $0x10b0] sm:$0xf] }
  0xdc   : > { %587 = vst [vmem:[%s5027_s27 + $0x330] sm:$0xf] %v586_v12  ;;  %v714_v12 = vld [vmem:[%s5022_s26 + $0x10c0] sm:$0xf] }
  0xdd   : > { %589 = vst [vmem:[%s5027_s27 + $0x334] sm:$0xf] %v588_v13  ;;  %v716_v13 = vld [vmem:[%s5022_s26 + $0x10d0] sm:$0xf] }
  0xde   : > { %591 = vst [vmem:[%s5027_s27 + $0x338] sm:$0xf] %v590_v14  ;;  %v718_v14 = vld [vmem:[%s5022_s26 + $0x10e0] sm:$0xf] }
  0xdf   : > { %593 = vst [vmem:[%s5027_s27 + $0x33c] sm:$0xf] %v592_v15  ;;  %v720_v15 = vld [vmem:[%s5022_s26 + $0x10f0] sm:$0xf] }
  0xe0   : > { %595 = vst [vmem:[%s5027_s27 + $0x340] sm:$0xf] %v594_v16  ;;  %v722_v16 = vld [vmem:[%s5022_s26 + $0x1100] sm:$0xf] }
  0xe1   : > { %597 = vst [vmem:[%s5027_s27 + $0x344] sm:$0xf] %v596_v17  ;;  %v724_v17 = vld [vmem:[%s5022_s26 + $0x1110] sm:$0xf] }
  0xe2   : > { %599 = vst [vmem:[%s5027_s27 + $0x348] sm:$0xf] %v598_v18  ;;  %v726_v18 = vld [vmem:[%s5022_s26 + $0x1120] sm:$0xf] }
  0xe3   : > { %601 = vst [vmem:[%s5027_s27 + $0x34c] sm:$0xf] %v600_v19  ;;  %v728_v19 = vld [vmem:[%s5022_s26 + $0x1130] sm:$0xf] }
  0xe4   : > { %603 = vst [vmem:[%s5027_s27 + $0x350] sm:$0xf] %v602_v20  ;;  %v730_v20 = vld [vmem:[%s5022_s26 + $0x1140] sm:$0xf] }
  0xe5   : > { %605 = vst [vmem:[%s5027_s27 + $0x354] sm:$0xf] %v604_v21  ;;  %v732_v21 = vld [vmem:[%s5022_s26 + $0x1150] sm:$0xf] }
  0xe6   : > { %607 = vst [vmem:[%s5027_s27 + $0x358] sm:$0xf] %v606_v22  ;;  %v734_v22 = vld [vmem:[%s5022_s26 + $0x1160] sm:$0xf] }
  0xe7   : > { %609 = vst [vmem:[%s5027_s27 + $0x35c] sm:$0xf] %v608_v23  ;;  %v736_v23 = vld [vmem:[%s5022_s26 + $0x1170] sm:$0xf] }
  0xe8   : > { %611 = vst [vmem:[%s5027_s27 + $0x360] sm:$0xf] %v610_v24  ;;  %v738_v24 = vld [vmem:[%s5022_s26 + $0x1180] sm:$0xf] }
  0xe9   : > { %613 = vst [vmem:[%s5027_s27 + $0x364] sm:$0xf] %v612_v25  ;;  %v740_v25 = vld [vmem:[%s5022_s26 + $0x1190] sm:$0xf] }
  0xea   : > { %615 = vst [vmem:[%s5027_s27 + $0x368] sm:$0xf] %v614_v26  ;;  %v742_v26 = vld [vmem:[%s5022_s26 + $0x11a0] sm:$0xf] }
  0xeb   : > { %617 = vst [vmem:[%s5027_s27 + $0x36c] sm:$0xf] %v616_v27  ;;  %v744_v27 = vld [vmem:[%s5022_s26 + $0x11b0] sm:$0xf] }
  0xec   : > { %619 = vst [vmem:[%s5027_s27 + $0x370] sm:$0xf] %v618_v28  ;;  %v746_v28 = vld [vmem:[%s5022_s26 + $0x11c0] sm:$0xf] }
  0xed   : > { %621 = vst [vmem:[%s5027_s27 + $0x374] sm:$0xf] %v620_v29  ;;  %v748_v29 = vld [vmem:[%s5022_s26 + $0x11d0] sm:$0xf] }
  0xee   : > { %623 = vst [vmem:[%s5027_s27 + $0x378] sm:$0xf] %v622_v30  ;;  %v750_v30 = vld [vmem:[%s5022_s26 + $0x11e0] sm:$0xf] }
  0xef   : > { %625 = vst [vmem:[%s5027_s27 + $0x37c] sm:$0xf] %v624_v31  ;;  %v752_v31 = vld [vmem:[%s5022_s26 + $0x11f0] sm:$0xf] }
  0xf0   : > { %627 = vst [vmem:[%s5027_s27 + $0x380] sm:$0xf] %v626_v32 }
  0xf1   : > { %629 = vst [vmem:[%s5027_s27 + $0x384] sm:$0xf] %v628_v33 }
  0xf2   : > { %631 = vst [vmem:[%s5027_s27 + $0x388] sm:$0xf] %v630_v34 }
  0xf3   : > { %633 = vst [vmem:[%s5027_s27 + $0x38c] sm:$0xf] %v632_v35 }
  0xf4   : > { %635 = vst [vmem:[%s5027_s27 + $0x390] sm:$0xf] %v634_v36 }
  0xf5   : > { %637 = vst [vmem:[%s5027_s27 + $0x394] sm:$0xf] %v636_v37 }
  0xf6   : > { %639 = vst [vmem:[%s5027_s27 + $0x398] sm:$0xf] %v638_v38 }
  0xf7   : > { %641 = vst [vmem:[%s5027_s27 + $0x39c] sm:$0xf] %v640_v39 }
  0xf8   : > { %643 = vst [vmem:[%s5027_s27 + $0x3a0] sm:$0xf] %v642_v40 }
  0xf9   : > { %645 = vst [vmem:[%s5027_s27 + $0x3a4] sm:$0xf] %v644_v41 }
  0xfa   : > { %647 = vst [vmem:[%s5027_s27 + $0x3a8] sm:$0xf] %v646_v42 }
  0xfb   : > { %649 = vst [vmem:[%s5027_s27 + $0x3ac] sm:$0xf] %v648_v43 }
  0xfc   : > { %651 = vst [vmem:[%s5027_s27 + $0x3b0] sm:$0xf] %v650_v44 }
  0xfd   : > { %653 = vst [vmem:[%s5027_s27 + $0x3b4] sm:$0xf] %v652_v45 }
  0xfe   : > { %655 = vst [vmem:[%s5027_s27 + $0x3b8] sm:$0xf] %v654_v46 }
  0xff   : > { %657 = vst [vmem:[%s5027_s27 + $0x3bc] sm:$0xf] %v656_v47 }
 0x100   : > { %659 = vst [vmem:[%s5027_s27 + $0x3c0] sm:$0xf] %v658_v48 }
 0x101   : > { %661 = vst [vmem:[%s5027_s27 + $0x3c4] sm:$0xf] %v660_v49 }
 0x102   : > { %663 = vst [vmem:[%s5027_s27 + $0x3c8] sm:$0xf] %v662_v50 }
 0x103   : > { %665 = vst [vmem:[%s5027_s27 + $0x3cc] sm:$0xf] %v664_v51 }
 0x104   : > { %667 = vst [vmem:[%s5027_s27 + $0x3d0] sm:$0xf] %v666_v52 }
 0x105   : > { %669 = vst [vmem:[%s5027_s27 + $0x3d4] sm:$0xf] %v668_v53 }
 0x106   : > { %671 = vst [vmem:[%s5027_s27 + $0x3d8] sm:$0xf] %v670_v54 }
 0x107   : > { %673 = vst [vmem:[%s5027_s27 + $0x3dc] sm:$0xf] %v672_v55 }
 0x108   : > { %675 = vst [vmem:[%s5027_s27 + $0x3e0] sm:$0xf] %v674_v56 }
 0x109   : > { %677 = vst [vmem:[%s5027_s27 + $0x3e4] sm:$0xf] %v676_v57 }
 0x10a   : > { %679 = vst [vmem:[%s5027_s27 + $0x3e8] sm:$0xf] %v678_v58 }
 0x10b   : > { %681 = vst [vmem:[%s5027_s27 + $0x3ec] sm:$0xf] %v680_v59 }
 0x10c   : > { %683 = vst [vmem:[%s5027_s27 + $0x3f0] sm:$0xf] %v682_v60 }
 0x10d   : > { %685 = vst [vmem:[%s5027_s27 + $0x3f4] sm:$0xf] %v684_v61 }
 0x10e   : > { %687 = vst [vmem:[%s5027_s27 + $0x3f8] sm:$0xf] %v686_v62 }
 0x10f   : > { %689 = vst [vmem:[%s5027_s27 + $0x3fc] sm:$0xf] %v688_v63 }
 0x110   : > { %691 = vst [vmem:[%s5027_s27 + $0x400] sm:$0xf] %v690_v0 }
 0x111   : > { %693 = vst [vmem:[%s5027_s27 + $0x404] sm:$0xf] %v692_v1 }
 0x112   : > { %695 = vst [vmem:[%s5027_s27 + $0x408] sm:$0xf] %v694_v2 }
 0x113   : > { %697 = vst [vmem:[%s5027_s27 + $0x40c] sm:$0xf] %v696_v3 }
 0x114   : > { %699 = vst [vmem:[%s5027_s27 + $0x410] sm:$0xf] %v698_v4 }
 0x115   : > { %701 = vst [vmem:[%s5027_s27 + $0x414] sm:$0xf] %v700_v5 }
 0x116   : > { %703 = vst [vmem:[%s5027_s27 + $0x418] sm:$0xf] %v702_v6 }
 0x117   : > { %705 = vst [vmem:[%s5027_s27 + $0x41c] sm:$0xf] %v704_v7 }
 0x118   : > { %707 = vst [vmem:[%s5027_s27 + $0x420] sm:$0xf] %v706_v8 }
 0x119   : > { %709 = vst [vmem:[%s5027_s27 + $0x424] sm:$0xf] %v708_v9 }
 0x11a   : > { %711 = vst [vmem:[%s5027_s27 + $0x428] sm:$0xf] %v710_v10 }
 0x11b   : > { %713 = vst [vmem:[%s5027_s27 + $0x42c] sm:$0xf] %v712_v11 }
 0x11c   : > { %715 = vst [vmem:[%s5027_s27 + $0x430] sm:$0xf] %v714_v12 }
 0x11d   : > { %717 = vst [vmem:[%s5027_s27 + $0x434] sm:$0xf] %v716_v13 }
 0x11e   : > { %719 = vst [vmem:[%s5027_s27 + $0x438] sm:$0xf] %v718_v14 }
 0x11f   : > { %721 = vst [vmem:[%s5027_s27 + $0x43c] sm:$0xf] %v720_v15 }
 0x120   : > { %723 = vst [vmem:[%s5027_s27 + $0x440] sm:$0xf] %v722_v16 }
 0x121   : > { %725 = vst [vmem:[%s5027_s27 + $0x444] sm:$0xf] %v724_v17 }
 0x122   : > { %727 = vst [vmem:[%s5027_s27 + $0x448] sm:$0xf] %v726_v18 }
 0x123   : > { %729 = vst [vmem:[%s5027_s27 + $0x44c] sm:$0xf] %v728_v19 }
 0x124   : > { %731 = vst [vmem:[%s5027_s27 + $0x450] sm:$0xf] %v730_v20 }
 0x125   : > { %733 = vst [vmem:[%s5027_s27 + $0x454] sm:$0xf] %v732_v21 }
 0x126   : > { %735 = vst [vmem:[%s5027_s27 + $0x458] sm:$0xf] %v734_v22 }
 0x127   : > { %737 = vst [vmem:[%s5027_s27 + $0x45c] sm:$0xf] %v736_v23 }
 0x128   : > { %739 = vst [vmem:[%s5027_s27 + $0x460] sm:$0xf] %v738_v24 }
 0x129   : > { %741 = vst [vmem:[%s5027_s27 + $0x464] sm:$0xf] %v740_v25 }
 0x12a   : > { %743 = vst [vmem:[%s5027_s27 + $0x468] sm:$0xf] %v742_v26 }
 0x12b   : > { %745 = vst [vmem:[%s5027_s27 + $0x46c] sm:$0xf] %v744_v27 }
 0x12c   : > { %747 = vst [vmem:[%s5027_s27 + $0x470] sm:$0xf] %v746_v28 }
 0x12d   : > { %749 = vst [vmem:[%s5027_s27 + $0x474] sm:$0xf] %v748_v29 }
 0x12e   : > { %751 = vst [vmem:[%s5027_s27 + $0x478] sm:$0xf] %v750_v30 }
 0x12f   : > { %753 = vst [vmem:[%s5027_s27 + $0x47c] sm:$0xf] %v752_v31 }
 0x130 PF: > { %p4152_p6 = scmp.ge.s32.totalorder %s4957_s16, 1  ;;  %p2536_p7 = scmp.lt.s32.totalorder %s4957_s16, 5 }
 0x132   : > { %p2537_p8 = pnand %p4152_p6, %p2536_p7 }
 0x133   : > { %s2543_s28 = sand.u32 (!%p2537_p8), 1, %s4941_s12   ;;  %p2580_p9 = scmp.lt.s32.totalorder (!%p2537_p8), %s4949_s14, 3 }
 0x134   : > { %2540 = sbr.rel (%p2537_p8) target bundleno = 608 (0x260), region = 80 }
 0x135   : > { %s4877_s29 = smul.u32 (!%p2537_p8), 1152, %s2543_s28 }
 0x137   : > { %s5605_s30 = scalar_lea.vmem (!%p2537_p8), [#allocation2], %s4877_s29 }
 0x139   : > { %v4739_v32 = vld [vmem:[%s5605_s30 + $0x38] sm:$0xff]  ;;  %v4738_v36 = vld [vmem:[%s5605_s30 + $0x30] sm:$0xff]  ;;  %v4737_v40 = vld [vmem:[%s5605_s30 + $0x28] sm:$0xff]  ;;  %s5815_s14 = smov (!%p2580_p9, %s4949_s14), 3 }
 0x13a   : > { %v4747_v33 = vld [vmem:[%s5605_s30 + $0x78] sm:$0xff]  ;;  %3792 = vmatpush.bf16.msra.mxu0 %v4739_v32  ;;  %v4746_v37 = vld [vmem:[%s5605_s30 + $0x70] sm:$0xff]  ;;  %v4745_v41 = vld [vmem:[%s5605_s30 + $0x68] sm:$0xff]  ;;  %s2582_s8 = scalar_lea.vmem %s5806_s2, %s5815_s14  ;;  %s4153_s21 = sshll.u32 %s5815_s14, 1 }
 0x13b   : > { %v4755_v34 = vld [vmem:[%s5605_s30 + $0xb8] sm:$0xff]  ;;  %3805 = vmatpush.bf16.msra.mxu1 %v4747_v33  ;;  %v4754_v38 = vld [vmem:[%s5605_s30 + $0xb0] sm:$0xff]  ;;  %v4753_v42 = vld [vmem:[%s5605_s30 + $0xa8] sm:$0xff]  ;;  %s2590_s24 = scalar_lea.vmem %s5807_s3, %s4153_s21 }
 0x13c   : > { %v4763_v35 = vld [vmem:[%s5605_s30 + $0xf8] sm:$0xff]  ;;  %3818 = vmatpush.bf16.msra.mxu2 %v4755_v34  ;;  %v4762_v39 = vld [vmem:[%s5605_s30 + $0xf0] sm:$0xff]  ;;  %v4761_v43 = vld [vmem:[%s5605_s30 + $0xe8] sm:$0xff] }
 0x13d   : > { %3831 = vmatpush.bf16.msra.mxu3 %v4763_v35  ;;  %v4736_v44 = vld [vmem:[%s5605_s30 + $0x20] sm:$0xff]  ;;  %v4735_v48 = vld [vmem:[%s5605_s30 + $0x18] sm:$0xff]  ;;  %v4734_v53 = vld [vmem:[%s5605_s30 + $0x10] sm:$0xff] }
 0x13e   : > { %3793 = vmatpush.bf16.msra.mxu0 %v4738_v36  ;;  %v4744_v45 = vld [vmem:[%s5605_s30 + $0x60] sm:$0xff]  ;;  %v4743_v49 = vld [vmem:[%s5605_s30 + $0x58] sm:$0xff]  ;;  %v4742_v54 = vld [vmem:[%s5605_s30 + $0x50] sm:$0xff] }
 0x13f   : > { %3806 = vmatpush.bf16.msra.mxu1 %v4746_v37  ;;  %v4752_v46 = vld [vmem:[%s5605_s30 + $0xa0] sm:$0xff]  ;;  %v4751_v50 = vld [vmem:[%s5605_s30 + $0x98] sm:$0xff]  ;;  %v4750_v55 = vld [vmem:[%s5605_s30 + $0x90] sm:$0xff] }
 0x140   : > { %3819 = vmatpush.bf16.msra.mxu2 %v4754_v38  ;;  %v4760_v47 = vld [vmem:[%s5605_s30 + $0xe0] sm:$0xff]  ;;  %v4759_v51 = vld [vmem:[%s5605_s30 + $0xd8] sm:$0xff]  ;;  %v4758_v56 = vld [vmem:[%s5605_s30 + $0xd0] sm:$0xff] }
 0x141   : > { %3832 = vmatpush.bf16.msra.mxu3 %v4762_v39  ;;  %v2591_v52 = vld [vmem:[%s5804_s0] sm:$0xff]  ;;  %v4733_v57 = vld [vmem:[%s5605_s30 + $0x8] sm:$0xff]  ;;  %v4732_v61 = vld [vmem:[%s5605_s30] sm:$0xff] }
 0x142   : > { %3794 = vmatpush.bf16.msra.mxu0 %v4737_v40  ;;  %2887 = vst [vmem:[#allocation1] ss:$9 sm:$0xff] %v2591_v52  ;;  %v4741_v58 = vld [vmem:[%s5605_s30 + $0x48] sm:$0xff]  ;;  %v4740_v62 = vld [vmem:[%s5605_s30 + $0x40] sm:$0xff]  ;;  %v4771_v0 = vld [vmem:[%s5605_s30 + $0x138] sm:$0xff] }
 0x143   : > { %3807 = vmatpush.bf16.msra.mxu1 %v4745_v41  ;;  %v4749_v59 = vld [vmem:[%s5605_s30 + $0x88] sm:$0xff]  ;;  %v4748_v63 = vld [vmem:[%s5605_s30 + $0x80] sm:$0xff]  ;;  %v4779_v1 = vld [vmem:[%s5605_s30 + $0x178] sm:$0xff] }
 0x144   : > { %3820 = vmatpush.bf16.msra.mxu2 %v4753_v42  ;;  %v4757_v60 = vld [vmem:[%s5605_s30 + $0xc8] sm:$0xff]  ;;  %v4787_v2 = vld [vmem:[%s5605_s30 + $0x1b8] sm:$0xff]  ;;  %v4756_v3 = vld [vmem:[%s5605_s30 + $0xc0] sm:$0xff] }
 0x145   : > { %3833 = vmatpush.bf16.msra.mxu3 %v4761_v43  ;;  %v4795_v4 = vld [vmem:[%s5605_s30 + $0x1f8] sm:$0xff]  ;;  %v4770_v6 = vld [vmem:[%s5605_s30 + $0x130] sm:$0xff]  ;;  %v4769_v12 = vld [vmem:[%s5605_s30 + $0x128] sm:$0xff] }
 0x146   : > { %3795 = vmatpush.bf16.msra.mxu0 %v4736_v44  ;;  %v4778_v8 = vld [vmem:[%s5605_s30 + $0x170] sm:$0xff]  ;;  %v2592_v17 = vld [vmem:[%s5804_s0 + $0x8] sm:$0xff]  ;;  %v4777_v19 = vld [vmem:[%s5605_s30 + $0x168] sm:$0xff] }
 0x147   : > { %3808 = vmatpush.bf16.msra.mxu1 %v4744_v45  ;;  %v4786_v9 = vld [vmem:[%s5605_s30 + $0x1b0] sm:$0xff]  ;;  %v4785_v20 = vld [vmem:[%s5605_s30 + $0x1a8] sm:$0xff]  ;;  %v4768_v22 = vld [vmem:[%s5605_s30 + $0x120] sm:$0xff] }
 0x148   : > { %3821 = vmatpush.bf16.msra.mxu2 %v4752_v46  ;;  %v4794_v11 = vld [vmem:[%s5605_s30 + $0x1f0] sm:$0xff]  ;;  %v4793_v21 = vld [vmem:[%s5605_s30 + $0x1e8] sm:$0xff]  ;;  %v4776_v23 = vld [vmem:[%s5605_s30 + $0x160] sm:$0xff] }
 0x149   : > { %3834 = vmatpush.bf16.msra.mxu3 %v4760_v47  ;;  %v2888_v5 = vld [vmem:[#allocation1] sm:$0xff]  ;;  %v2890_v7 = vld [vmem:[#allocation1 + $0x12] sm:$0xff]  ;;  %v2889_v10 = vld [vmem:[#allocation1 + $0x9] sm:$0xff] }
 0x14a   : > { %3796 = vmatpush.bf16.msra.mxu0 %v4735_v48  ;;  %v2891_v13 = vld [vmem:[#allocation1 + $0x1b] sm:$0xff]  ;;  %v5661_v15 = vld [vmem:[#allocation1 + $0x24] sm:$0xff]  ;;  %v5668_v18 = vld [vmem:[#allocation1 + $0x2d] sm:$0xff] }
 0x14b   : > { %3809 = vmatpush.bf16.msra.mxu1 %v4743_v49  ;;  %v5659_v14 = vld [vmem:[#allocation1 + $0x36] sm:$0xff]  ;;  %v5663_v16 = vld [vmem:[#allocation1 + $0x3f] sm:$0xff]  ;;  %v4784_v24 = vld [vmem:[%s5605_s30 + $0x1a0] sm:$0xff] }
 0x14c   : > { %3822 = vmatpush.bf16.msra.mxu2 %v4751_v50  ;;  %2897 = vst [vmem:[#allocation1] ss:$9 sm:$0xff] %v2592_v17  ;;  %v4792_v25 = vld [vmem:[%s5605_s30 + $0x1e0] sm:$0xff]  ;;  %v4767_v26 = vld [vmem:[%s5605_s30 + $0x118] sm:$0xff]  ;;  %v4766_v30 = vld [vmem:[%s5605_s30 + $0x110] sm:$0xff] }
 0x14d   : > { %3835 = vmatpush.bf16.msra.mxu3 %v4759_v51  ;;  %v4775_v27 = vld [vmem:[%s5605_s30 + $0x158] sm:$0xff]  ;;  %v4774_v31 = vld [vmem:[%s5605_s30 + $0x150] sm:$0xff]  ;;  %v4765_v34 = vld [vmem:[%s5605_s30 + $0x108] sm:$0xff] }
 0x14e   : > { %3797 = vmatpush.bf16.msra.mxu0 %v4734_v53  ;;  %v4783_v28 = vld [vmem:[%s5605_s30 + $0x198] sm:$0xff]  ;;  %v4782_v32 = vld [vmem:[%s5605_s30 + $0x190] sm:$0xff]  ;;  %v4773_v35 = vld [vmem:[%s5605_s30 + $0x148] sm:$0xff] }
 0x14f   : > { %3810 = vmatpush.bf16.msra.mxu1 %v4742_v54  ;;  %v4791_v29 = vld [vmem:[%s5605_s30 + $0x1d8] sm:$0xff]  ;;  %v4790_v33 = vld [vmem:[%s5605_s30 + $0x1d0] sm:$0xff]  ;;  %v4781_v36 = vld [vmem:[%s5605_s30 + $0x188] sm:$0xff] }
 0x150   : > { %3823 = vmatpush.bf16.msra.mxu2 %v4750_v55  ;;  %v4789_v37 = vld [vmem:[%s5605_s30 + $0x1c8] sm:$0xff]  ;;  %v4764_v38 = vld [vmem:[%s5605_s30 + $0x100] sm:$0xff]  ;;  %v4803_v41 = vld [vmem:[%s5605_s30 + $0x238] sm:$0xff] }
 0x151   : > { %3836 = vmatpush.bf16.msra.mxu3 %v4758_v56  ;;  %v4772_v39 = vld [vmem:[%s5605_s30 + $0x140] sm:$0xff]  ;;  %v4811_v42 = vld [vmem:[%s5605_s30 + $0x278] sm:$0xff]  ;;  %v4802_v46 = vld [vmem:[%s5605_s30 + $0x230] sm:$0xff] }
 0x152   : > { %3798 = vmatpush.bf16.msra.mxu0 %v4733_v57  ;;  %v4780_v40 = vld [vmem:[%s5605_s30 + $0x180] sm:$0xff]  ;;  %v4819_v43 = vld [vmem:[%s5605_s30 + $0x2b8] sm:$0xff]  ;;  %v4810_v47 = vld [vmem:[%s5605_s30 + $0x270] sm:$0xff] }
 0x153   : > { %3811 = vmatpush.bf16.msra.mxu1 %v4741_v58  ;;  %v4788_v44 = vld [vmem:[%s5605_s30 + $0x1c0] sm:$0xff]  ;;  %v4827_v45 = vld [vmem:[%s5605_s30 + $0x2f8] sm:$0xff]  ;;  %v4818_v48 = vld [vmem:[%s5605_s30 + $0x2b0] sm:$0xff] }
 0x154   : > { %3824 = vmatpush.bf16.msra.mxu2 %v4749_v59  ;;  %v4826_v49 = vld [vmem:[%s5605_s30 + $0x2f0] sm:$0xff]  ;;  %v4801_v50 = vld [vmem:[%s5605_s30 + $0x228] sm:$0xff]  ;;  %v4800_v54 = vld [vmem:[%s5605_s30 + $0x220] sm:$0xff] }
 0x155   : > { %3837 = vmatpush.bf16.msra.mxu3 %v4757_v60  ;;  %v4809_v51 = vld [vmem:[%s5605_s30 + $0x268] sm:$0xff]  ;;  %v4808_v55 = vld [vmem:[%s5605_s30 + $0x260] sm:$0xff]  ;;  %v4799_v58 = vld [vmem:[%s5605_s30 + $0x218] sm:$0xff] }
 0x156   : > { %3799 = vmatpush.bf16.msra.mxu0 %v4732_v61  ;;  %v4817_v52 = vld [vmem:[%s5605_s30 + $0x2a8] sm:$0xff]  ;;  %v4816_v56 = vld [vmem:[%s5605_s30 + $0x2a0] sm:$0xff]  ;;  %v4807_v59 = vld [vmem:[%s5605_s30 + $0x258] sm:$0xff] }
 0x157   : > { %3812 = vmatpush.bf16.msra.mxu1 %v4740_v62  ;;  %v4825_v53 = vld [vmem:[%s5605_s30 + $0x2e8] sm:$0xff]  ;;  %v4824_v57 = vld [vmem:[%s5605_s30 + $0x2e0] sm:$0xff]  ;;  %v4815_v60 = vld [vmem:[%s5605_s30 + $0x298] sm:$0xff] }
 0x158   : > { %3825 = vmatpush.bf16.msra.mxu2 %v4748_v63  ;;  %v4823_v61 = vld [vmem:[%s5605_s30 + $0x2d8] sm:$0xff]  ;;  %v4798_v62 = vld [vmem:[%s5605_s30 + $0x210] sm:$0xff]  ;;  %v2899_v17 = vld [vmem:[#allocation1 + $0x9] sm:$0xff] }
 0x159   : > { %3838 = vmatpush.bf16.msra.mxu3 %v4756_v3  ;;  %3800 = vmatmul.bf16.vlgmr.msra.gmra.mxu0 %v2888_v5  ;;  %v4806_v63 = vld [vmem:[%s5605_s30 + $0x250] sm:$0xff]  ;;  %v4805_v3 = vld [vmem:[%s5605_s30 + $0x248] sm:$0xff] }
 0x15a   : > { %3844 = vmatpush.bf16.msrb.mxu0 %v4771_v0  ;;  %3813 = vmatmul.bf16.vlgmr.msra.gmra.mxu1 %v2889_v10  ;;  %v4814_v0 = vld [vmem:[%s5605_s30 + $0x290] sm:$0xff]  ;;  %v4821_v5 = vld [vmem:[%s5605_s30 + $0x2c8] sm:$0xff]  ;;  %v4843_v10 = vld [vmem:[%s5605_s30 + $0x378] sm:$0xff] }
 0x15b   : > { %3857 = vmatpush.bf16.msrb.mxu1 %v4779_v1  ;;  %3826 = vmatmul.bf16.vlgmr.msra.gmra.mxu2 %v2890_v7  ;;  %v4822_v1 = vld [vmem:[%s5605_s30 + $0x2d0] sm:$0xff]  ;;  %v4804_v7 = vld [vmem:[%s5605_s30 + $0x240] sm:$0xff] }
 0x15c   : > { %3870 = vmatpush.bf16.msrb.mxu2 %v4787_v2  ;;  %3839 = vmatmul.bf16.vlgmr.msra.gmra.mxu3 %v2891_v13  ;;  %v4797_v2 = vld [vmem:[%s5605_s30 + $0x208] sm:$0xff]  ;;  %v2898_v13 = vld [vmem:[#allocation1] sm:$0xff] }
 0x15d   : > { %3883 = vmatpush.bf16.msrb.mxu3 %v4795_v4  ;;  %v4813_v4 = vld [vmem:[%s5605_s30 + $0x288] sm:$0xff] }
 0x15e   : > { %3845 = vmatpush.bf16.msrb.mxu0 %v4770_v6  ;;  %v4796_v6 = vld [vmem:[%s5605_s30 + $0x200] sm:$0xff] }
 0x15f   : > { %3858 = vmatpush.bf16.msrb.mxu1 %v4778_v8  ;;  %v4812_v8 = vld [vmem:[%s5605_s30 + $0x280] sm:$0xff] }
 0x160   : > { %3871 = vmatpush.bf16.msrb.mxu2 %v4786_v9  ;;  %v4835_v9 = vld [vmem:[%s5605_s30 + $0x338] sm:$0xff] }
 0x161   : > { %3884 = vmatpush.bf16.msrb.mxu3 %v4794_v11  ;;  %v4851_v11 = vld [vmem:[%s5605_s30 + $0x3b8] sm:$0xff] }
 0x162   : > { %3846 = vmatpush.bf16.msrb.mxu0 %v4769_v12  ;;  %v4820_v12 = vld [vmem:[%s5605_s30 + $0x2c0] sm:$0xff] }
 0x163   : > { %3859 = vmatpush.bf16.msrb.mxu1 %v4777_v19  ;;  %v2901_v19 = vld [vmem:[#allocation1 + $0x1b] sm:$0xff] }
 0x164   : > { %3872 = vmatpush.bf16.msrb.mxu2 %v4785_v20  ;;  %v4850_v20 = vld [vmem:[%s5605_s30 + $0x3b0] sm:$0xff] }
 0x165   : > { %3885 = vmatpush.bf16.msrb.mxu3 %v4793_v21  ;;  %v4858_v21 = vld [vmem:[%s5605_s30 + $0x3f0] sm:$0xff] }
 0x166   : > { %3847 = vmatpush.bf16.msrb.mxu0 %v4768_v22  ;;  %v4833_v22 = vld [vmem:[%s5605_s30 + $0x328] sm:$0xff] }
 0x167   : > { %3860 = vmatpush.bf16.msrb.mxu1 %v4776_v23  ;;  %v4841_v23 = vld [vmem:[%s5605_s30 + $0x368] sm:$0xff] }
 0x168   : > { %3873 = vmatpush.bf16.msrb.mxu2 %v4784_v24  ;;  %v4849_v24 = vld [vmem:[%s5605_s30 + $0x3a8] sm:$0xff] }
 0x169   : > { %3886 = vmatpush.bf16.msrb.mxu3 %v4792_v25  ;;  %v4857_v25 = vld [vmem:[%s5605_s30 + $0x3e8] sm:$0xff] }
 0x16a   : > { %3848 = vmatpush.bf16.msrb.mxu0 %v4767_v26  ;;  %v4832_v26 = vld [vmem:[%s5605_s30 + $0x320] sm:$0xff] }
 0x16b   : > { %3861 = vmatpush.bf16.msrb.mxu1 %v4775_v27  ;;  %v4840_v27 = vld [vmem:[%s5605_s30 + $0x360] sm:$0xff] }
 0x16c   : > { %3874 = vmatpush.bf16.msrb.mxu2 %v4783_v28  ;;  %v4848_v28 = vld [vmem:[%s5605_s30 + $0x3a0] sm:$0xff] }
 0x16d   : > { %3887 = vmatpush.bf16.msrb.mxu3 %v4791_v29  ;;  %v4856_v29 = vld [vmem:[%s5605_s30 + $0x3e0] sm:$0xff] }
 0x16e   : > { %3849 = vmatpush.bf16.msrb.mxu0 %v4766_v30  ;;  %v4831_v30 = vld [vmem:[%s5605_s30 + $0x318] sm:$0xff] }
 0x16f   : > { %3862 = vmatpush.bf16.msrb.mxu1 %v4774_v31  ;;  %v4839_v31 = vld [vmem:[%s5605_s30 + $0x358] sm:$0xff] }
 0x170   : > { %3875 = vmatpush.bf16.msrb.mxu2 %v4782_v32  ;;  %v4847_v32 = vld [vmem:[%s5605_s30 + $0x398] sm:$0xff] }
 0x171   : > { %3888 = vmatpush.bf16.msrb.mxu3 %v4790_v33  ;;  %v4855_v33 = vld [vmem:[%s5605_s30 + $0x3d8] sm:$0xff] }
 0x172   : > { %3850 = vmatpush.bf16.msrb.mxu0 %v4765_v34  ;;  %v4830_v34 = vld [vmem:[%s5605_s30 + $0x310] sm:$0xff] }
 0x173   : > { %3863 = vmatpush.bf16.msrb.mxu1 %v4773_v35  ;;  %v4838_v35 = vld [vmem:[%s5605_s30 + $0x350] sm:$0xff] }
 0x174   : > { %3876 = vmatpush.bf16.msrb.mxu2 %v4781_v36  ;;  %v4846_v36 = vld [vmem:[%s5605_s30 + $0x390] sm:$0xff] }
 0x175   : > { %3889 = vmatpush.bf16.msrb.mxu3 %v4789_v37  ;;  %v4854_v37 = vld [vmem:[%s5605_s30 + $0x3d0] sm:$0xff] }
 0x176   : > { %3851 = vmatpush.bf16.msrb.mxu0 %v4764_v38  ;;  %v4829_v38 = vld [vmem:[%s5605_s30 + $0x308] sm:$0xff] }
 0x177   : > { %3864 = vmatpush.bf16.msrb.mxu1 %v4772_v39  ;;  %v4837_v39 = vld [vmem:[%s5605_s30 + $0x348] sm:$0xff] }
 0x178   : > { %3877 = vmatpush.bf16.msrb.mxu2 %v4780_v40  ;;  %v2902_v40 = vld [vmem:[#allocation1 + $0x24] sm:$0xff] }
 0x179   : > { %3890 = vmatpush.bf16.msrb.mxu3 %v4788_v44  ;;  %3852 = vmatmul.bf16.vlgmr.msrb.gmra.mxu0 %v5661_v15  ;;  %v2900_v15 = vld [vmem:[#allocation1 + $0x12] sm:$0xff]  ;;  %v2593_v44 = vld [vmem:[%s5804_s0 + $0x10] sm:$0x3] }
 0x17a   : > { %3896 = vmatpush.bf16.msra.mxu0 %v4803_v41  ;;  %3865 = vmatmul.bf16.vlgmr.msrb.gmra.mxu1 %v5668_v18  ;;  %v4842_v18 = vld [vmem:[%s5605_s30 + $0x370] sm:$0xff] }
 0x17b   : > { %3909 = vmatpush.bf16.msra.mxu1 %v4811_v42  ;;  %3878 = vmatmul.bf16.vlgmr.msrb.gmra.mxu2 %v5659_v14  ;;  %v4859_v14 = vld [vmem:[%s5605_s30 + $0x3f8] sm:$0xff]  ;;  %v2904_v41 = vld [vmem:[#allocation1 + $0x36] sm:$0xff]  ;;  %v2903_v42 = vld [vmem:[#allocation1 + $0x2d] sm:$0xff] }
 0x17c   : > { %3922 = vmatpush.bf16.msra.mxu2 %v4819_v43  ;;  %3891 = vmatmul.bf16.vlgmr.msrb.gmra.mxu3 %v5663_v16  ;;  %v4834_v16 = vld [vmem:[%s5605_s30 + $0x330] sm:$0xff] }
 0x17d   : > { %3935 = vmatpush.bf16.msra.mxu3 %v4827_v45  ;;  %v2905_v43 = vld [vmem:[#allocation1 + $0x3f] sm:$0xff]  ;;  %v4845_v45 = vld [vmem:[%s5605_s30 + $0x388] sm:$0xff] }
 0x17e   : > { %3897 = vmatpush.bf16.msra.mxu0 %v4802_v46  ;;  %2907 = vst [vmem:[#allocation1] ss:$9 sm:$0xff] %v2593_v44  ;;  %v4853_v46 = vld [vmem:[%s5605_s30 + $0x3c8] sm:$0xff] }
 0x17f   : > { %3910 = vmatpush.bf16.msra.mxu1 %v4810_v47  ;;  %v4828_v47 = vld [vmem:[%s5605_s30 + $0x300] sm:$0xff] }
 0x180   : > { %3923 = vmatpush.bf16.msra.mxu2 %v4818_v48  ;;  %v4836_v48 = vld [vmem:[%s5605_s30 + $0x340] sm:$0xff] }
 0x181   : > { %3936 = vmatpush.bf16.msra.mxu3 %v4826_v49  ;;  %v4867_v49 = vld [vmem:[%s5605_s30 + $0x438] sm:$0xff] }
 0x182   : > { %3898 = vmatpush.bf16.msra.mxu0 %v4801_v50  ;;  %v4844_v50 = vld [vmem:[%s5605_s30 + $0x380] sm:$0xff] }
 0x183   : > { %3911 = vmatpush.bf16.msra.mxu1 %v4809_v51  ;;  %v4875_v51 = vld [vmem:[%s5605_s30 + $0x478] sm:$0xff] }
 0x184   : > { %3924 = vmatpush.bf16.msra.mxu2 %v4817_v52  ;;  %v4852_v52 = vld [vmem:[%s5605_s30 + $0x3c0] sm:$0xff] }
 0x185   : > { %3937 = vmatpush.bf16.msra.mxu3 %v4825_v53  ;;  %v4866_v53 = vld [vmem:[%s5605_s30 + $0x430] sm:$0xff] }
 0x186   : > { %3899 = vmatpush.bf16.msra.mxu0 %v4800_v54  ;;  %v4874_v54 = vld [vmem:[%s5605_s30 + $0x470] sm:$0xff] }
 0x187   : > { %3912 = vmatpush.bf16.msra.mxu1 %v4808_v55  ;;  %v4865_v55 = vld [vmem:[%s5605_s30 + $0x428] sm:$0xff] }
 0x188   : > { %3925 = vmatpush.bf16.msra.mxu2 %v4816_v56  ;;  %v4873_v56 = vld [vmem:[%s5605_s30 + $0x468] sm:$0xff] }
 0x189   : > { %3938 = vmatpush.bf16.msra.mxu3 %v4824_v57  ;;  %v4864_v57 = vld [vmem:[%s5605_s30 + $0x420] sm:$0xff] }
 0x18a   : > { %3900 = vmatpush.bf16.msra.mxu0 %v4799_v58  ;;  %v4872_v58 = vld [vmem:[%s5605_s30 + $0x460] sm:$0xff] }
 0x18b   : > { %3913 = vmatpush.bf16.msra.mxu1 %v4807_v59  ;;  %v4863_v59 = vld [vmem:[%s5605_s30 + $0x418] sm:$0xff] }
 0x18c   : > { %3926 = vmatpush.bf16.msra.mxu2 %v4815_v60  ;;  %v4871_v60 = vld [vmem:[%s5605_s30 + $0x458] sm:$0xff] }
 0x18d   : > { %3939 = vmatpush.bf16.msra.mxu3 %v4823_v61  ;;  %v4862_v61 = vld [vmem:[%s5605_s30 + $0x410] sm:$0xff] }
 0x18e   : > { %3901 = vmatpush.bf16.msra.mxu0 %v4798_v62  ;;  %v4870_v62 = vld [vmem:[%s5605_s30 + $0x450] sm:$0xff] }
 0x18f   : > { %3914 = vmatpush.bf16.msra.mxu1 %v4806_v63  ;;  %v4861_v63 = vld [vmem:[%s5605_s30 + $0x408] sm:$0xff] }
 0x190   : > { %3927 = vmatpush.bf16.msra.mxu2 %v4814_v0  ;;  %v4869_v0 = vld [vmem:[%s5605_s30 + $0x448] sm:$0xff] }
 0x191   : > { %3940 = vmatpush.bf16.msra.mxu3 %v4822_v1  ;;  %v4860_v1 = vld [vmem:[%s5605_s30 + $0x400] sm:$0xff] }
 0x192   : > { %3902 = vmatpush.bf16.msra.mxu0 %v4797_v2  ;;  %v4868_v2 = vld [vmem:[%s5605_s30 + $0x440] sm:$0xff] }
 0x193   : > { %3915 = vmatpush.bf16.msra.mxu1 %v4805_v3  ;;  %v2908_v3 = vld [vmem:[#allocation1] sm:$0xff] }
 0x194   : > { %3928 = vmatpush.bf16.msra.mxu2 %v4813_v4  ;;  %v2909_v4 = vld [vmem:[#allocation1 + $0x9] sm:$0xff] }
 0x195   : > { %3941 = vmatpush.bf16.msra.mxu3 %v4821_v5  ;;  %v4918_v5 = vld [vmem:[%s2582_s8] ss:$0 sm:$0xff] }
 0x196   : > { %3903 = vmatpush.bf16.msra.mxu0 %v4796_v6 }
 0x197   : > { %3916 = vmatpush.bf16.msra.mxu1 %v4804_v7 }
 0x198   : > { %3929 = vmatpush.bf16.msra.mxu2 %v4812_v8 }
 0x199   : > { %3942 = vmatpush.bf16.msra.mxu3 %v4820_v12  ;;  %3904 = vmatmul.bf16.vlgmr.msra.gmra.mxu0 %v2898_v13 }
 0x19a   : > { %3948 = vmatpush.bf16.msrb.mxu0 %v4835_v9  ;;  %3917 = vmatmul.bf16.vlgmr.msra.gmra.mxu1 %v2899_v17 }
 0x19b   : > { %3961 = vmatpush.bf16.msrb.mxu1 %v4843_v10  ;;  %3930 = vmatmul.bf16.vlgmr.msra.gmra.mxu2 %v2900_v15 }
 0x19c   : > { %3974 = vmatpush.bf16.msrb.mxu2 %v4851_v11  ;;  %3943 = vmatmul.bf16.vlgmr.msra.gmra.mxu3 %v2901_v19 }
 0x19d   : > { %3987 = vmatpush.bf16.msrb.mxu3 %v4859_v14 }
 0x19e   : > { %3949 = vmatpush.bf16.msrb.mxu0 %v4834_v16 }
 0x19f   : > { %3962 = vmatpush.bf16.msrb.mxu1 %v4842_v18 }
 0x1a0   : > { %3975 = vmatpush.bf16.msrb.mxu2 %v4850_v20 }
 0x1a1   : > { %3988 = vmatpush.bf16.msrb.mxu3 %v4858_v21 }
 0x1a2   : > { %3950 = vmatpush.bf16.msrb.mxu0 %v4833_v22 }
 0x1a3   : > { %3963 = vmatpush.bf16.msrb.mxu1 %v4841_v23 }
 0x1a4   : > { %3976 = vmatpush.bf16.msrb.mxu2 %v4849_v24 }
 0x1a5   : > { %3989 = vmatpush.bf16.msrb.mxu3 %v4857_v25 }
 0x1a6   : > { %3951 = vmatpush.bf16.msrb.mxu0 %v4832_v26 }
 0x1a7   : > { %3964 = vmatpush.bf16.msrb.mxu1 %v4840_v27 }
 0x1a8   : > { %3977 = vmatpush.bf16.msrb.mxu2 %v4848_v28 }
 0x1a9   : > { %3990 = vmatpush.bf16.msrb.mxu3 %v4856_v29 }
 0x1aa   : > { %3952 = vmatpush.bf16.msrb.mxu0 %v4831_v30 }
 0x1ab   : > { %3965 = vmatpush.bf16.msrb.mxu1 %v4839_v31 }
 0x1ac   : > { %3978 = vmatpush.bf16.msrb.mxu2 %v4847_v32 }
 0x1ad   : > { %3991 = vmatpush.bf16.msrb.mxu3 %v4855_v33 }
 0x1ae   : > { %3953 = vmatpush.bf16.msrb.mxu0 %v4830_v34 }
 0x1af   : > { %3966 = vmatpush.bf16.msrb.mxu1 %v4838_v35 }
 0x1b0   : > { %3979 = vmatpush.bf16.msrb.mxu2 %v4846_v36 }
 0x1b1   : > { %3992 = vmatpush.bf16.msrb.mxu3 %v4854_v37 }
 0x1b2   : > { %3954 = vmatpush.bf16.msrb.mxu0 %v4829_v38 }
 0x1b3   : > { %3967 = vmatpush.bf16.msrb.mxu1 %v4837_v39 }
 0x1b4   : > { %3980 = vmatpush.bf16.msrb.mxu2 %v4845_v45 }
 0x1b5   : > { %3993 = vmatpush.bf16.msrb.mxu3 %v4853_v46 }
 0x1b6   : > { %3955 = vmatpush.bf16.msrb.mxu0 %v4828_v47 }
 0x1b7   : > { %3968 = vmatpush.bf16.msrb.mxu1 %v4836_v48 }
 0x1b8   : > { %3981 = vmatpush.bf16.msrb.mxu2 %v4844_v50 }
 0x1b9   : > { %3994 = vmatpush.bf16.msrb.mxu3 %v4852_v52  ;;  %3956 = vmatmul.bf16.vlgmr.msrb.gmra.mxu0 %v2902_v40 }
 0x1ba   : > { %4000 = vmatpush.bf16.msra.mxu0 %v4867_v49  ;;  %3969 = vmatmul.bf16.vlgmr.msrb.gmra.mxu1 %v2903_v42 }
 0x1bb   : > { %4013 = vmatpush.bf16.msra.mxu1 %v4875_v51  ;;  %3982 = vmatmul.bf16.vlgmr.msrb.gmra.mxu2 %v2904_v41 }
 0x1bc   : > { %3995 = vmatmul.bf16.vlgmr.msrb.gmra.mxu3 %v2905_v43 }
 0x1be   : > { %4001 = vmatpush.bf16.msra.mxu0 %v4866_v53 }
 0x1bf   : > { %4014 = vmatpush.bf16.msra.mxu1 %v4874_v54 }
 0x1c2   : > { %4002 = vmatpush.bf16.msra.mxu0 %v4865_v55 }
 0x1c3   : > { %4015 = vmatpush.bf16.msra.mxu1 %v4873_v56 }
 0x1c6   : > { %4003 = vmatpush.bf16.msra.mxu0 %v4864_v57 }
 0x1c7   : > { %4016 = vmatpush.bf16.msra.mxu1 %v4872_v58 }
 0x1ca   : > { %4004 = vmatpush.bf16.msra.mxu0 %v4863_v59 }
 0x1cb   : > { %4017 = vmatpush.bf16.msra.mxu1 %v4871_v60 }
 0x1ce   : > { %4005 = vmatpush.bf16.msra.mxu0 %v4862_v61 }
 0x1cf   : > { %4018 = vmatpush.bf16.msra.mxu1 %v4870_v62 }
 0x1d2   : > { %4006 = vmatpush.bf16.msra.mxu0 %v4861_v63 }
 0x1d3   : > { %4019 = vmatpush.bf16.msra.mxu1 %v4869_v0 }
 0x1d6   : > { %4007 = vmatpush.bf16.msra.mxu0 %v4860_v1  ;;  %v3801_v6 = vpop.f32.mrf.mxu0 }
 0x1d7   : > { %4020 = vmatpush.bf16.msra.mxu1 %v4868_v2  ;;  %v3802_v7 = vadd.f32 %v4918_v5, %v3801_v6  ;;  %v3814_v8 = vpop.f32.mrf.mxu1 }
 0x1d9   : > { %4008 = vmatmul.bf16.vlgmr.msra.gmra.mxu0 %v2908_v3  ;;  %v3815_v9 = vadd.f32 %v3814_v8, %v3802_v7 }
 0x1da   : > { %4021 = vmatmul.bf16.vlgmr.msra.gmra.mxu1 %v2909_v4 }
 0x1de   : > { %v3827_v10 = vpop.f32.mrf.mxu2  ;;  %v3803_v12 = vpop.f32.mrf.mxu0 }
 0x1df   : > { %v3828_v11 = vadd.f32 %v3827_v10, %v3815_v9  ;;  %v3840_v13 = vpop.f32.mrf.mxu3  ;;  %v3816_v14 = vpop.f32.mrf.mxu1 }
 0x1e1   : > { %v3841_v15 = vadd.f32 %v3840_v13, %v3828_v11 }
 0x1e6   : > { %v3829_v16 = vpop.f32.mrf.mxu2 }
 0x1e7   : > { %v3842_v17 = vpop.f32.mrf.mxu3 }
 0x1f6   : > { %v3853_v18 = vpop.f32.mrf.mxu0 }
 0x1f7   : > { %v3866_v19 = vpop.f32.mrf.mxu1  ;;  %v3854_v34 = vadd.f32 %v3853_v18, %v3841_v15 }
 0x1f9   : > { %v3867_v35 = vadd.f32 %v3866_v19, %v3854_v34 }
 0x1fe   : > { %v3879_v20 = vpop.f32.mrf.mxu2  ;;  %v3855_v22 = vpop.f32.mrf.mxu0 }
 0x1ff   : > { %v3892_v21 = vpop.f32.mrf.mxu3  ;;  %v3868_v23 = vpop.f32.mrf.mxu1  ;;  %v3880_v36 = vadd.f32 %v3879_v20, %v3867_v35 }
 0x201   : > { %v3893_v39 = vadd.f32 %v3892_v21, %v3880_v36 }
 0x206   : > { %v3881_v24 = vpop.f32.mrf.mxu2 }
 0x207   : > { %v3894_v25 = vpop.f32.mrf.mxu3 }
 0x216   : > { %v3905_v26 = vpop.f32.mrf.mxu0 }
 0x217   : > { %v3918_v27 = vpop.f32.mrf.mxu1  ;;  %v3906_v40 = vadd.f32 %v3905_v26, %v3893_v39 }
 0x219   : > { %v3919_v45 = vadd.f32 %v3918_v27, %v3906_v40 }
 0x21e   : > { %v3931_v28 = vpop.f32.mrf.mxu2  ;;  %v3907_v29 = vpop.f32.mrf.mxu0 }
 0x21f   : > { %v3944_v30 = vpop.f32.mrf.mxu3  ;;  %v3920_v31 = vpop.f32.mrf.mxu1  ;;  %v3932_v46 = vadd.f32 %v3931_v28, %v3919_v45 }
 0x221   : > { %v3945_v47 = vadd.f32 %v3944_v30, %v3932_v46 }
 0x226   : > { %v3933_v32 = vpop.f32.mrf.mxu2 }
 0x227   : > { %v3946_v33 = vpop.f32.mrf.mxu3 }
 0x236   : > { %v3957_v37 = vpop.f32.mrf.mxu0 }
 0x237   : > { %v3970_v38 = vpop.f32.mrf.mxu1  ;;  %v3958_v50 = vadd.f32 %v3957_v37, %v3945_v47 }
 0x239   : > { %v3971_v51 = vadd.f32 %v3970_v38, %v3958_v50 }
 0x23e   : > { %v3983_v41 = vpop.f32.mrf.mxu2  ;;  %v3959_v42 = vpop.f32.mrf.mxu0 }
 0x23f   : > { %v3996_v43 = vpop.f32.mrf.mxu3  ;;  %v3972_v44 = vpop.f32.mrf.mxu1  ;;  %v3984_v52 = vadd.f32 %v3983_v41, %v3971_v51 }
 0x241   : > { %v3997_v53 = vadd.f32 %v3996_v43, %v3984_v52 }
 0x246   : > { %v3985_v48 = vpop.f32.mrf.mxu2 }
 0x247   : > { %v3998_v49 = vpop.f32.mrf.mxu3 }
 0x256   : > { %v4009_v54 = vpop.f32.mrf.mxu0 }
 0x257   : > { %v4010_v55 = vadd.f32 %v4009_v54, %v3997_v53  ;;  %v4022_v56 = vpop.f32.mrf.mxu1 }
 0x259   : > { %v4023_v57 = vadd.f32 %v4022_v56, %v4010_v55 }
 0x25b   : > { %vm4026_vm0 = vcmp.ge.f32.partialorder %v4023_v57, 0.0  ;;  %v4027_v58 = vmul.f32 0.01, %v4023_v57 }
 0x25d   : > { %v4028_v59 = vsel %vm4026_vm0, %v4023_v57, %v4027_v58 }
 0x25e   : > { %4029 = vst [vmem:[%s2590_s24] sm:$0x3] %v4028_v59  ;;  %v4011_v60 = vpop.f32.mrf.mxu0 }
 0x25f   : > { %v4024_v61 = vpop.f32.mrf.mxu1 }
 0x260 PF: > { %s13_s16 = sadd.s32 1, %s4957_s16   ;;  %s5808_s12 = smov %s4945_s13 }
 0x261   : > { %p10_p10 = scmp.ge.s32.totalorder %s13_s16, 6   ;;  %s5809_s13 = smov %s5014_s20 }
 0x262   : > { %s5810_s14 = smov %s4953_s15  ;;  %s5811_s15 = smov %s5813_s17 }
 0x263   :  { %12 = sbr.rel (!%p10_p10) target bundleno = 3 (0x3), region = 129 }

// kernel: u_net_forward.13
= control target key start
LH: loop header
LB: loop body
LE: loop exit
PB: predicated region body
PF: predicated region fallthrough
CT: control target
= control target key end

     0   :  { %8 = vsyncpa [#allocation3], 0  ;;  %s2733_s0 = inlined_call_operand.vmem [shape: bf16[8,2048], index: 0, kind: input, shape index: {}]   ;;  %s2734_s1 = inlined_call_operand.hbm [shape: bf16[2048,512], index: 1, kind: input, shape index: {}]   ;;  %s2735_s2 = inlined_call_operand.vmem [shape: f32[1,512], index: 2, kind: input, shape index: {}]   ;;  %s2736_s3 = inlined_call_operand.vmem [shape: f32[8,512], index: 3, kind: output, shape index: {}]  }
   0x1   :  { %10 = vsyncpa [#allocation3 + $0x1], 0  ;;  %s2479_s12 = smov 0   ;;  %s2481_s13 = smov 0  }
   0x2   :  { %s2483_s14 = smov 0   ;;  %s2485_s15 = smov 0  }
   0x3   :  { %s2487_s16 = smov 0   ;;  %s2489_s17 = smov 0  }
   0x4 LB: > { %s1663_s18 = sadd.s32 4294967295, %s2454_s17   ;;  %s25_s19 = sadd.s32 1, %s2450_s16  ;;  %s2454_s17 = sphi %s2489_s17, %s16_s17   ;;  %s2450_s16 = sphi %s2487_s16, %s2743_s16   ;;  %s2446_s15 = sphi %s2485_s15, %s2742_s15   ;;  %s2442_s14 = sphi %s2483_s14, %s2741_s14   ;;  %s2438_s13 = sphi %s2481_s13, %s2740_s13   ;;  %s2434_s12 = sphi %s2479_s12, %s2739_s12  }
   0x5   : > { %p26_p0 = scmp.ge.s32.totalorder %s25_s19, 4  ;;  %s61_s20 = sadd.s32 1, %s2442_s14 }
   0x6   : > { %p68_p1 = scmp.ne.s32.totalorder %s2442_s14, %s2438_s13  ;;  %p69_p2 = scmp.eq.s32.totalorder %s2454_s17, 0 }
   0x7   : > { %s2745_s19 = smov (%p26_p0, %s25_s19), 0  ;;  %p74_p4 = scmp.ne.s32.totalorder %s2438_s13, %s2434_s12 }
   0x8   : > { %p2515_p3 = por %p69_p2, %p68_p1  ;;  %s58_s22 = ssub.s32 %s2450_s16, %s2745_s19 }
   0x9   : > { %p75_p5 = scmp.eq.s32.totalorder %s1663_s18, 0  ;;  %p59_p6 = scmp.eq.s32.totalorder %s58_s22, 0 }
   0xa   : > { %p2321_p8 = scmp.lt.s32.totalorder %s2454_s17, 4  ;;  %s160_s25 = sand.u32 1, %s2442_s14  }
   0xb   : > { %p2522_p7 = por %p75_p5, %p74_p4  ;;  %s1669_s26 = sshll.u32 %s2450_s16, 2 }
   0xc   : > { %s2528_s24 = scalar_select %p59_p6, %s2442_s14, %s61_s20  }
   0xd   : > { %s1668_s27 = sshll.u32 %s160_s25, 10  ;;  %s168_s30 = scalar_lea.hbm %s2734_s1, %s1669_s26 }
   0xe   : > { %s169_s4 = sshll.u32 %s168_s30, 4  ;;  %s164_s5 = scalar_lea.vmem [#allocation2], %s1668_s27  ;;  %s170_s4 = int_to_ptr.hbm [resolvable:$true] %s169_s4 }
   0xf   : > { %s171_s6 = sshll.u32 %s164_s5, 4  ;;  %p2318_p9 = pnand %p2321_p8, %p2515_p3  ;;  %s172_s6 = int_to_ptr.vmem [resolvable:$true] %s171_s6 }
  0x10   : > { %p1670_p10 = scmp.ge.s32.totalorder %s2454_s17, 1  ;;  %s161_s7 = scalar_lea.sflag [#allocation3], %s160_s25 }
  0x11   : > { %s2456_s8 = smov 256   ;;  %s2457_s9 = smov 64  }
  0x12   : > { %s2458_s10 = smov 4   ;;  %p185_p11 = scmp.lt.s32.totalorder %s2454_s17, 5 }
  0x13   : > { %2320 = dma.hbm_to_vmem [thread:$0]  (!%p2318_p9), %s170_s4, 16384, %s172_s6, %s161_s7, %s2456_s8, %s2457_s9, %s2458_s10  }
  0x14   : > { %p186_p12 = pnand %p1670_p10, %p185_p11 }
  0x15   : > { %s191_s11 = sand.u32 (!%p186_p12), 1, %s2438_s13  }
  0x16   : > { %189 = sbr.rel (%p186_p12) target bundleno = 299 (0x12b), region = 32  ;;  %s1671_s12 = sshll.u32 (!%p186_p12), %s191_s11, 10 }
  0x17   : > { %s192_s18 = scalar_lea.sflag (!%p186_p12), [#allocation3], %s191_s11  ;;  %s2540_s20 = scalar_lea.vmem (!%p186_p12), [#allocation2], %s1671_s12 }
  0x1b   : > { %2429 = dma.done.wait (%p2522_p7), %s192_s18, 16384  }
  0x1c   : > { %2431 = vsyncadd (%p2522_p7), %s192_s18, 4294950912  ;;  %v2194_v0 = vld [vmem:[%s2540_s20 + $0x38] sm:$0xff]  ;;  %v2193_v4 = vld [vmem:[%s2540_s20 + $0x30] sm:$0xff]  ;;  %p235_p13 = scmp.lt.s32.totalorder %s2446_s15, 3 }
  0x1d   : > { %v2202_v1 = vld [vmem:[%s2540_s20 + $0x78] sm:$0xff]  ;;  %1338 = vmatpush.bf16.msra.mxu0 %v2194_v0  ;;  %v2201_v5 = vld [vmem:[%s2540_s20 + $0x70] sm:$0xff]  ;;  %v2192_v8 = vld [vmem:[%s2540_s20 + $0x28] sm:$0xff] }
  0x1e   : > { %v2210_v2 = vld [vmem:[%s2540_s20 + $0xb8] sm:$0xff]  ;;  %1351 = vmatpush.bf16.msra.mxu1 %v2202_v1  ;;  %v2209_v6 = vld [vmem:[%s2540_s20 + $0xb0] sm:$0xff]  ;;  %v2200_v9 = vld [vmem:[%s2540_s20 + $0x68] sm:$0xff]  ;;  %s2747_s15 = smov (!%p235_p13, %s2446_s15), 3 }
  0x1f   : > { %v2218_v3 = vld [vmem:[%s2540_s20 + $0xf8] sm:$0xff]  ;;  %1364 = vmatpush.bf16.msra.mxu2 %v2210_v2  ;;  %v2217_v7 = vld [vmem:[%s2540_s20 + $0xf0] sm:$0xff]  ;;  %v2208_v10 = vld [vmem:[%s2540_s20 + $0xa8] sm:$0xff]  ;;  %s237_s23 = scalar_lea.vmem %s2735_s2, %s2747_s15 }
  0x20   : > { %1377 = vmatpush.bf16.msra.mxu3 %v2218_v3  ;;  %v2216_v11 = vld [vmem:[%s2540_s20 + $0xe8] sm:$0xff]  ;;  %v2191_v12 = vld [vmem:[%s2540_s20 + $0x20] sm:$0xff]  ;;  %v2190_v16 = vld [vmem:[%s2540_s20 + $0x18] sm:$0xff] }
  0x21   : > { %1339 = vmatpush.bf16.msra.mxu0 %v2193_v4  ;;  %v2199_v13 = vld [vmem:[%s2540_s20 + $0x60] sm:$0xff]  ;;  %v2198_v17 = vld [vmem:[%s2540_s20 + $0x58] sm:$0xff]  ;;  %v2189_v20 = vld [vmem:[%s2540_s20 + $0x10] sm:$0xff] }
  0x22   : > { %1352 = vmatpush.bf16.msra.mxu1 %v2201_v5  ;;  %v2207_v14 = vld [vmem:[%s2540_s20 + $0xa0] sm:$0xff]  ;;  %v2206_v18 = vld [vmem:[%s2540_s20 + $0x98] sm:$0xff]  ;;  %v2197_v21 = vld [vmem:[%s2540_s20 + $0x50] sm:$0xff] }
  0x23   : > { %1365 = vmatpush.bf16.msra.mxu2 %v2209_v6  ;;  %v2215_v15 = vld [vmem:[%s2540_s20 + $0xe0] sm:$0xff]  ;;  %v2214_v19 = vld [vmem:[%s2540_s20 + $0xd8] sm:$0xff]  ;;  %v2205_v22 = vld [vmem:[%s2540_s20 + $0x90] sm:$0xff] }
  0x24   : > { %1378 = vmatpush.bf16.msra.mxu3 %v2217_v7  ;;  %v2213_v23 = vld [vmem:[%s2540_s20 + $0xd0] sm:$0xff]  ;;  %v2188_v24 = vld [vmem:[%s2540_s20 + $0x8] sm:$0xff]  ;;  %v246_v29 = vld [vmem:[%s2733_s0] sm:$0xff] }
  0x25   : > { %1340 = vmatpush.bf16.msra.mxu0 %v2192_v8  ;;  %v2196_v25 = vld [vmem:[%s2540_s20 + $0x48] sm:$0xff]  ;;  %v2187_v30 = vld [vmem:[%s2540_s20] sm:$0xff]  ;;  %v522_v33 = vunpack.c.l.b16 %v246_v29  ;;  %v523_v37 = vunpack.c.h.b16 %v246_v29  ;;  %v2226_v38 = vld [vmem:[%s2540_s20 + $0x138] sm:$0xff] }
  0x26   : > { %1353 = vmatpush.bf16.msra.mxu1 %v2200_v9  ;;  %v2204_v26 = vld [vmem:[%s2540_s20 + $0x88] sm:$0xff]  ;;  %v2195_v31 = vld [vmem:[%s2540_s20 + $0x40] sm:$0xff]  ;;  %v2234_v39 = vld [vmem:[%s2540_s20 + $0x178] sm:$0xff] }
  0x27   : > { %1366 = vmatpush.bf16.msra.mxu2 %v2208_v10  ;;  %v2212_v27 = vld [vmem:[%s2540_s20 + $0xc8] sm:$0xff]  ;;  %v2203_v34 = vld [vmem:[%s2540_s20 + $0x80] sm:$0xff]  ;;  %v2242_v40 = vld [vmem:[%s2540_s20 + $0x1b8] sm:$0xff]  ;;  %v538_v43 = vpack.c.b16 %v522_v33, %v522_v33  ;;  %v539_v45 = vpack.c.b16 %v523_v37, %v523_v37 }
  0x28   : > { %1379 = vmatpush.bf16.msra.mxu3 %v2216_v11  ;;  %v247_v28 = vld [vmem:[%s2733_s0 + $0x8] sm:$0xff]  ;;  %v2211_v35 = vld [vmem:[%s2540_s20 + $0xc0] sm:$0xff]  ;;  %v2250_v41 = vld [vmem:[%s2540_s20 + $0x1f8] sm:$0xff] }
  0x29   : > { %1341 = vmatpush.bf16.msra.mxu0 %v2191_v12  ;;  %v524_v32 = vunpack.c.l.b16 %v247_v28  ;;  %v525_v36 = vunpack.c.h.b16 %v247_v28  ;;  %v2225_v46 = vld [vmem:[%s2540_s20 + $0x130] sm:$0xff]  ;;  %v2224_v50 = vld [vmem:[%s2540_s20 + $0x128] sm:$0xff]  ;;  %v2223_v54 = vld [vmem:[%s2540_s20 + $0x120] sm:$0xff] }
  0x2a   : > { %1354 = vmatpush.bf16.msra.mxu1 %v2199_v13  ;;  %v2233_v47 = vld [vmem:[%s2540_s20 + $0x170] sm:$0xff]  ;;  %v2232_v51 = vld [vmem:[%s2540_s20 + $0x168] sm:$0xff]  ;;  %v2231_v55 = vld [vmem:[%s2540_s20 + $0x160] sm:$0xff] }
  0x2b   : > { %1367 = vmatpush.bf16.msra.mxu2 %v2207_v14  ;;  %v540_v42 = vpack.c.b16 %v524_v32, %v524_v32  ;;  %v541_v44 = vpack.c.b16 %v525_v36, %v525_v36  ;;  %v2241_v48 = vld [vmem:[%s2540_s20 + $0x1b0] sm:$0xff]  ;;  %v2240_v52 = vld [vmem:[%s2540_s20 + $0x1a8] sm:$0xff]  ;;  %v2239_v56 = vld [vmem:[%s2540_s20 + $0x1a0] sm:$0xff] }
  0x2c   : > { %1380 = vmatpush.bf16.msra.mxu3 %v2215_v15  ;;  %v2249_v49 = vld [vmem:[%s2540_s20 + $0x1f0] sm:$0xff]  ;;  %v2248_v53 = vld [vmem:[%s2540_s20 + $0x1e8] sm:$0xff]  ;;  %v2247_v57 = vld [vmem:[%s2540_s20 + $0x1e0] sm:$0xff] }
  0x2d   : > { %1342 = vmatpush.bf16.msra.mxu0 %v2190_v16  ;;  %v2222_v58 = vld [vmem:[%s2540_s20 + $0x118] sm:$0xff]  ;;  %v2221_v62 = vld [vmem:[%s2540_s20 + $0x110] sm:$0xff]  ;;  %v2220_v2 = vld [vmem:[%s2540_s20 + $0x108] sm:$0xff] }
  0x2e   : > { %1355 = vmatpush.bf16.msra.mxu1 %v2198_v17  ;;  %v2230_v59 = vld [vmem:[%s2540_s20 + $0x158] sm:$0xff]  ;;  %v2229_v63 = vld [vmem:[%s2540_s20 + $0x150] sm:$0xff]  ;;  %v2228_v3 = vld [vmem:[%s2540_s20 + $0x148] sm:$0xff] }
  0x2f   : > { %1368 = vmatpush.bf16.msra.mxu2 %v2206_v18  ;;  %v2238_v60 = vld [vmem:[%s2540_s20 + $0x198] sm:$0xff]  ;;  %v2237_v0 = vld [vmem:[%s2540_s20 + $0x190] sm:$0xff]  ;;  %v2236_v4 = vld [vmem:[%s2540_s20 + $0x188] sm:$0xff] }
  0x30   : > { %1381 = vmatpush.bf16.msra.mxu3 %v2214_v19  ;;  %v2246_v61 = vld [vmem:[%s2540_s20 + $0x1d8] sm:$0xff]  ;;  %v2245_v1 = vld [vmem:[%s2540_s20 + $0x1d0] sm:$0xff]  ;;  %v2244_v5 = vld [vmem:[%s2540_s20 + $0x1c8] sm:$0xff] }
  0x31   : > { %1343 = vmatpush.bf16.msra.mxu0 %v2189_v20  ;;  %v249_v6 = vld [vmem:[%s2733_s0 + $0x18] sm:$0xff]  ;;  %v248_v7 = vld [vmem:[%s2733_s0 + $0x10] sm:$0xff]  ;;  %v2219_v8 = vld [vmem:[%s2540_s20 + $0x100] sm:$0xff] }
  0x32   : > { %1356 = vmatpush.bf16.msra.mxu1 %v2197_v21  ;;  %v2227_v9 = vld [vmem:[%s2540_s20 + $0x140] sm:$0xff]  ;;  %v528_v10 = vunpack.c.l.b16 %v249_v6  ;;  %v526_v11 = vunpack.c.l.b16 %v248_v7  ;;  %v529_v14 = vunpack.c.h.b16 %v249_v6  ;;  %v527_v15 = vunpack.c.h.b16 %v248_v7  ;;  %v2258_v16 = vld [vmem:[%s2540_s20 + $0x238] sm:$0xff]  ;;  %v2256_v28 = vld [vmem:[%s2540_s20 + $0x228] sm:$0xff] }
  0x33   : > { %1369 = vmatpush.bf16.msra.mxu2 %v2205_v22  ;;  %v2235_v12 = vld [vmem:[%s2540_s20 + $0x180] sm:$0xff]  ;;  %v2266_v17 = vld [vmem:[%s2540_s20 + $0x278] sm:$0xff]  ;;  %v2264_v29 = vld [vmem:[%s2540_s20 + $0x268] sm:$0xff] }
  0x34   : > { %1382 = vmatpush.bf16.msra.mxu3 %v2213_v23  ;;  %v2243_v13 = vld [vmem:[%s2540_s20 + $0x1c0] sm:$0xff]  ;;  %v2274_v18 = vld [vmem:[%s2540_s20 + $0x2b8] sm:$0xff]  ;;  %v544_v20 = vpack.c.b16 %v528_v10, %v528_v10  ;;  %v542_v21 = vpack.c.b16 %v526_v11, %v526_v11  ;;  %v545_v22 = vpack.c.b16 %v529_v14, %v529_v14  ;;  %v543_v23 = vpack.c.b16 %v527_v15, %v527_v15  ;;  %v2288_v6 = vld [vmem:[%s2540_s20 + $0x328] sm:$0xff] }
  0x35   : > { %1344 = vmatpush.bf16.msra.mxu0 %v2188_v24  ;;  %v2282_v19 = vld [vmem:[%s2540_s20 + $0x2f8] sm:$0xff]  ;;  %v2257_v24 = vld [vmem:[%s2540_s20 + $0x230] sm:$0xff]  ;;  %v2255_v32 = vld [vmem:[%s2540_s20 + $0x220] sm:$0xff] }
  0x36   : > { %1357 = vmatpush.bf16.msra.mxu1 %v2196_v25  ;;  %v2265_v25 = vld [vmem:[%s2540_s20 + $0x270] sm:$0xff]  ;;  %v2263_v33 = vld [vmem:[%s2540_s20 + $0x260] sm:$0xff]  ;;  %v2254_v36 = vld [vmem:[%s2540_s20 + $0x218] sm:$0xff] }
  0x37   : > { %1370 = vmatpush.bf16.msra.mxu2 %v2204_v26  ;;  %v2273_v26 = vld [vmem:[%s2540_s20 + $0x2b0] sm:$0xff]  ;;  %v2262_v37 = vld [vmem:[%s2540_s20 + $0x258] sm:$0xff]  ;;  %v2296_v7 = vld [vmem:[%s2540_s20 + $0x368] sm:$0xff] }
  0x38   : > { %1383 = vmatpush.bf16.msra.mxu3 %v2212_v27  ;;  %v2281_v27 = vld [vmem:[%s2540_s20 + $0x2f0] sm:$0xff]  ;;  %v2287_v10 = vld [vmem:[%s2540_s20 + $0x320] sm:$0xff]  ;;  %v2286_v14 = vld [vmem:[%s2540_s20 + $0x318] sm:$0xff] }
  0x39   : > { %1345 = vmatpush.bf16.msra.mxu0 %v2187_v30  ;;  %v2272_v30 = vld [vmem:[%s2540_s20 + $0x2a8] sm:$0xff]  ;;  %v2295_v11 = vld [vmem:[%s2540_s20 + $0x360] sm:$0xff]  ;;  %v2294_v15 = vld [vmem:[%s2540_s20 + $0x358] sm:$0xff] }
  0x3a   : > { %1358 = vmatpush.bf16.msra.mxu1 %v2195_v31  ;;  %v2280_v31 = vld [vmem:[%s2540_s20 + $0x2e8] sm:$0xff] }
  0x3b   : > { %1371 = vmatpush.bf16.msra.mxu2 %v2203_v34  ;;  %v2271_v34 = vld [vmem:[%s2540_s20 + $0x2a0] sm:$0xff] }
  0x3c   : > { %1384 = vmatpush.bf16.msra.mxu3 %v2211_v35  ;;  %1346 = vmatmul.bf16.vlgmr.msra.gmra.mxu0 %v538_v43  ;;  %v2279_v35 = vld [vmem:[%s2540_s20 + $0x2e0] sm:$0xff]  ;;  %v2277_v43 = vld [vmem:[%s2540_s20 + $0x2d0] sm:$0xff] }
  0x3d   : > { %1390 = vmatpush.bf16.msrb.mxu0 %v2226_v38  ;;  %1359 = vmatmul.bf16.vlgmr.msra.gmra.mxu1 %v539_v45  ;;  %v2270_v38 = vld [vmem:[%s2540_s20 + $0x298] sm:$0xff]  ;;  %v2260_v45 = vld [vmem:[%s2540_s20 + $0x248] sm:$0xff] }
  0x3e   : > { %1403 = vmatpush.bf16.msrb.mxu1 %v2234_v39  ;;  %1372 = vmatmul.bf16.vlgmr.msra.gmra.mxu2 %v540_v42  ;;  %v2278_v39 = vld [vmem:[%s2540_s20 + $0x2d8] sm:$0xff]  ;;  %v2269_v42 = vld [vmem:[%s2540_s20 + $0x290] sm:$0xff] }
  0x3f   : > { %1416 = vmatpush.bf16.msrb.mxu2 %v2242_v40  ;;  %1385 = vmatmul.bf16.vlgmr.msra.gmra.mxu3 %v541_v44  ;;  %v2253_v40 = vld [vmem:[%s2540_s20 + $0x210] sm:$0xff]  ;;  %v2252_v44 = vld [vmem:[%s2540_s20 + $0x208] sm:$0xff] }
  0x40   : > { %1429 = vmatpush.bf16.msrb.mxu3 %v2250_v41  ;;  %v2261_v41 = vld [vmem:[%s2540_s20 + $0x250] sm:$0xff] }
  0x41   : > { %1391 = vmatpush.bf16.msrb.mxu0 %v2225_v46  ;;  %v2268_v46 = vld [vmem:[%s2540_s20 + $0x288] sm:$0xff] }
  0x42   : > { %1404 = vmatpush.bf16.msrb.mxu1 %v2233_v47  ;;  %v2276_v47 = vld [vmem:[%s2540_s20 + $0x2c8] sm:$0xff] }
  0x43   : > { %1417 = vmatpush.bf16.msrb.mxu2 %v2241_v48  ;;  %v250_v48 = vld [vmem:[%s2733_s0 + $0x20] sm:$0xff] }
  0x44   : > { %1430 = vmatpush.bf16.msrb.mxu3 %v2249_v49  ;;  %v251_v49 = vld [vmem:[%s2733_s0 + $0x28] sm:$0xff] }
  0x45   : > { %1392 = vmatpush.bf16.msrb.mxu0 %v2224_v50  ;;  %v2251_v50 = vld [vmem:[%s2540_s20 + $0x200] sm:$0xff] }
  0x46   : > { %1405 = vmatpush.bf16.msrb.mxu1 %v2232_v51  ;;  %v2259_v51 = vld [vmem:[%s2540_s20 + $0x240] sm:$0xff] }
  0x47   : > { %1418 = vmatpush.bf16.msrb.mxu2 %v2240_v52  ;;  %v530_v52 = vunpack.c.l.b16 %v250_v48 }
  0x48   : > { %1431 = vmatpush.bf16.msrb.mxu3 %v2248_v53  ;;  %v532_v53 = vunpack.c.l.b16 %v251_v49 }
  0x49   : > { %1393 = vmatpush.bf16.msrb.mxu0 %v2223_v54  ;;  %v2267_v54 = vld [vmem:[%s2540_s20 + $0x280] sm:$0xff] }
  0x4a   : > { %1406 = vmatpush.bf16.msrb.mxu1 %v2231_v55  ;;  %v2275_v55 = vld [vmem:[%s2540_s20 + $0x2c0] sm:$0xff] }
  0x4b   : > { %1419 = vmatpush.bf16.msrb.mxu2 %v2239_v56  ;;  %v531_v56 = vunpack.c.h.b16 %v250_v48 }
  0x4c   : > { %1432 = vmatpush.bf16.msrb.mxu3 %v2247_v57  ;;  %v533_v57 = vunpack.c.h.b16 %v251_v49 }
  0x4d   : > { %1394 = vmatpush.bf16.msrb.mxu0 %v2222_v58  ;;  %v2290_v58 = vld [vmem:[%s2540_s20 + $0x338] sm:$0xff] }
  0x4e   : > { %1407 = vmatpush.bf16.msrb.mxu1 %v2230_v59  ;;  %v2298_v59 = vld [vmem:[%s2540_s20 + $0x378] sm:$0xff] }
  0x4f   : > { %1420 = vmatpush.bf16.msrb.mxu2 %v2238_v60  ;;  %v2306_v60 = vld [vmem:[%s2540_s20 + $0x3b8] sm:$0xff] }
  0x50   : > { %1433 = vmatpush.bf16.msrb.mxu3 %v2246_v61  ;;  %v2314_v61 = vld [vmem:[%s2540_s20 + $0x3f8] sm:$0xff] }
  0x51   : > { %1395 = vmatpush.bf16.msrb.mxu0 %v2221_v62  ;;  %v546_v62 = vpack.c.b16 %v530_v52, %v530_v52 }
  0x52   : > { %1408 = vmatpush.bf16.msrb.mxu1 %v2229_v63  ;;  %v548_v63 = vpack.c.b16 %v532_v53, %v532_v53 }
  0x53   : > { %1421 = vmatpush.bf16.msrb.mxu2 %v2237_v0  ;;  %v547_v0 = vpack.c.b16 %v531_v56, %v531_v56 }
  0x54   : > { %1434 = vmatpush.bf16.msrb.mxu3 %v2245_v1  ;;  %v549_v1 = vpack.c.b16 %v533_v57, %v533_v57 }
  0x55   : > { %1396 = vmatpush.bf16.msrb.mxu0 %v2220_v2  ;;  %v2289_v2 = vld [vmem:[%s2540_s20 + $0x330] sm:$0xff] }
  0x56   : > { %1409 = vmatpush.bf16.msrb.mxu1 %v2228_v3  ;;  %v2297_v3 = vld [vmem:[%s2540_s20 + $0x370] sm:$0xff] }
  0x57   : > { %1422 = vmatpush.bf16.msrb.mxu2 %v2236_v4  ;;  %v2305_v4 = vld [vmem:[%s2540_s20 + $0x3b0] sm:$0xff] }
  0x58   : > { %1435 = vmatpush.bf16.msrb.mxu3 %v2244_v5  ;;  %v2313_v5 = vld [vmem:[%s2540_s20 + $0x3f0] sm:$0xff] }
  0x59   : > { %1397 = vmatpush.bf16.msrb.mxu0 %v2219_v8  ;;  %v2304_v8 = vld [vmem:[%s2540_s20 + $0x3a8] sm:$0xff] }
  0x5a   : > { %1410 = vmatpush.bf16.msrb.mxu1 %v2227_v9  ;;  %v2312_v9 = vld [vmem:[%s2540_s20 + $0x3e8] sm:$0xff] }
  0x5b   : > { %1423 = vmatpush.bf16.msrb.mxu2 %v2235_v12  ;;  %v2303_v12 = vld [vmem:[%s2540_s20 + $0x3a0] sm:$0xff] }
  0x5c   : > { %1436 = vmatpush.bf16.msrb.mxu3 %v2243_v13  ;;  %1398 = vmatmul.bf16.vlgmr.msrb.gmra.mxu0 %v542_v21  ;;  %v2311_v13 = vld [vmem:[%s2540_s20 + $0x3e0] sm:$0xff]  ;;  %v2309_v21 = vld [vmem:[%s2540_s20 + $0x3d0] sm:$0xff] }
  0x5d   : > { %1442 = vmatpush.bf16.msra.mxu0 %v2258_v16  ;;  %1411 = vmatmul.bf16.vlgmr.msrb.gmra.mxu1 %v543_v23  ;;  %v2302_v16 = vld [vmem:[%s2540_s20 + $0x398] sm:$0xff]  ;;  %v2292_v23 = vld [vmem:[%s2540_s20 + $0x348] sm:$0xff] }
  0x5e   : > { %1455 = vmatpush.bf16.msra.mxu1 %v2266_v17  ;;  %1424 = vmatmul.bf16.vlgmr.msrb.gmra.mxu2 %v544_v20  ;;  %v2310_v17 = vld [vmem:[%s2540_s20 + $0x3d8] sm:$0xff]  ;;  %v2301_v20 = vld [vmem:[%s2540_s20 + $0x390] sm:$0xff] }
  0x5f   : > { %1468 = vmatpush.bf16.msra.mxu2 %v2274_v18  ;;  %1437 = vmatmul.bf16.vlgmr.msrb.gmra.mxu3 %v545_v22  ;;  %v2285_v18 = vld [vmem:[%s2540_s20 + $0x310] sm:$0xff]  ;;  %v2284_v22 = vld [vmem:[%s2540_s20 + $0x308] sm:$0xff] }
  0x60   : > { %1481 = vmatpush.bf16.msra.mxu3 %v2282_v19  ;;  %v2293_v19 = vld [vmem:[%s2540_s20 + $0x350] sm:$0xff] }
  0x61   : > { %1443 = vmatpush.bf16.msra.mxu0 %v2257_v24  ;;  %v252_v24 = vld [vmem:[%s2733_s0 + $0x30] sm:$0xff] }
  0x62   : > { %1456 = vmatpush.bf16.msra.mxu1 %v2265_v25  ;;  %v2300_v25 = vld [vmem:[%s2540_s20 + $0x388] sm:$0xff] }
  0x63   : > { %1469 = vmatpush.bf16.msra.mxu2 %v2273_v26  ;;  %v2308_v26 = vld [vmem:[%s2540_s20 + $0x3c8] sm:$0xff] }
  0x64   : > { %1482 = vmatpush.bf16.msra.mxu3 %v2281_v27  ;;  %v253_v27 = vld [vmem:[%s2733_s0 + $0x38] sm:$0xff] }
  0x65   : > { %1444 = vmatpush.bf16.msra.mxu0 %v2256_v28  ;;  %v534_v28 = vunpack.c.l.b16 %v252_v24 }
  0x66   : > { %1457 = vmatpush.bf16.msra.mxu1 %v2264_v29  ;;  %v535_v29 = vunpack.c.h.b16 %v252_v24 }
  0x67   : > { %1470 = vmatpush.bf16.msra.mxu2 %v2272_v30  ;;  %v2283_v30 = vld [vmem:[%s2540_s20 + $0x300] sm:$0xff] }
  0x68   : > { %1483 = vmatpush.bf16.msra.mxu3 %v2280_v31  ;;  %v2291_v31 = vld [vmem:[%s2540_s20 + $0x340] sm:$0xff] }
  0x69   : > { %1445 = vmatpush.bf16.msra.mxu0 %v2255_v32  ;;  %v536_v32 = vunpack.c.l.b16 %v253_v27 }
  0x6a   : > { %1458 = vmatpush.bf16.msra.mxu1 %v2263_v33  ;;  %v537_v33 = vunpack.c.h.b16 %v253_v27 }
  0x6b   : > { %1471 = vmatpush.bf16.msra.mxu2 %v2271_v34  ;;  %v2299_v34 = vld [vmem:[%s2540_s20 + $0x380] sm:$0xff] }
  0x6c   : > { %1484 = vmatpush.bf16.msra.mxu3 %v2279_v35  ;;  %v2307_v35 = vld [vmem:[%s2540_s20 + $0x3c0] sm:$0xff]  ;;  %s1672_s20 = sshll.u32 %s2747_s15, 3 }
  0x6d   : > { %1446 = vmatpush.bf16.msra.mxu0 %v2254_v36  ;;  %v550_v36 = vpack.c.b16 %v534_v28, %v534_v28  ;;  %s245_s26 = scalar_lea.vmem %s2736_s3, %s1672_s20 }
  0x6e   : > { %1459 = vmatpush.bf16.msra.mxu1 %v2262_v37  ;;  %v551_v37 = vpack.c.b16 %v535_v29, %v535_v29 }
  0x6f   : > { %1472 = vmatpush.bf16.msra.mxu2 %v2270_v38  ;;  %v552_v38 = vpack.c.b16 %v536_v32, %v536_v32 }
  0x70   : > { %1485 = vmatpush.bf16.msra.mxu3 %v2278_v39  ;;  %v553_v39 = vpack.c.b16 %v537_v33, %v537_v33 }
  0x71   : > { %1447 = vmatpush.bf16.msra.mxu0 %v2253_v40  ;;  %v2373_v40 = vld [vmem:[%s237_s23] ss:$0 sm:$0xff] }
  0x72   : > { %1460 = vmatpush.bf16.msra.mxu1 %v2261_v41 }
  0x73   : > { %1473 = vmatpush.bf16.msra.mxu2 %v2269_v42 }
  0x74   : > { %1486 = vmatpush.bf16.msra.mxu3 %v2277_v43 }
  0x75   : > { %1448 = vmatpush.bf16.msra.mxu0 %v2252_v44 }
  0x76   : > { %1461 = vmatpush.bf16.msra.mxu1 %v2260_v45 }
  0x77   : > { %1474 = vmatpush.bf16.msra.mxu2 %v2268_v46 }
  0x78   : > { %1487 = vmatpush.bf16.msra.mxu3 %v2276_v47 }
  0x79   : > { %1449 = vmatpush.bf16.msra.mxu0 %v2251_v50 }
  0x7a   : > { %1462 = vmatpush.bf16.msra.mxu1 %v2259_v51 }
  0x7b   : > { %1475 = vmatpush.bf16.msra.mxu2 %v2267_v54 }
  0x7c   : > { %1488 = vmatpush.bf16.msra.mxu3 %v2275_v55  ;;  %1450 = vmatmul.bf16.vlgmr.msra.gmra.mxu0 %v546_v62 }
  0x7d   : > { %1494 = vmatpush.bf16.msrb.mxu0 %v2290_v58  ;;  %1463 = vmatmul.bf16.vlgmr.msra.gmra.mxu1 %v547_v0 }
  0x7e   : > { %1507 = vmatpush.bf16.msrb.mxu1 %v2298_v59  ;;  %1476 = vmatmul.bf16.vlgmr.msra.gmra.mxu2 %v548_v63 }
  0x7f   : > { %1520 = vmatpush.bf16.msrb.mxu2 %v2306_v60  ;;  %1489 = vmatmul.bf16.vlgmr.msra.gmra.mxu3 %v549_v1 }
  0x80   : > { %1533 = vmatpush.bf16.msrb.mxu3 %v2314_v61 }
  0x81   : > { %1495 = vmatpush.bf16.msrb.mxu0 %v2289_v2 }
  0x82   : > { %1508 = vmatpush.bf16.msrb.mxu1 %v2297_v3 }
  0x83   : > { %1521 = vmatpush.bf16.msrb.mxu2 %v2305_v4 }
  0x84   : > { %1534 = vmatpush.bf16.msrb.mxu3 %v2313_v5 }
  0x85   : > { %1496 = vmatpush.bf16.msrb.mxu0 %v2288_v6 }
  0x86   : > { %1509 = vmatpush.bf16.msrb.mxu1 %v2296_v7 }
  0x87   : > { %1522 = vmatpush.bf16.msrb.mxu2 %v2304_v8 }
  0x88   : > { %1535 = vmatpush.bf16.msrb.mxu3 %v2312_v9 }
  0x89   : > { %1497 = vmatpush.bf16.msrb.mxu0 %v2287_v10 }
  0x8a   : > { %1510 = vmatpush.bf16.msrb.mxu1 %v2295_v11 }
  0x8b   : > { %1523 = vmatpush.bf16.msrb.mxu2 %v2303_v12 }
  0x8c   : > { %1536 = vmatpush.bf16.msrb.mxu3 %v2311_v13 }
  0x8d   : > { %1498 = vmatpush.bf16.msrb.mxu0 %v2286_v14 }
  0x8e   : > { %1511 = vmatpush.bf16.msrb.mxu1 %v2294_v15 }
  0x8f   : > { %1524 = vmatpush.bf16.msrb.mxu2 %v2302_v16 }
  0x90   : > { %1537 = vmatpush.bf16.msrb.mxu3 %v2310_v17 }
  0x91   : > { %1499 = vmatpush.bf16.msrb.mxu0 %v2285_v18 }
  0x92   : > { %1512 = vmatpush.bf16.msrb.mxu1 %v2293_v19 }
  0x93   : > { %1525 = vmatpush.bf16.msrb.mxu2 %v2301_v20 }
  0x94   : > { %1538 = vmatpush.bf16.msrb.mxu3 %v2309_v21 }
  0x95   : > { %1500 = vmatpush.bf16.msrb.mxu0 %v2284_v22 }
  0x96   : > { %1513 = vmatpush.bf16.msrb.mxu1 %v2292_v23 }
  0x97   : > { %1526 = vmatpush.bf16.msrb.mxu2 %v2300_v25 }
  0x98   : > { %1539 = vmatpush.bf16.msrb.mxu3 %v2308_v26 }
  0x99   : > { %1501 = vmatpush.bf16.msrb.mxu0 %v2283_v30 }
  0x9a   : > { %1514 = vmatpush.bf16.msrb.mxu1 %v2291_v31 }
  0x9b   : > { %1527 = vmatpush.bf16.msrb.mxu2 %v2299_v34 }
  0x9c   : > { %1540 = vmatpush.bf16.msrb.mxu3 %v2307_v35  ;;  %1502 = vmatmul.bf16.vlgmr.msrb.gmra.mxu0 %v550_v36 }
  0x9d   : > { %1515 = vmatmul.bf16.vlgmr.msrb.gmra.mxu1 %v551_v37 }
  0x9e   : > { %1528 = vmatmul.bf16.vlgmr.msrb.gmra.mxu2 %v552_v38 }
  0x9f   : > { %1541 = vmatmul.bf16.vlgmr.msrb.gmra.mxu3 %v553_v39 }
  0xb9   : > { %v1347_v41 = vpop.f32.mrf.mxu0 }
  0xba   : > { %v1348_v42 = vadd.f32 %v2373_v40, %v1347_v41  ;;  %v1360_v43 = vpop.f32.mrf.mxu1 }
  0xbc   : > { %v1361_v44 = vadd.f32 %v1360_v43, %v1348_v42 }
  0xc1   : > { %v1373_v45 = vpop.f32.mrf.mxu2  ;;  %v1349_v48 = vpop.f32.mrf.mxu0 }
  0xc2   : > { %v1374_v46 = vadd.f32 %v1373_v45, %v1361_v44  ;;  %v1386_v47 = vpop.f32.mrf.mxu3  ;;  %v1362_v50 = vpop.f32.mrf.mxu1 }
  0xc4   : > { %v1387_v49 = vadd.f32 %v1386_v47, %v1374_v46 }
  0xc9   : > { %v1375_v51 = vpop.f32.mrf.mxu2 }
  0xca   : > { %v1388_v52 = vpop.f32.mrf.mxu3 }
  0xd9   : > { %v1399_v53 = vpop.f32.mrf.mxu0 }
  0xda   : > { %v1412_v54 = vpop.f32.mrf.mxu1  ;;  %v1400_v63 = vadd.f32 %v1399_v53, %v1387_v49 }
  0xdc   : > { %v1413_v3 = vadd.f32 %v1412_v54, %v1400_v63 }
  0xe1   : > { %v1425_v55 = vpop.f32.mrf.mxu2  ;;  %v1401_v57 = vpop.f32.mrf.mxu0 }
  0xe2   : > { %v1438_v56 = vpop.f32.mrf.mxu3  ;;  %v1414_v58 = vpop.f32.mrf.mxu1  ;;  %v1426_v5 = vadd.f32 %v1425_v55, %v1413_v3 }
  0xe4   : > { %v1439_v8 = vadd.f32 %v1438_v56, %v1426_v5 }
  0xe9   : > { %v1427_v59 = vpop.f32.mrf.mxu2 }
  0xea   : > { %v1440_v60 = vpop.f32.mrf.mxu3 }
  0xf9   : > { %v1451_v61 = vpop.f32.mrf.mxu0 }
  0xfa   : > { %v1464_v62 = vpop.f32.mrf.mxu1  ;;  %v1452_v9 = vadd.f32 %v1451_v61, %v1439_v8 }
  0xfc   : > { %v1465_v10 = vadd.f32 %v1464_v62, %v1452_v9 }
 0x101   : > { %v1477_v0 = vpop.f32.mrf.mxu2  ;;  %v1453_v2 = vpop.f32.mrf.mxu0 }
 0x102   : > { %v1490_v1 = vpop.f32.mrf.mxu3  ;;  %v1466_v4 = vpop.f32.mrf.mxu1  ;;  %v1478_v11 = vadd.f32 %v1477_v0, %v1465_v10 }
 0x104   : > { %v1491_v12 = vadd.f32 %v1490_v1, %v1478_v11 }
 0x109   : > { %v1479_v6 = vpop.f32.mrf.mxu2 }
 0x10a   : > { %v1492_v7 = vpop.f32.mrf.mxu3 }
 0x119   : > { %v1503_v13 = vpop.f32.mrf.mxu0 }
 0x11a   : > { %v1516_v14 = vpop.f32.mrf.mxu1  ;;  %v1504_v15 = vadd.f32 %v1503_v13, %v1491_v12 }
 0x11c   : > { %v1517_v16 = vadd.f32 %v1516_v14, %v1504_v15 }
 0x121   : > { %v1529_v17 = vpop.f32.mrf.mxu2  ;;  %v1505_v20 = vpop.f32.mrf.mxu0 }
 0x122   : > { %v1542_v18 = vpop.f32.mrf.mxu3  ;;  %v1530_v19 = vadd.f32 %v1529_v17, %v1517_v16  ;;  %v1518_v21 = vpop.f32.mrf.mxu1 }
 0x124   : > { %v1543_v22 = vadd.f32 %v1542_v18, %v1530_v19 }
 0x126   : > { %vm1546_vm0 = vcmp.ge.f32.partialorder %v1543_v22, 0.0  ;;  %v1547_v23 = vmul.f32 0.01, %v1543_v22 }
 0x128   : > { %v1548_v24 = vsel %vm1546_vm0, %v1543_v22, %v1547_v23 }
 0x129   : > { %1549 = vst [vmem:[%s245_s26] sm:$0xff] %v1548_v24  ;;  %v1531_v25 = vpop.f32.mrf.mxu2 }
 0x12a   : > { %v1544_v26 = vpop.f32.mrf.mxu3 }
 0x12b PF: > { %s16_s17 = sadd.s32 1, %s2454_s17   ;;  %s2739_s12 = smov %s2438_s13 }
 0x12c   : > { %p13_p0 = scmp.ge.s32.totalorder %s16_s17, 6   ;;  %s2740_s13 = smov %s2442_s14 }
 0x12d   : > { %s2741_s14 = smov %s2528_s24  ;;  %s2742_s15 = smov %s2450_s16 }
 0x12e   : > { %s2743_s16 = smov %s2745_s19  ;;  %15 = sbr.rel (!%p13_p0) target bundleno = 4 (0x4), region = 78 }
 0x133   :  { %1577 = vsyncpa [#allocation3], 1 }
 0x134   :  { %1579 = vsyncpa [#allocation3 + $0x1], 1 }

// kernel: u_net_forward.14
= control target key start
LH: loop header
LB: loop body
LE: loop exit
PB: predicated region body
PF: predicated region fallthrough
CT: control target
= control target key end

     0   :  { %s2213_s12 = smov 0   ;;  %s2215_s13 = smov 0   ;;  %s2734_s0 = inlined_call_operand.vmem [shape: bf16[32,1024], index: 0, kind: input, shape index: {}]   ;;  %s2735_s1 = inlined_call_operand.vmem [shape: bf16[1024,256], index: 1, kind: input, shape index: {}]   ;;  %s2736_s2 = inlined_call_operand.vmem [shape: f32[1,256], index: 2, kind: input, shape index: {}]   ;;  %s2737_s3 = inlined_call_operand.vmem [shape: f32[32,256], index: 3, kind: output, shape index: {}]  }
   0x1   :  { %s2217_s14 = smov 0   ;;  %s2219_s15 = smov 0  }
   0x2   :  { %s2221_s16 = smov 0  }
   0x3 LB: > { %s22_s17 = sadd.s32 1, %s2187_s15  ;;  %s1698_s18 = sadd.s32 4294967295, %s2191_s16   ;;  %s2191_s16 = sphi %s2221_s16, %s13_s16   ;;  %s2187_s15 = sphi %s2219_s15, %s2742_s15   ;;  %s2183_s14 = sphi %s2217_s14, %s2741_s14   ;;  %s2179_s13 = sphi %s2215_s13, %s2740_s13   ;;  %s2175_s12 = sphi %s2213_s12, %s2739_s12  }
   0x4   : > { %p23_p0 = scmp.ge.s32.totalorder %s22_s17, 2  ;;  %p65_p1 = scmp.ne.s32.totalorder %s2179_s13, %s2175_s12 }
   0x5   : > { %p66_p2 = scmp.eq.s32.totalorder %s2191_s16, 0  ;;  %p123_p4 = scmp.eq.s32.totalorder %s1698_s18, 1 }
   0x6   : > { %s2744_s17 = smov (%p23_p0, %s22_s17), 0  ;;  %s58_s20 = sadd.s32 1, %s2179_s13 }
   0x7   : > { %p67_p3 = por %p66_p2, %p65_p1  ;;  %s55_s19 = ssub.s32 %s2187_s15, %s2744_s17 }
   0x8   : > { %p56_p5 = scmp.eq.s32.totalorder %s55_s19, 0  ;;  %p2248_p6 = por %p123_p4, %p65_p1 }
   0x9   : > { %p1702_p7 = scmp.ge.s32.totalorder %s2191_s16, 2 }
   0xa   : > { %s2253_s22 = scalar_select %p56_p5, %s2179_s13, %s58_s20  }
   0xb   : > { %155 = sbr.rel (%p1702_p7) target bundleno = 148 (0x94), region = 20 }
  0x10   : > { %158 = sbr.rel (!%p67_p3) target bundleno = 148 (0x94), region = 24  ;;  %s160_s23 = sand.u32 (%p67_p3), 1, %s2179_s13  }
  0x11   : > { %s1704_s24 = sshll.u32 (%p67_p3), %s2187_s15, 2  ;;  %s1703_s25 = sshll.u32 (%p67_p3), %s160_s23, 9 }
  0x12   : > { %s2261_s28 = scalar_lea.vmem (%p67_p3), %s2735_s1, %s1704_s24  ;;  %s2265_s29 = scalar_lea.vmem (%p67_p3), [#allocation2], %s1703_s25 }
  0x13   : > { %v181_v0 = vld [vmem:[%s2261_s28] sm:$0xf] (%p67_p3)  ;;  %v183_v1 = vld [vmem:[%s2261_s28 + $0x8] sm:$0xf] (%p67_p3)  ;;  %v185_v2 = vld [vmem:[%s2261_s28 + $0x10] sm:$0xf] (%p67_p3) }
  0x14   : > { %182 = vst [vmem:[%s2265_s29] sm:$0xf] (%p67_p3), %v181_v0  ;;  %v187_v3 = vld [vmem:[%s2261_s28 + $0x18] sm:$0xf] (%p67_p3)  ;;  %v189_v4 = vld [vmem:[%s2261_s28 + $0x20] sm:$0xf] (%p67_p3) }
  0x15   : > { %184 = vst [vmem:[%s2265_s29 + $0x4] sm:$0xf] %v183_v1  ;;  %v191_v5 = vld [vmem:[%s2261_s28 + $0x28] sm:$0xf]  ;;  %v193_v6 = vld [vmem:[%s2261_s28 + $0x30] sm:$0xf] }
  0x16   : > { %186 = vst [vmem:[%s2265_s29 + $0x8] sm:$0xf] %v185_v2  ;;  %v195_v7 = vld [vmem:[%s2261_s28 + $0x38] sm:$0xf]  ;;  %v197_v8 = vld [vmem:[%s2261_s28 + $0x40] sm:$0xf] }
  0x17   : > { %188 = vst [vmem:[%s2265_s29 + $0xc] sm:$0xf] %v187_v3  ;;  %v199_v9 = vld [vmem:[%s2261_s28 + $0x48] sm:$0xf]  ;;  %v201_v10 = vld [vmem:[%s2261_s28 + $0x50] sm:$0xf] }
  0x18   : > { %190 = vst [vmem:[%s2265_s29 + $0x10] sm:$0xf] %v189_v4  ;;  %v203_v11 = vld [vmem:[%s2261_s28 + $0x58] sm:$0xf]  ;;  %v205_v12 = vld [vmem:[%s2261_s28 + $0x60] sm:$0xf] }
  0x19   : > { %192 = vst [vmem:[%s2265_s29 + $0x14] sm:$0xf] %v191_v5  ;;  %v207_v13 = vld [vmem:[%s2261_s28 + $0x68] sm:$0xf]  ;;  %v209_v14 = vld [vmem:[%s2261_s28 + $0x70] sm:$0xf] }
  0x1a   : > { %194 = vst [vmem:[%s2265_s29 + $0x18] sm:$0xf] %v193_v6  ;;  %v211_v15 = vld [vmem:[%s2261_s28 + $0x78] sm:$0xf]  ;;  %v213_v16 = vld [vmem:[%s2261_s28 + $0x80] sm:$0xf] }
  0x1b   : > { %196 = vst [vmem:[%s2265_s29 + $0x1c] sm:$0xf] %v195_v7  ;;  %v215_v17 = vld [vmem:[%s2261_s28 + $0x88] sm:$0xf]  ;;  %v217_v18 = vld [vmem:[%s2261_s28 + $0x90] sm:$0xf] }
  0x1c   : > { %198 = vst [vmem:[%s2265_s29 + $0x20] sm:$0xf] %v197_v8  ;;  %v219_v19 = vld [vmem:[%s2261_s28 + $0x98] sm:$0xf]  ;;  %v221_v20 = vld [vmem:[%s2261_s28 + $0xa0] sm:$0xf] }
  0x1d   : > { %200 = vst [vmem:[%s2265_s29 + $0x24] sm:$0xf] %v199_v9  ;;  %v223_v21 = vld [vmem:[%s2261_s28 + $0xa8] sm:$0xf]  ;;  %v225_v22 = vld [vmem:[%s2261_s28 + $0xb0] sm:$0xf] }
  0x1e   : > { %202 = vst [vmem:[%s2265_s29 + $0x28] sm:$0xf] %v201_v10  ;;  %v227_v23 = vld [vmem:[%s2261_s28 + $0xb8] sm:$0xf]  ;;  %v229_v24 = vld [vmem:[%s2261_s28 + $0xc0] sm:$0xf] }
  0x1f   : > { %204 = vst [vmem:[%s2265_s29 + $0x2c] sm:$0xf] %v203_v11  ;;  %v231_v25 = vld [vmem:[%s2261_s28 + $0xc8] sm:$0xf]  ;;  %v233_v26 = vld [vmem:[%s2261_s28 + $0xd0] sm:$0xf] }
  0x20   : > { %206 = vst [vmem:[%s2265_s29 + $0x30] sm:$0xf] %v205_v12  ;;  %v235_v27 = vld [vmem:[%s2261_s28 + $0xd8] sm:$0xf]  ;;  %v237_v28 = vld [vmem:[%s2261_s28 + $0xe0] sm:$0xf] }
  0x21   : > { %208 = vst [vmem:[%s2265_s29 + $0x34] sm:$0xf] %v207_v13  ;;  %v239_v29 = vld [vmem:[%s2261_s28 + $0xe8] sm:$0xf]  ;;  %v241_v30 = vld [vmem:[%s2261_s28 + $0xf0] sm:$0xf] }
  0x22   : > { %210 = vst [vmem:[%s2265_s29 + $0x38] sm:$0xf] %v209_v14  ;;  %v243_v31 = vld [vmem:[%s2261_s28 + $0xf8] sm:$0xf]  ;;  %v245_v32 = vld [vmem:[%s2261_s28 + $0x100] sm:$0xf] }
  0x23   : > { %212 = vst [vmem:[%s2265_s29 + $0x3c] sm:$0xf] %v211_v15  ;;  %v247_v33 = vld [vmem:[%s2261_s28 + $0x108] sm:$0xf]  ;;  %v249_v34 = vld [vmem:[%s2261_s28 + $0x110] sm:$0xf] }
  0x24   : > { %214 = vst [vmem:[%s2265_s29 + $0x40] sm:$0xf] %v213_v16  ;;  %v251_v35 = vld [vmem:[%s2261_s28 + $0x118] sm:$0xf]  ;;  %v253_v36 = vld [vmem:[%s2261_s28 + $0x120] sm:$0xf] }
  0x25   : > { %216 = vst [vmem:[%s2265_s29 + $0x44] sm:$0xf] %v215_v17  ;;  %v255_v37 = vld [vmem:[%s2261_s28 + $0x128] sm:$0xf]  ;;  %v257_v38 = vld [vmem:[%s2261_s28 + $0x130] sm:$0xf] }
  0x26   : > { %218 = vst [vmem:[%s2265_s29 + $0x48] sm:$0xf] %v217_v18  ;;  %v259_v39 = vld [vmem:[%s2261_s28 + $0x138] sm:$0xf]  ;;  %v261_v40 = vld [vmem:[%s2261_s28 + $0x140] sm:$0xf] }
  0x27   : > { %220 = vst [vmem:[%s2265_s29 + $0x4c] sm:$0xf] %v219_v19  ;;  %v263_v41 = vld [vmem:[%s2261_s28 + $0x148] sm:$0xf]  ;;  %v265_v42 = vld [vmem:[%s2261_s28 + $0x150] sm:$0xf] }
  0x28   : > { %222 = vst [vmem:[%s2265_s29 + $0x50] sm:$0xf] %v221_v20  ;;  %v267_v43 = vld [vmem:[%s2261_s28 + $0x158] sm:$0xf]  ;;  %v269_v44 = vld [vmem:[%s2261_s28 + $0x160] sm:$0xf] }
  0x29   : > { %224 = vst [vmem:[%s2265_s29 + $0x54] sm:$0xf] %v223_v21  ;;  %v271_v45 = vld [vmem:[%s2261_s28 + $0x168] sm:$0xf]  ;;  %v273_v46 = vld [vmem:[%s2261_s28 + $0x170] sm:$0xf] }
  0x2a   : > { %226 = vst [vmem:[%s2265_s29 + $0x58] sm:$0xf] %v225_v22  ;;  %v275_v47 = vld [vmem:[%s2261_s28 + $0x178] sm:$0xf]  ;;  %v277_v48 = vld [vmem:[%s2261_s28 + $0x180] sm:$0xf] }
  0x2b   : > { %228 = vst [vmem:[%s2265_s29 + $0x5c] sm:$0xf] %v227_v23  ;;  %v279_v49 = vld [vmem:[%s2261_s28 + $0x188] sm:$0xf]  ;;  %v281_v50 = vld [vmem:[%s2261_s28 + $0x190] sm:$0xf] }
  0x2c   : > { %230 = vst [vmem:[%s2265_s29 + $0x60] sm:$0xf] %v229_v24  ;;  %v283_v51 = vld [vmem:[%s2261_s28 + $0x198] sm:$0xf]  ;;  %v285_v52 = vld [vmem:[%s2261_s28 + $0x1a0] sm:$0xf] }
  0x2d   : > { %232 = vst [vmem:[%s2265_s29 + $0x64] sm:$0xf] %v231_v25  ;;  %v287_v53 = vld [vmem:[%s2261_s28 + $0x1a8] sm:$0xf]  ;;  %v289_v54 = vld [vmem:[%s2261_s28 + $0x1b0] sm:$0xf] }
  0x2e   : > { %234 = vst [vmem:[%s2265_s29 + $0x68] sm:$0xf] %v233_v26  ;;  %v291_v55 = vld [vmem:[%s2261_s28 + $0x1b8] sm:$0xf]  ;;  %v293_v56 = vld [vmem:[%s2261_s28 + $0x1c0] sm:$0xf] }
  0x2f   : > { %236 = vst [vmem:[%s2265_s29 + $0x6c] sm:$0xf] %v235_v27  ;;  %v295_v57 = vld [vmem:[%s2261_s28 + $0x1c8] sm:$0xf]  ;;  %v297_v58 = vld [vmem:[%s2261_s28 + $0x1d0] sm:$0xf] }
  0x30   : > { %238 = vst [vmem:[%s2265_s29 + $0x70] sm:$0xf] %v237_v28  ;;  %v299_v59 = vld [vmem:[%s2261_s28 + $0x1d8] sm:$0xf]  ;;  %v301_v60 = vld [vmem:[%s2261_s28 + $0x1e0] sm:$0xf] }
  0x31   : > { %240 = vst [vmem:[%s2265_s29 + $0x74] sm:$0xf] %v239_v29  ;;  %v303_v61 = vld [vmem:[%s2261_s28 + $0x1e8] sm:$0xf]  ;;  %v305_v62 = vld [vmem:[%s2261_s28 + $0x1f0] sm:$0xf] }
  0x32   : > { %242 = vst [vmem:[%s2265_s29 + $0x78] sm:$0xf] %v241_v30  ;;  %v307_v63 = vld [vmem:[%s2261_s28 + $0x1f8] sm:$0xf]  ;;  %v309_v0 = vld [vmem:[%s2261_s28 + $0x200] sm:$0xf] }
  0x33   : > { %244 = vst [vmem:[%s2265_s29 + $0x7c] sm:$0xf] %v243_v31  ;;  %v311_v1 = vld [vmem:[%s2261_s28 + $0x208] sm:$0xf]  ;;  %v313_v2 = vld [vmem:[%s2261_s28 + $0x210] sm:$0xf] }
  0x34   : > { %246 = vst [vmem:[%s2265_s29 + $0x80] sm:$0xf] %v245_v32  ;;  %v315_v3 = vld [vmem:[%s2261_s28 + $0x218] sm:$0xf]  ;;  %v317_v4 = vld [vmem:[%s2261_s28 + $0x220] sm:$0xf] }
  0x35   : > { %248 = vst [vmem:[%s2265_s29 + $0x84] sm:$0xf] %v247_v33  ;;  %v319_v5 = vld [vmem:[%s2261_s28 + $0x228] sm:$0xf]  ;;  %v321_v6 = vld [vmem:[%s2261_s28 + $0x230] sm:$0xf] }
  0x36   : > { %250 = vst [vmem:[%s2265_s29 + $0x88] sm:$0xf] %v249_v34  ;;  %v323_v7 = vld [vmem:[%s2261_s28 + $0x238] sm:$0xf]  ;;  %v325_v8 = vld [vmem:[%s2261_s28 + $0x240] sm:$0xf] }
  0x37   : > { %252 = vst [vmem:[%s2265_s29 + $0x8c] sm:$0xf] %v251_v35  ;;  %v327_v9 = vld [vmem:[%s2261_s28 + $0x248] sm:$0xf]  ;;  %v329_v10 = vld [vmem:[%s2261_s28 + $0x250] sm:$0xf] }
  0x38   : > { %254 = vst [vmem:[%s2265_s29 + $0x90] sm:$0xf] %v253_v36  ;;  %v331_v11 = vld [vmem:[%s2261_s28 + $0x258] sm:$0xf]  ;;  %v333_v12 = vld [vmem:[%s2261_s28 + $0x260] sm:$0xf] }
  0x39   : > { %256 = vst [vmem:[%s2265_s29 + $0x94] sm:$0xf] %v255_v37  ;;  %v335_v13 = vld [vmem:[%s2261_s28 + $0x268] sm:$0xf]  ;;  %v337_v14 = vld [vmem:[%s2261_s28 + $0x270] sm:$0xf] }
  0x3a   : > { %258 = vst [vmem:[%s2265_s29 + $0x98] sm:$0xf] %v257_v38  ;;  %v339_v15 = vld [vmem:[%s2261_s28 + $0x278] sm:$0xf]  ;;  %v341_v16 = vld [vmem:[%s2261_s28 + $0x280] sm:$0xf] }
  0x3b   : > { %260 = vst [vmem:[%s2265_s29 + $0x9c] sm:$0xf] %v259_v39  ;;  %v343_v17 = vld [vmem:[%s2261_s28 + $0x288] sm:$0xf]  ;;  %v345_v18 = vld [vmem:[%s2261_s28 + $0x290] sm:$0xf] }
  0x3c   : > { %262 = vst [vmem:[%s2265_s29 + $0xa0] sm:$0xf] %v261_v40  ;;  %v347_v19 = vld [vmem:[%s2261_s28 + $0x298] sm:$0xf]  ;;  %v349_v20 = vld [vmem:[%s2261_s28 + $0x2a0] sm:$0xf] }
  0x3d   : > { %264 = vst [vmem:[%s2265_s29 + $0xa4] sm:$0xf] %v263_v41  ;;  %v351_v21 = vld [vmem:[%s2261_s28 + $0x2a8] sm:$0xf]  ;;  %v353_v22 = vld [vmem:[%s2261_s28 + $0x2b0] sm:$0xf] }
  0x3e   : > { %266 = vst [vmem:[%s2265_s29 + $0xa8] sm:$0xf] %v265_v42  ;;  %v355_v23 = vld [vmem:[%s2261_s28 + $0x2b8] sm:$0xf]  ;;  %v357_v24 = vld [vmem:[%s2261_s28 + $0x2c0] sm:$0xf] }
  0x3f   : > { %268 = vst [vmem:[%s2265_s29 + $0xac] sm:$0xf] %v267_v43  ;;  %v359_v25 = vld [vmem:[%s2261_s28 + $0x2c8] sm:$0xf]  ;;  %v361_v26 = vld [vmem:[%s2261_s28 + $0x2d0] sm:$0xf] }
  0x40   : > { %270 = vst [vmem:[%s2265_s29 + $0xb0] sm:$0xf] %v269_v44  ;;  %v363_v27 = vld [vmem:[%s2261_s28 + $0x2d8] sm:$0xf]  ;;  %v365_v28 = vld [vmem:[%s2261_s28 + $0x2e0] sm:$0xf] }
  0x41   : > { %272 = vst [vmem:[%s2265_s29 + $0xb4] sm:$0xf] %v271_v45  ;;  %v367_v29 = vld [vmem:[%s2261_s28 + $0x2e8] sm:$0xf]  ;;  %v369_v30 = vld [vmem:[%s2261_s28 + $0x2f0] sm:$0xf] }
  0x42   : > { %274 = vst [vmem:[%s2265_s29 + $0xb8] sm:$0xf] %v273_v46  ;;  %v371_v31 = vld [vmem:[%s2261_s28 + $0x2f8] sm:$0xf]  ;;  %v373_v32 = vld [vmem:[%s2261_s28 + $0x300] sm:$0xf] }
  0x43   : > { %276 = vst [vmem:[%s2265_s29 + $0xbc] sm:$0xf] %v275_v47  ;;  %v375_v33 = vld [vmem:[%s2261_s28 + $0x308] sm:$0xf]  ;;  %v377_v34 = vld [vmem:[%s2261_s28 + $0x310] sm:$0xf] }
  0x44   : > { %278 = vst [vmem:[%s2265_s29 + $0xc0] sm:$0xf] %v277_v48  ;;  %v379_v35 = vld [vmem:[%s2261_s28 + $0x318] sm:$0xf]  ;;  %v381_v36 = vld [vmem:[%s2261_s28 + $0x320] sm:$0xf] }
  0x45   : > { %280 = vst [vmem:[%s2265_s29 + $0xc4] sm:$0xf] %v279_v49  ;;  %v383_v37 = vld [vmem:[%s2261_s28 + $0x328] sm:$0xf]  ;;  %v385_v38 = vld [vmem:[%s2261_s28 + $0x330] sm:$0xf] }
  0x46   : > { %282 = vst [vmem:[%s2265_s29 + $0xc8] sm:$0xf] %v281_v50  ;;  %v387_v39 = vld [vmem:[%s2261_s28 + $0x338] sm:$0xf]  ;;  %v389_v40 = vld [vmem:[%s2261_s28 + $0x340] sm:$0xf] }
  0x47   : > { %284 = vst [vmem:[%s2265_s29 + $0xcc] sm:$0xf] %v283_v51  ;;  %v391_v41 = vld [vmem:[%s2261_s28 + $0x348] sm:$0xf]  ;;  %v393_v42 = vld [vmem:[%s2261_s28 + $0x350] sm:$0xf] }
  0x48   : > { %286 = vst [vmem:[%s2265_s29 + $0xd0] sm:$0xf] %v285_v52  ;;  %v395_v43 = vld [vmem:[%s2261_s28 + $0x358] sm:$0xf]  ;;  %v397_v44 = vld [vmem:[%s2261_s28 + $0x360] sm:$0xf] }
  0x49   : > { %288 = vst [vmem:[%s2265_s29 + $0xd4] sm:$0xf] %v287_v53  ;;  %v399_v45 = vld [vmem:[%s2261_s28 + $0x368] sm:$0xf]  ;;  %v401_v46 = vld [vmem:[%s2261_s28 + $0x370] sm:$0xf] }
  0x4a   : > { %290 = vst [vmem:[%s2265_s29 + $0xd8] sm:$0xf] %v289_v54  ;;  %v403_v47 = vld [vmem:[%s2261_s28 + $0x378] sm:$0xf]  ;;  %v405_v48 = vld [vmem:[%s2261_s28 + $0x380] sm:$0xf] }
  0x4b   : > { %292 = vst [vmem:[%s2265_s29 + $0xdc] sm:$0xf] %v291_v55  ;;  %v407_v49 = vld [vmem:[%s2261_s28 + $0x388] sm:$0xf]  ;;  %v409_v50 = vld [vmem:[%s2261_s28 + $0x390] sm:$0xf] }
  0x4c   : > { %294 = vst [vmem:[%s2265_s29 + $0xe0] sm:$0xf] %v293_v56  ;;  %v411_v51 = vld [vmem:[%s2261_s28 + $0x398] sm:$0xf]  ;;  %v413_v52 = vld [vmem:[%s2261_s28 + $0x3a0] sm:$0xf] }
  0x4d   : > { %296 = vst [vmem:[%s2265_s29 + $0xe4] sm:$0xf] %v295_v57  ;;  %v415_v53 = vld [vmem:[%s2261_s28 + $0x3a8] sm:$0xf]  ;;  %v417_v54 = vld [vmem:[%s2261_s28 + $0x3b0] sm:$0xf] }
  0x4e   : > { %298 = vst [vmem:[%s2265_s29 + $0xe8] sm:$0xf] %v297_v58  ;;  %v419_v55 = vld [vmem:[%s2261_s28 + $0x3b8] sm:$0xf]  ;;  %v421_v56 = vld [vmem:[%s2261_s28 + $0x3c0] sm:$0xf] }
  0x4f   : > { %300 = vst [vmem:[%s2265_s29 + $0xec] sm:$0xf] %v299_v59  ;;  %v423_v57 = vld [vmem:[%s2261_s28 + $0x3c8] sm:$0xf]  ;;  %v425_v58 = vld [vmem:[%s2261_s28 + $0x3d0] sm:$0xf] }
  0x50   : > { %302 = vst [vmem:[%s2265_s29 + $0xf0] sm:$0xf] %v301_v60  ;;  %v427_v59 = vld [vmem:[%s2261_s28 + $0x3d8] sm:$0xf]  ;;  %v429_v60 = vld [vmem:[%s2261_s28 + $0x3e0] sm:$0xf] }
  0x51   : > { %304 = vst [vmem:[%s2265_s29 + $0xf4] sm:$0xf] %v303_v61  ;;  %v431_v61 = vld [vmem:[%s2261_s28 + $0x3e8] sm:$0xf] }
  0x52   : > { %306 = vst [vmem:[%s2265_s29 + $0xf8] sm:$0xf] %v305_v62  ;;  %v433_v62 = vld [vmem:[%s2261_s28 + $0x3f0] sm:$0xf] }
  0x53   : > { %308 = vst [vmem:[%s2265_s29 + $0xfc] sm:$0xf] %v307_v63  ;;  %v435_v63 = vld [vmem:[%s2261_s28 + $0x3f8] sm:$0xf] }
  0x54   : > { %310 = vst [vmem:[%s2265_s29 + $0x100] sm:$0xf] %v309_v0 }
  0x55   : > { %312 = vst [vmem:[%s2265_s29 + $0x104] sm:$0xf] %v311_v1 }
  0x56   : > { %314 = vst [vmem:[%s2265_s29 + $0x108] sm:$0xf] %v313_v2 }
  0x57   : > { %316 = vst [vmem:[%s2265_s29 + $0x10c] sm:$0xf] %v315_v3 }
  0x58   : > { %318 = vst [vmem:[%s2265_s29 + $0x110] sm:$0xf] %v317_v4 }
  0x59   : > { %320 = vst [vmem:[%s2265_s29 + $0x114] sm:$0xf] %v319_v5 }
  0x5a   : > { %322 = vst [vmem:[%s2265_s29 + $0x118] sm:$0xf] %v321_v6 }
  0x5b   : > { %324 = vst [vmem:[%s2265_s29 + $0x11c] sm:$0xf] %v323_v7 }
  0x5c   : > { %326 = vst [vmem:[%s2265_s29 + $0x120] sm:$0xf] %v325_v8 }
  0x5d   : > { %328 = vst [vmem:[%s2265_s29 + $0x124] sm:$0xf] %v327_v9 }
  0x5e   : > { %330 = vst [vmem:[%s2265_s29 + $0x128] sm:$0xf] %v329_v10 }
  0x5f   : > { %332 = vst [vmem:[%s2265_s29 + $0x12c] sm:$0xf] %v331_v11 }
  0x60   : > { %334 = vst [vmem:[%s2265_s29 + $0x130] sm:$0xf] %v333_v12 }
  0x61   : > { %336 = vst [vmem:[%s2265_s29 + $0x134] sm:$0xf] %v335_v13 }
  0x62   : > { %338 = vst [vmem:[%s2265_s29 + $0x138] sm:$0xf] %v337_v14 }
  0x63   : > { %340 = vst [vmem:[%s2265_s29 + $0x13c] sm:$0xf] %v339_v15 }
  0x64   : > { %342 = vst [vmem:[%s2265_s29 + $0x140] sm:$0xf] %v341_v16 }
  0x65   : > { %344 = vst [vmem:[%s2265_s29 + $0x144] sm:$0xf] %v343_v17 }
  0x66   : > { %346 = vst [vmem:[%s2265_s29 + $0x148] sm:$0xf] %v345_v18 }
  0x67   : > { %348 = vst [vmem:[%s2265_s29 + $0x14c] sm:$0xf] %v347_v19 }
  0x68   : > { %350 = vst [vmem:[%s2265_s29 + $0x150] sm:$0xf] %v349_v20 }
  0x69   : > { %352 = vst [vmem:[%s2265_s29 + $0x154] sm:$0xf] %v351_v21 }
  0x6a   : > { %354 = vst [vmem:[%s2265_s29 + $0x158] sm:$0xf] %v353_v22 }
  0x6b   : > { %356 = vst [vmem:[%s2265_s29 + $0x15c] sm:$0xf] %v355_v23 }
  0x6c   : > { %358 = vst [vmem:[%s2265_s29 + $0x160] sm:$0xf] %v357_v24 }
  0x6d   : > { %360 = vst [vmem:[%s2265_s29 + $0x164] sm:$0xf] %v359_v25 }
  0x6e   : > { %362 = vst [vmem:[%s2265_s29 + $0x168] sm:$0xf] %v361_v26 }
  0x6f   : > { %364 = vst [vmem:[%s2265_s29 + $0x16c] sm:$0xf] %v363_v27 }
  0x70   : > { %366 = vst [vmem:[%s2265_s29 + $0x170] sm:$0xf] %v365_v28 }
  0x71   : > { %368 = vst [vmem:[%s2265_s29 + $0x174] sm:$0xf] %v367_v29 }
  0x72   : > { %370 = vst [vmem:[%s2265_s29 + $0x178] sm:$0xf] %v369_v30 }
  0x73   : > { %372 = vst [vmem:[%s2265_s29 + $0x17c] sm:$0xf] %v371_v31 }
  0x74   : > { %374 = vst [vmem:[%s2265_s29 + $0x180] sm:$0xf] %v373_v32 }
  0x75   : > { %376 = vst [vmem:[%s2265_s29 + $0x184] sm:$0xf] %v375_v33 }
  0x76   : > { %378 = vst [vmem:[%s2265_s29 + $0x188] sm:$0xf] %v377_v34 }
  0x77   : > { %380 = vst [vmem:[%s2265_s29 + $0x18c] sm:$0xf] %v379_v35 }
  0x78   : > { %382 = vst [vmem:[%s2265_s29 + $0x190] sm:$0xf] %v381_v36 }
  0x79   : > { %384 = vst [vmem:[%s2265_s29 + $0x194] sm:$0xf] %v383_v37 }
  0x7a   : > { %386 = vst [vmem:[%s2265_s29 + $0x198] sm:$0xf] %v385_v38 }
  0x7b   : > { %388 = vst [vmem:[%s2265_s29 + $0x19c] sm:$0xf] %v387_v39 }
  0x7c   : > { %390 = vst [vmem:[%s2265_s29 + $0x1a0] sm:$0xf] %v389_v40 }
  0x7d   : > { %392 = vst [vmem:[%s2265_s29 + $0x1a4] sm:$0xf] %v391_v41 }
  0x7e   : > { %394 = vst [vmem:[%s2265_s29 + $0x1a8] sm:$0xf] %v393_v42 }
  0x7f   : > { %396 = vst [vmem:[%s2265_s29 + $0x1ac] sm:$0xf] %v395_v43 }
  0x80   : > { %398 = vst [vmem:[%s2265_s29 + $0x1b0] sm:$0xf] %v397_v44 }
  0x81   : > { %400 = vst [vmem:[%s2265_s29 + $0x1b4] sm:$0xf] %v399_v45 }
  0x82   : > { %402 = vst [vmem:[%s2265_s29 + $0x1b8] sm:$0xf] %v401_v46 }
  0x83   : > { %404 = vst [vmem:[%s2265_s29 + $0x1bc] sm:$0xf] %v403_v47 }
  0x84   : > { %406 = vst [vmem:[%s2265_s29 + $0x1c0] sm:$0xf] %v405_v48 }
  0x85   : > { %408 = vst [vmem:[%s2265_s29 + $0x1c4] sm:$0xf] %v407_v49 }
  0x86   : > { %410 = vst [vmem:[%s2265_s29 + $0x1c8] sm:$0xf] %v409_v50 }
  0x87   : > { %412 = vst [vmem:[%s2265_s29 + $0x1cc] sm:$0xf] %v411_v51 }
  0x88   : > { %414 = vst [vmem:[%s2265_s29 + $0x1d0] sm:$0xf] %v413_v52 }
  0x89   : > { %416 = vst [vmem:[%s2265_s29 + $0x1d4] sm:$0xf] %v415_v53 }
  0x8a   : > { %418 = vst [vmem:[%s2265_s29 + $0x1d8] sm:$0xf] %v417_v54 }
  0x8b   : > { %420 = vst [vmem:[%s2265_s29 + $0x1dc] sm:$0xf] %v419_v55 }
  0x8c   : > { %422 = vst [vmem:[%s2265_s29 + $0x1e0] sm:$0xf] %v421_v56 }
  0x8d   : > { %424 = vst [vmem:[%s2265_s29 + $0x1e4] sm:$0xf] %v423_v57 }
  0x8e   : > { %426 = vst [vmem:[%s2265_s29 + $0x1e8] sm:$0xf] %v425_v58 }
  0x8f   : > { %428 = vst [vmem:[%s2265_s29 + $0x1ec] sm:$0xf] %v427_v59 }
  0x90   : > { %430 = vst [vmem:[%s2265_s29 + $0x1f0] sm:$0xf] %v429_v60 }
  0x91   : > { %432 = vst [vmem:[%s2265_s29 + $0x1f4] sm:$0xf] %v431_v61 }
  0x92   : > { %434 = vst [vmem:[%s2265_s29 + $0x1f8] sm:$0xf] %v433_v62 }
  0x93   : > { %436 = vst [vmem:[%s2265_s29 + $0x1fc] sm:$0xf] %v435_v63 }
  0x94 PF: > { %p1705_p8 = scmp.ge.s32.totalorder %s2191_s16, 1  ;;  %p721_p9 = scmp.lt.s32.totalorder %s2191_s16, 3 }
  0x96   : > { %p722_p10 = pnand %p1705_p8, %p721_p9 }
  0x97   : > { %s728_s30 = sand.u32 (!%p722_p10), 1, %s2175_s12   ;;  %p766_p11 = scmp.lt.s32.totalorder (!%p722_p10), %s2183_s14, 1 }
  0x98   : > { %725 = sbr.rel (%p722_p10) target bundleno = 395 (0x18b), region = 69  ;;  %s1706_s4 = sshll.u32 (!%p722_p10), %s728_s30, 9 }
  0x99   : > { %s2526_s5 = scalar_lea.vmem (!%p722_p10), [#allocation2], %s1706_s4 }
  0x9d   : > { %v2055_v0 = vld [vmem:[%s2526_s5 + $0x38] sm:$0xff]  ;;  %v2054_v4 = vld [vmem:[%s2526_s5 + $0x30] sm:$0xff]  ;;  %v2053_v8 = vld [vmem:[%s2526_s5 + $0x28] sm:$0xff]  ;;  %s2552_s6 = scalar_select %p766_p11, %s2183_s14, 1 }
  0x9e   : > { %v2063_v1 = vld [vmem:[%s2526_s5 + $0x78] sm:$0xff]  ;;  %1382 = vmatpush.bf16.msra.mxu0 %v2055_v0  ;;  %v2062_v5 = vld [vmem:[%s2526_s5 + $0x70] sm:$0xff]  ;;  %v2061_v9 = vld [vmem:[%s2526_s5 + $0x68] sm:$0xff]  ;;  %s2029_s12 = sshll.u32 (%p2248_p6), %s2183_s14, 3 }
  0x9f   : > { %v2071_v2 = vld [vmem:[%s2526_s5 + $0xb8] sm:$0xff]  ;;  %1401 = vmatpush.bf16.msra.mxu1 %v2063_v1  ;;  %v2070_v6 = vld [vmem:[%s2526_s5 + $0xb0] sm:$0xff]  ;;  %v2069_v10 = vld [vmem:[%s2526_s5 + $0xa8] sm:$0xff]  ;;  %s768_s9 = scalar_lea.vmem %s2736_s2, %s2552_s6  ;;  %s1707_s6 = sshll.u32 %s728_s30, 5 }
  0xa0   : > { %v2079_v3 = vld [vmem:[%s2526_s5 + $0xf8] sm:$0xff]  ;;  %1420 = vmatpush.bf16.msra.mxu2 %v2071_v2  ;;  %v2078_v7 = vld [vmem:[%s2526_s5 + $0xf0] sm:$0xff]  ;;  %v2077_v11 = vld [vmem:[%s2526_s5 + $0xe8] sm:$0xff]  ;;  %s1561_s23 = scalar_lea.vmem (%p2248_p6), %s2737_s3, %s2029_s12 }
  0xa1   : > { %1439 = vmatpush.bf16.msra.mxu3 %v2079_v3  ;;  %v2052_v12 = vld [vmem:[%s2526_s5 + $0x20] sm:$0xff]  ;;  %v2051_v16 = vld [vmem:[%s2526_s5 + $0x18] sm:$0xff]  ;;  %v2050_v20 = vld [vmem:[%s2526_s5 + $0x10] sm:$0xff] }
  0xa2   : > { %1383 = vmatpush.bf16.msra.mxu0 %v2054_v4  ;;  %v2060_v13 = vld [vmem:[%s2526_s5 + $0x60] sm:$0xff]  ;;  %v2059_v17 = vld [vmem:[%s2526_s5 + $0x58] sm:$0xff]  ;;  %v2058_v21 = vld [vmem:[%s2526_s5 + $0x50] sm:$0xff] }
  0xa3   : > { %1402 = vmatpush.bf16.msra.mxu1 %v2062_v5  ;;  %v2068_v14 = vld [vmem:[%s2526_s5 + $0xa0] sm:$0xff]  ;;  %v2067_v18 = vld [vmem:[%s2526_s5 + $0x98] sm:$0xff]  ;;  %v2066_v22 = vld [vmem:[%s2526_s5 + $0x90] sm:$0xff] }
  0xa4   : > { %1421 = vmatpush.bf16.msra.mxu2 %v2070_v6  ;;  %v2076_v15 = vld [vmem:[%s2526_s5 + $0xe0] sm:$0xff]  ;;  %v2075_v19 = vld [vmem:[%s2526_s5 + $0xd8] sm:$0xff]  ;;  %v2074_v23 = vld [vmem:[%s2526_s5 + $0xd0] sm:$0xff] }
  0xa5   : > { %1440 = vmatpush.bf16.msra.mxu3 %v2078_v7  ;;  %v2049_v24 = vld [vmem:[%s2526_s5 + $0x8] sm:$0xff]  ;;  %v2048_v28 = vld [vmem:[%s2526_s5] sm:$0xff]  ;;  %v2103_v40 = vld [vmem:[%s2526_s5 + $0x1b8] sm:$0xff] }
  0xa6   : > { %1384 = vmatpush.bf16.msra.mxu0 %v2053_v8  ;;  %v2057_v25 = vld [vmem:[%s2526_s5 + $0x48] sm:$0xff]  ;;  %v1710_v29 = vld [vmem:[%s2734_s0] sm:$0xf]  ;;  %v2032_v34 = vld [vmem:[%s2734_s0 + $0x4] sm:$0xf] }
  0xa7   : > { %1403 = vmatpush.bf16.msra.mxu1 %v2061_v9  ;;  %v2065_v26 = vld [vmem:[%s2526_s5 + $0x88] sm:$0xff]  ;;  %v2036_v30 = vld [vmem:[%s2734_s0 + $0x1c] sm:$0xf0]  ;;  %v1712_v35 = vld [vmem:[%s2734_s0 + $0x20] sm:$0xf0] }
  0xa8   : > { %1422 = vmatpush.bf16.msra.mxu2 %v2069_v10  ;;  %v2073_v27 = vld [vmem:[%s2526_s5 + $0xc8] sm:$0xff]  ;;  %v2056_v31 = vld [vmem:[%s2526_s5 + $0x40] sm:$0xff]  ;;  %v2087_v41 = vld [vmem:[%s2526_s5 + $0x138] sm:$0xff]  ;;  %v1711_v42 = vor.u32 %v2036_v30, %v1710_v29  ;;  %v1715_v43 = vor.u32 %v2032_v34, %v1712_v35 }
  0xa9   : > { %1441 = vmatpush.bf16.msra.mxu3 %v2077_v11  ;;  %v2064_v32 = vld [vmem:[%s2526_s5 + $0x80] sm:$0xff]  ;;  %v1718_v36 = vld [vmem:[%s2734_s0 + $0x8] sm:$0xf]  ;;  %v2033_v38 = vld [vmem:[%s2734_s0 + $0xc] sm:$0xf] }
  0xaa   : > { %1385 = vmatpush.bf16.msra.mxu0 %v2052_v12  ;;  %v2072_v33 = vld [vmem:[%s2526_s5 + $0xc0] sm:$0xff]  ;;  %v2037_v37 = vld [vmem:[%s2734_s0 + $0x24] sm:$0xf0]  ;;  %v1720_v39 = vld [vmem:[%s2734_s0 + $0x28] sm:$0xf0] }
  0xab   : > { %1404 = vmatpush.bf16.msra.mxu1 %v2060_v13  ;;  %v1719_v44 = vor.u32 %v2037_v37, %v1718_v36  ;;  %v1723_v45 = vor.u32 %v2033_v38, %v1720_v39  ;;  %v2095_v46 = vld [vmem:[%s2526_s5 + $0x178] sm:$0xff]  ;;  %v2102_v48 = vld [vmem:[%s2526_s5 + $0x1b0] sm:$0xff]  ;;  %v2101_v52 = vld [vmem:[%s2526_s5 + $0x1a8] sm:$0xff] }
  0xac   : > { %1423 = vmatpush.bf16.msra.mxu2 %v2068_v14  ;;  %v2111_v47 = vld [vmem:[%s2526_s5 + $0x1f8] sm:$0xff]  ;;  %v2086_v49 = vld [vmem:[%s2526_s5 + $0x130] sm:$0xff]  ;;  %v2085_v53 = vld [vmem:[%s2526_s5 + $0x128] sm:$0xff] }
  0xad   : > { %1442 = vmatpush.bf16.msra.mxu3 %v2076_v15  ;;  %v2094_v50 = vld [vmem:[%s2526_s5 + $0x170] sm:$0xff]  ;;  %v2093_v54 = vld [vmem:[%s2526_s5 + $0x168] sm:$0xff]  ;;  %v2100_v56 = vld [vmem:[%s2526_s5 + $0x1a0] sm:$0xff] }
  0xae   : > { %1386 = vmatpush.bf16.msra.mxu0 %v2051_v16  ;;  %v2110_v51 = vld [vmem:[%s2526_s5 + $0x1f0] sm:$0xff]  ;;  %v2109_v55 = vld [vmem:[%s2526_s5 + $0x1e8] sm:$0xff]  ;;  %v2084_v57 = vld [vmem:[%s2526_s5 + $0x120] sm:$0xff] }
  0xaf   : > { %1405 = vmatpush.bf16.msra.mxu1 %v2059_v17  ;;  %v2092_v58 = vld [vmem:[%s2526_s5 + $0x160] sm:$0xff]  ;;  %v1750_v0 = vld [vmem:[%s2734_s0 + $0x48] sm:$0xf]  ;;  %v2041_v2 = vld [vmem:[%s2734_s0 + $0x4c] sm:$0xf] }
  0xb0   : > { %1424 = vmatpush.bf16.msra.mxu2 %v2067_v18  ;;  %v2108_v59 = vld [vmem:[%s2526_s5 + $0x1e0] sm:$0xff]  ;;  %v2045_v1 = vld [vmem:[%s2734_s0 + $0x64] sm:$0xf0]  ;;  %v1752_v3 = vld [vmem:[%s2734_s0 + $0x68] sm:$0xf0] }
  0xb1   : > { %1443 = vmatpush.bf16.msra.mxu3 %v2075_v19  ;;  %v1742_v60 = vld [vmem:[%s2734_s0 + $0x40] sm:$0xf]  ;;  %v2040_v62 = vld [vmem:[%s2734_s0 + $0x44] sm:$0xf]  ;;  %v2099_v4 = vld [vmem:[%s2526_s5 + $0x198] sm:$0xff]  ;;  %v1751_v8 = vor.u32 %v2045_v1, %v1750_v0  ;;  %v1755_v9 = vor.u32 %v2041_v2, %v1752_v3 }
  0xb2   : > { %1387 = vmatpush.bf16.msra.mxu0 %v2050_v20  ;;  %v2044_v61 = vld [vmem:[%s2734_s0 + $0x5c] sm:$0xf0]  ;;  %v1744_v63 = vld [vmem:[%s2734_s0 + $0x60] sm:$0xf0]  ;;  %v2083_v5 = vld [vmem:[%s2526_s5 + $0x118] sm:$0xff] }
  0xb3   : > { %1406 = vmatpush.bf16.msra.mxu1 %v2058_v21  ;;  %v1743_v6 = vor.u32 %v2044_v61, %v1742_v60  ;;  %v1747_v7 = vor.u32 %v2040_v62, %v1744_v63  ;;  %v2091_v10 = vld [vmem:[%s2526_s5 + $0x158] sm:$0xff]  ;;  %v2098_v12 = vld [vmem:[%s2526_s5 + $0x190] sm:$0xff]  ;;  %v2097_v16 = vld [vmem:[%s2526_s5 + $0x188] sm:$0xff] }
  0xb4   : > { %1425 = vmatpush.bf16.msra.mxu2 %v2066_v22  ;;  %v2107_v11 = vld [vmem:[%s2526_s5 + $0x1d8] sm:$0xff]  ;;  %v2082_v13 = vld [vmem:[%s2526_s5 + $0x110] sm:$0xff]  ;;  %v2081_v17 = vld [vmem:[%s2526_s5 + $0x108] sm:$0xff] }
  0xb5   : > { %1444 = vmatpush.bf16.msra.mxu3 %v2074_v23  ;;  %v2090_v14 = vld [vmem:[%s2526_s5 + $0x150] sm:$0xff]  ;;  %v2089_v18 = vld [vmem:[%s2526_s5 + $0x148] sm:$0xff]  ;;  %v2096_v20 = vld [vmem:[%s2526_s5 + $0x180] sm:$0xff] }
  0xb6   : > { %1388 = vmatpush.bf16.msra.mxu0 %v2049_v24  ;;  %v2106_v15 = vld [vmem:[%s2526_s5 + $0x1d0] sm:$0xff]  ;;  %v2105_v19 = vld [vmem:[%s2526_s5 + $0x1c8] sm:$0xff]  ;;  %v2080_v21 = vld [vmem:[%s2526_s5 + $0x100] sm:$0xff] }
  0xb7   : > { %1407 = vmatpush.bf16.msra.mxu1 %v2057_v25  ;;  %v2088_v22 = vld [vmem:[%s2526_s5 + $0x140] sm:$0xff]  ;;  %v1726_v24 = vld [vmem:[%s2734_s0 + $0x10] sm:$0xf]  ;;  %v2039_v29 = vld [vmem:[%s2734_s0 + $0x34] sm:$0xf0] }
  0xb8   : > { %1426 = vmatpush.bf16.msra.mxu2 %v2065_v26  ;;  %v2104_v23 = vld [vmem:[%s2526_s5 + $0x1c0] sm:$0xff]  ;;  %v2038_v25 = vld [vmem:[%s2734_s0 + $0x2c] sm:$0xf0]  ;;  %v2034_v26 = vld [vmem:[%s2734_s0 + $0x14] sm:$0xf] }
  0xb9   : > { %1445 = vmatpush.bf16.msra.mxu3 %v2073_v27  ;;  %v1728_v27 = vld [vmem:[%s2734_s0 + $0x30] sm:$0xf0]  ;;  %v2035_v30 = vld [vmem:[%s2734_s0 + $0x1c] sm:$0xf]  ;;  %v1758_v36 = vld [vmem:[%s2734_s0 + $0x50] sm:$0xf] }
  0xba   : > { %1389 = vmatpush.bf16.msra.mxu0 %v2048_v28  ;;  %v1734_v28 = vld [vmem:[%s2734_s0 + $0x18] sm:$0xf]  ;;  %v2046_v37 = vld [vmem:[%s2734_s0 + $0x6c] sm:$0xf0]  ;;  %v2042_v38 = vld [vmem:[%s2734_s0 + $0x54] sm:$0xf] }
  0xbb   : > { %1408 = vmatpush.bf16.msra.mxu1 %v2056_v31  ;;  %v1736_v31 = vld [vmem:[%s2734_s0 + $0x38] sm:$0xf0]  ;;  %v1735_v34 = vor.u32 %v2039_v29, %v1734_v28  ;;  %v1760_v39 = vld [vmem:[%s2734_s0 + $0x70] sm:$0xf0] }
  0xbc   : > { %1427 = vmatpush.bf16.msra.mxu2 %v2064_v32  ;;  %v1727_v32 = vor.u32 %v2038_v25, %v1726_v24  ;;  %v1739_v35 = vor.u32 %v2035_v30, %v1736_v31 }
  0xbd   : > { %1446 = vmatpush.bf16.msra.mxu3 %v2072_v33  ;;  %1390 = vmatmul.bf16.vlgmr.msra.gmra.mxu0 %v1711_v42  ;;  %v1731_v33 = vor.u32 %v2034_v26, %v1728_v27  ;;  %v2043_v42 = vld [vmem:[%s2734_s0 + $0x5c] sm:$0xf] }
  0xbe   : > { %1458 = vmatpush.bf16.msrb.mxu0 %v2087_v41  ;;  %1409 = vmatmul.bf16.vlgmr.msra.gmra.mxu1 %v1715_v43  ;;  %v2047_v41 = vld [vmem:[%s2734_s0 + $0x74] sm:$0xf0]  ;;  %v1768_v43 = vld [vmem:[%s2734_s0 + $0x78] sm:$0xf0] }
  0xbf   : > { %1428 = vmatmul.bf16.vlgmr.msra.gmra.mxu2 %v1719_v44  ;;  %1477 = vmatpush.bf16.msrb.mxu1 %v2095_v46  ;;  %v1759_v44 = vor.u32 %v2046_v37, %v1758_v36 }
  0xc0   : > { %1496 = vmatpush.bf16.msrb.mxu2 %v2103_v40  ;;  %1447 = vmatmul.bf16.vlgmr.msra.gmra.mxu3 %v1723_v45  ;;  %v1766_v40 = vld [vmem:[%s2734_s0 + $0x58] sm:$0xf]  ;;  %v1763_v45 = vor.u32 %v2042_v38, %v1760_v39 }
  0xc1   : > { %1515 = vmatpush.bf16.msrb.mxu3 %v2111_v47  ;;  %v1767_v46 = vor.u32 %v2047_v41, %v1766_v40  ;;  %v1771_v47 = vor.u32 %v2043_v42, %v1768_v43 }
  0xc2   : > { %1459 = vmatpush.bf16.msrb.mxu0 %v2086_v49 }
  0xc3   : > { %1478 = vmatpush.bf16.msrb.mxu1 %v2094_v50 }
  0xc4   : > { %1497 = vmatpush.bf16.msrb.mxu2 %v2102_v48 }
  0xc5   : > { %1516 = vmatpush.bf16.msrb.mxu3 %v2110_v51 }
  0xc6   : > { %1460 = vmatpush.bf16.msrb.mxu0 %v2085_v53 }
  0xc7   : > { %1479 = vmatpush.bf16.msrb.mxu1 %v2093_v54 }
  0xc8   : > { %1498 = vmatpush.bf16.msrb.mxu2 %v2101_v52 }
  0xc9   : > { %1517 = vmatpush.bf16.msrb.mxu3 %v2109_v55 }
  0xca   : > { %1461 = vmatpush.bf16.msrb.mxu0 %v2084_v57 }
  0xcb   : > { %1480 = vmatpush.bf16.msrb.mxu1 %v2092_v58 }
  0xcc   : > { %1499 = vmatpush.bf16.msrb.mxu2 %v2100_v56  ;;  %v2152_v56 = vld [vmem:[%s768_s9] ss:$0 sm:$0xff]  ;;  %s2703_s9 = scalar_lea.vmem [#allocation3], %s1707_s6 }
  0xcd   : > { %1518 = vmatpush.bf16.msrb.mxu3 %v2108_v59  ;;  %1395 = vmatmul.bf16.gmra.mxu0 %v1743_v6 }
  0xce   : > { %1462 = vmatpush.bf16.msrb.mxu0 %v2083_v5  ;;  %1414 = vmatmul.bf16.gmra.mxu1 %v1747_v7 }
  0xcf   : > { %1433 = vmatmul.bf16.gmra.mxu2 %v1751_v8  ;;  %1481 = vmatpush.bf16.msrb.mxu1 %v2091_v10 }
  0xd0   : > { %1500 = vmatpush.bf16.msrb.mxu2 %v2099_v4  ;;  %1452 = vmatmul.bf16.gmra.mxu3 %v1755_v9 }
  0xd1   : > { %1519 = vmatpush.bf16.msrb.mxu3 %v2107_v11 }
  0xd2   : > { %1463 = vmatpush.bf16.msrb.mxu0 %v2082_v13 }
  0xd3   : > { %1482 = vmatpush.bf16.msrb.mxu1 %v2090_v14 }
  0xd4   : > { %1501 = vmatpush.bf16.msrb.mxu2 %v2098_v12 }
  0xd5   : > { %1520 = vmatpush.bf16.msrb.mxu3 %v2106_v15 }
  0xd6   : > { %1464 = vmatpush.bf16.msrb.mxu0 %v2081_v17 }
  0xd7   : > { %1483 = vmatpush.bf16.msrb.mxu1 %v2089_v18 }
  0xd8   : > { %1502 = vmatpush.bf16.msrb.mxu2 %v2097_v16 }
  0xd9   : > { %1521 = vmatpush.bf16.msrb.mxu3 %v2105_v19 }
  0xda   : > { %1465 = vmatpush.bf16.msrb.mxu0 %v2080_v21 }
  0xdb   : > { %1484 = vmatpush.bf16.msrb.mxu1 %v2088_v22 }
  0xdc   : > { %1503 = vmatpush.bf16.msrb.mxu2 %v2096_v20 }
  0xdd   : > { %1522 = vmatpush.bf16.msrb.mxu3 %v2104_v23  ;;  %1466 = vmatmul.bf16.vlgmr.msrb.gmra.mxu0 %v1727_v32 }
  0xde   : > { %1485 = vmatmul.bf16.vlgmr.msrb.gmra.mxu1 %v1731_v33 }
  0xdf   : > { %1504 = vmatmul.bf16.vlgmr.msrb.gmra.mxu2 %v1735_v34 }
  0xe0   : > { %1523 = vmatmul.bf16.vlgmr.msrb.gmra.mxu3 %v1739_v35 }
  0xed   : > { %1471 = vmatmul.bf16.gmra.mxu0 %v1759_v44 }
  0xee   : > { %1490 = vmatmul.bf16.gmra.mxu1 %v1763_v45 }
  0xef   : > { %1509 = vmatmul.bf16.gmra.mxu2 %v1767_v46 }
  0xf0   : > { %1528 = vmatmul.bf16.gmra.mxu3 %v1771_v47 }
 0x13a   : > { %v1391_v48 = vpop.f32.mrf.mxu0 }
 0x13b   : > { %v1410_v49 = vpop.f32.mrf.mxu1  ;;  %v1392_v59 = vadd.f32 %v2152_v56, %v1391_v48 }
 0x13d   : > { %v1411_v62 = vadd.f32 %v1410_v49, %v1392_v59 }
 0x142   : > { %v1429_v50 = vpop.f32.mrf.mxu2  ;;  %v1393_v52 = vpop.f32.mrf.mxu0 }
 0x143   : > { %v1448_v51 = vpop.f32.mrf.mxu3  ;;  %v1412_v53 = vpop.f32.mrf.mxu1  ;;  %v1430_v1 = vadd.f32 %v1429_v50, %v1411_v62  ;;  %v1394_v2 = vadd.f32 %v2152_v56, %v1393_v52 }
 0x145   : > { %v1449_v5 = vadd.f32 %v1448_v51, %v1430_v1  ;;  %v1413_v8 = vadd.f32 %v1412_v53, %v1394_v2 }
 0x14a   : > { %v1431_v54 = vpop.f32.mrf.mxu2  ;;  %v1396_v57 = vpop.f32.mrf.mxu0 }
 0x14b   : > { %v1450_v55 = vpop.f32.mrf.mxu3  ;;  %v1415_v58 = vpop.f32.mrf.mxu1  ;;  %v1432_v10 = vadd.f32 %v1431_v54, %v1413_v8  ;;  %v1397_v11 = vadd.f32 %v2152_v56, %v1396_v57 }
 0x14d   : > { %v1451_v14 = vadd.f32 %v1450_v55, %v1432_v10  ;;  %v1416_v15 = vadd.f32 %v1415_v58, %v1397_v11 }
 0x152   : > { %v1434_v60 = vpop.f32.mrf.mxu2  ;;  %v1398_v63 = vpop.f32.mrf.mxu0 }
 0x153   : > { %v1453_v61 = vpop.f32.mrf.mxu3  ;;  %v1417_v0 = vpop.f32.mrf.mxu1  ;;  %v1435_v22 = vadd.f32 %v1434_v60, %v1416_v15  ;;  %v1399_v24 = vadd.f32 %v2152_v56, %v1398_v63 }
 0x155   : > { %v1454_v28 = vadd.f32 %v1453_v61, %v1435_v22  ;;  %v1418_v32 = vadd.f32 %v1417_v0, %v1399_v24 }
 0x15a   : > { %v1436_v3 = vpop.f32.mrf.mxu2  ;;  %v1467_v6 = vpop.f32.mrf.mxu0 }
 0x15b   : > { %v1455_v4 = vpop.f32.mrf.mxu3  ;;  %v1486_v7 = vpop.f32.mrf.mxu1  ;;  %v1468_v9 = vadd.f32 %v1467_v6, %v1449_v5  ;;  %v1437_v36 = vadd.f32 %v1436_v3, %v1418_v32 }
 0x15d   : > { %v1487_v12 = vadd.f32 %v1486_v7, %v1468_v9  ;;  %v1456_v41 = vadd.f32 %v1455_v4, %v1437_v36 }
 0x162   : > { %v1505_v13 = vpop.f32.mrf.mxu2  ;;  %v1469_v18 = vpop.f32.mrf.mxu0 }
 0x163   : > { %v1506_v16 = vadd.f32 %v1505_v13, %v1487_v12  ;;  %v1524_v17 = vpop.f32.mrf.mxu3  ;;  %v1488_v19 = vpop.f32.mrf.mxu1  ;;  %v1470_v21 = vadd.f32 %v1469_v18, %v1451_v14 }
 0x165   : > { %v1525_v20 = vadd.f32 %v1524_v17, %v1506_v16  ;;  %v1489_v26 = vadd.f32 %v1488_v19, %v1470_v21 }
 0x167   : > { %vm1534_vm0 = vcmp.ge.f32.partialorder %v1525_v20, 0.0  ;;  %v1538_v23 = vmul.f32 0.01, %v1525_v20 }
 0x169   : > { %v1542_v25 = vsel %vm1534_vm0, %v1525_v20, %v1538_v23 }
 0x16a   : > { %1546 = vst [vmem:[%s2703_s9] sm:$0xff] %v1542_v25  ;;  %v1507_v27 = vpop.f32.mrf.mxu2  ;;  %v1472_v31 = vpop.f32.mrf.mxu0 }
 0x16b   : > { %v1508_v29 = vadd.f32 %v1507_v27, %v1489_v26  ;;  %v1526_v30 = vpop.f32.mrf.mxu3  ;;  %v1473_v34 = vadd.f32 %v1472_v31, %v1454_v28  ;;  %v1491_v35 = vpop.f32.mrf.mxu1 }
 0x16d   : > { %v1527_v33 = vadd.f32 %v1526_v30, %v1508_v29  ;;  %v1492_v39 = vadd.f32 %v1491_v35, %v1473_v34 }
 0x16f   : > { %vm1535_vm1 = vcmp.ge.f32.partialorder %v1527_v33, 0.0  ;;  %v1539_v37 = vmul.f32 0.01, %v1527_v33 }
 0x171   : > { %v1543_v38 = vsel %vm1535_vm1, %v1527_v33, %v1539_v37  ;;  %v1596_v57 = vld [vmem:[%s2703_s9] sm:$0xff] (%p2248_p6) }
 0x172   : > { %1547 = vst [vmem:[%s2703_s9 + $0x8] sm:$0xff] %v1543_v38  ;;  %v1510_v40 = vpop.f32.mrf.mxu2  ;;  %v1474_v44 = vpop.f32.mrf.mxu0 }
 0x173   : > { %v1511_v42 = vadd.f32 %v1510_v40, %v1492_v39  ;;  %v1529_v43 = vpop.f32.mrf.mxu3  ;;  %v1475_v46 = vadd.f32 %v1474_v44, %v1456_v41  ;;  %v1493_v48 = vpop.f32.mrf.mxu1  ;;  %1597 = vst [vmem:[%s1561_s23] sm:$0xff] (%p2248_p6), %v1596_v57 }
 0x175   : > { %v1530_v45 = vadd.f32 %v1529_v43, %v1511_v42  ;;  %v1494_v50 = vadd.f32 %v1493_v48, %v1475_v46 }
 0x177   : > { %vm1536_vm2 = vcmp.ge.f32.partialorder %v1530_v45, 0.0  ;;  %v1540_v47 = vmul.f32 0.01, %v1530_v45 }
 0x179   : > { %v1544_v49 = vsel %vm1536_vm2, %v1530_v45, %v1540_v47  ;;  %v1598_v58 = vld [vmem:[%s2703_s9 + $0x8] sm:$0xff] (%p2248_p6) }
 0x17a   : > { %1548 = vst [vmem:[%s2703_s9 + $0x10] sm:$0xff] %v1544_v49  ;;  %v1512_v51 = vpop.f32.mrf.mxu2 }
 0x17b   : > { %v1513_v52 = vadd.f32 %v1512_v51, %v1494_v50  ;;  %v1531_v53 = vpop.f32.mrf.mxu3  ;;  %1599 = vst [vmem:[%s1561_s23 + $0x10] sm:$0xff] (%p2248_p6), %v1598_v58 }
 0x17d   : > { %v1532_v54 = vadd.f32 %v1531_v53, %v1513_v52 }
 0x17e   : > { %1556 = sbr.rel (!%p2248_p6) target bundleno = 395 (0x18b), region = 77 }
 0x17f   : > { %vm1537_vm3 = vcmp.ge.f32.partialorder %v1532_v54, 0.0  ;;  %v1541_v55 = vmul.f32 0.01, %v1532_v54 }
 0x181   : > { %v1545_v56 = vsel %vm1537_vm3, %v1532_v54, %v1541_v55  ;;  %v1600_v59 = vld [vmem:[%s2703_s9 + $0x10] sm:$0xff] (%p2248_p6) }
 0x182   : > { %1549 = vst [vmem:[%s2703_s9 + $0x18] sm:$0xff] %v1545_v56 }
 0x183   : > { %1601 = vst [vmem:[%s1561_s23 + $0x20] sm:$0xff] %v1600_v59 }
 0x189   : > { %v1602_v60 = vld [vmem:[%s2703_s9 + $0x18] sm:$0xff] }
 0x18a   : > { %1603 = vst [vmem:[%s1561_s23 + $0x30] sm:$0xff] %v1602_v60 }
 0x18b PF: > { %s13_s16 = sadd.s32 1, %s2191_s16   ;;  %s2739_s12 = smov %s2179_s13 }
 0x18c   : > { %p10_p12 = scmp.ge.s32.totalorder %s13_s16, 4   ;;  %s2740_s13 = smov %s2253_s22 }
 0x18d   : > { %s2741_s14 = smov %s2187_s15  ;;  %s2742_s15 = smov %s2744_s17 }
 0x18e   :  { %12 = sbr.rel (!%p10_p12) target bundleno = 3 (0x3), region = 152 }

// kernel: u_net_forward.15
= control target key start
LH: loop header
LB: loop body
LE: loop exit
PB: predicated region body
PF: predicated region fallthrough
CT: control target
= control target key end

     0   :  { %s1428_s1 = inlined_call_operand.vmem [shape: bf16[512,128], index: 1, kind: input, shape index: {}]   ;;  %s1429_s2 = inlined_call_operand.vmem [shape: f32[1,128], index: 2, kind: input, shape index: {}]   ;;  %s1430_s0 = inlined_call_operand.vmem [shape: bf16[128,512], index: 0, kind: input, shape index: {}]   ;;  %s1431_s3 = inlined_call_operand.vmem [shape: f32[128,128], index: 3, kind: output, shape index: {}]  }
   0x1   :  { %v1025_v0 = vld [vmem:[%s1428_s1 + $0x38] sm:$0xff]  ;;  %v1024_v4 = vld [vmem:[%s1428_s1 + $0x30] sm:$0xff]  ;;  %v1023_v8 = vld [vmem:[%s1428_s1 + $0x28] sm:$0xff] }
   0x2   :  { %v1033_v1 = vld [vmem:[%s1428_s1 + $0x78] sm:$0xff]  ;;  %466 = vmatpush.bf16.msra.mxu0 %v1025_v0  ;;  %v1032_v5 = vld [vmem:[%s1428_s1 + $0x70] sm:$0xff]  ;;  %v1031_v9 = vld [vmem:[%s1428_s1 + $0x68] sm:$0xff] }
   0x3   :  { %v1041_v2 = vld [vmem:[%s1428_s1 + $0xb8] sm:$0xff]  ;;  %515 = vmatpush.bf16.msra.mxu1 %v1033_v1  ;;  %v1040_v6 = vld [vmem:[%s1428_s1 + $0xb0] sm:$0xff]  ;;  %v1039_v10 = vld [vmem:[%s1428_s1 + $0xa8] sm:$0xff] }
   0x4   :  { %v1049_v3 = vld [vmem:[%s1428_s1 + $0xf8] sm:$0xff]  ;;  %564 = vmatpush.bf16.msra.mxu2 %v1041_v2  ;;  %v1048_v7 = vld [vmem:[%s1428_s1 + $0xf0] sm:$0xff]  ;;  %v1047_v11 = vld [vmem:[%s1428_s1 + $0xe8] sm:$0xff] }
   0x5   :  { %613 = vmatpush.bf16.msra.mxu3 %v1049_v3  ;;  %v1022_v12 = vld [vmem:[%s1428_s1 + $0x20] sm:$0xff]  ;;  %v1021_v16 = vld [vmem:[%s1428_s1 + $0x18] sm:$0xff]  ;;  %v1020_v20 = vld [vmem:[%s1428_s1 + $0x10] sm:$0xff] }
   0x6   :  { %467 = vmatpush.bf16.msra.mxu0 %v1024_v4  ;;  %v1030_v13 = vld [vmem:[%s1428_s1 + $0x60] sm:$0xff]  ;;  %v1029_v17 = vld [vmem:[%s1428_s1 + $0x58] sm:$0xff]  ;;  %v1028_v21 = vld [vmem:[%s1428_s1 + $0x50] sm:$0xff] }
   0x7   :  { %516 = vmatpush.bf16.msra.mxu1 %v1032_v5  ;;  %v1038_v14 = vld [vmem:[%s1428_s1 + $0xa0] sm:$0xff]  ;;  %v1037_v18 = vld [vmem:[%s1428_s1 + $0x98] sm:$0xff]  ;;  %v1036_v22 = vld [vmem:[%s1428_s1 + $0x90] sm:$0xff] }
   0x8   :  { %565 = vmatpush.bf16.msra.mxu2 %v1040_v6  ;;  %v1046_v15 = vld [vmem:[%s1428_s1 + $0xe0] sm:$0xff]  ;;  %v1045_v19 = vld [vmem:[%s1428_s1 + $0xd8] sm:$0xff]  ;;  %v1044_v23 = vld [vmem:[%s1428_s1 + $0xd0] sm:$0xff] }
   0x9   :  { %614 = vmatpush.bf16.msra.mxu3 %v1048_v7  ;;  %v1019_v24 = vld [vmem:[%s1428_s1 + $0x8] sm:$0xff]  ;;  %v1018_v28 = vld [vmem:[%s1428_s1] sm:$0xff]  ;;  %v988_v33 = vld [vmem:[%s1430_s0 + $0xc] sm:$0xf0] }
   0xa   :  { %468 = vmatpush.bf16.msra.mxu0 %v1023_v8  ;;  %v1027_v25 = vld [vmem:[%s1428_s1 + $0x48] sm:$0xff]  ;;  %v1026_v29 = vld [vmem:[%s1428_s1 + $0x40] sm:$0xff]  ;;  %v734_v35 = vld [vmem:[%s1430_s0 + $0x10] sm:$0xf0] }
   0xb   :  { %517 = vmatpush.bf16.msra.mxu1 %v1031_v9  ;;  %v1035_v26 = vld [vmem:[%s1428_s1 + $0x88] sm:$0xff]  ;;  %v1034_v30 = vld [vmem:[%s1428_s1 + $0x80] sm:$0xff]  ;;  %v989_v37 = vld [vmem:[%s1430_s0 + $0x14] sm:$0xf0] }
   0xc   :  { %566 = vmatpush.bf16.msra.mxu2 %v1039_v10  ;;  %v1043_v27 = vld [vmem:[%s1428_s1 + $0xc8] sm:$0xff]  ;;  %v1042_v31 = vld [vmem:[%s1428_s1 + $0xc0] sm:$0xff]  ;;  %v742_v39 = vld [vmem:[%s1430_s0 + $0x18] sm:$0xf0] }
   0xd   :  { %615 = vmatpush.bf16.msra.mxu3 %v1047_v11  ;;  %v732_v32 = vld [vmem:[%s1430_s0] sm:$0xf]  ;;  %v986_v34 = vld [vmem:[%s1430_s0 + $0x4] sm:$0xf]  ;;  %v740_v36 = vld [vmem:[%s1430_s0 + $0x8] sm:$0xf] }
   0xe   :  { %469 = vmatpush.bf16.msra.mxu0 %v1022_v12  ;;  %v987_v38 = vld [vmem:[%s1430_s0 + $0xc] sm:$0xf]  ;;  %v733_v40 = vor.u32 %v988_v33, %v732_v32  ;;  %v737_v41 = vor.u32 %v986_v34, %v734_v35  ;;  %v741_v42 = vor.u32 %v989_v37, %v740_v36  ;;  %v748_v44 = vld [vmem:[%s1430_s0 + $0x20] sm:$0xf]  ;;  %v992_v45 = vld [vmem:[%s1430_s0 + $0x2c] sm:$0xf0] }
   0xf   :  { %518 = vmatpush.bf16.msra.mxu1 %v1030_v13  ;;  %v745_v43 = vor.u32 %v987_v38, %v742_v39  ;;  %v990_v46 = vld [vmem:[%s1430_s0 + $0x24] sm:$0xf]  ;;  %v750_v47 = vld [vmem:[%s1430_s0 + $0x30] sm:$0xf0]  ;;  %v756_v48 = vld [vmem:[%s1430_s0 + $0x28] sm:$0xf]  ;;  %v749_v52 = vor.u32 %v992_v45, %v748_v44 }
  0x10   :  { %567 = vmatpush.bf16.msra.mxu2 %v1038_v14  ;;  %v993_v49 = vld [vmem:[%s1430_s0 + $0x34] sm:$0xf0]  ;;  %v991_v50 = vld [vmem:[%s1430_s0 + $0x2c] sm:$0xf]  ;;  %v758_v51 = vld [vmem:[%s1430_s0 + $0x38] sm:$0xf0]  ;;  %v753_v53 = vor.u32 %v990_v46, %v750_v47 }
  0x11   :  { %616 = vmatpush.bf16.msra.mxu3 %v1046_v15  ;;  %v757_v54 = vor.u32 %v993_v49, %v756_v48  ;;  %v761_v55 = vor.u32 %v991_v50, %v758_v51  ;;  %v764_v56 = vld [vmem:[%s1430_s0 + $0x40] sm:$0xf]  ;;  %v996_v57 = vld [vmem:[%s1430_s0 + $0x4c] sm:$0xf0]  ;;  %v994_v58 = vld [vmem:[%s1430_s0 + $0x44] sm:$0xf] }
  0x12   :  { %470 = vmatpush.bf16.msra.mxu0 %v1021_v16  ;;  %v766_v59 = vld [vmem:[%s1430_s0 + $0x50] sm:$0xf0]  ;;  %v772_v60 = vld [vmem:[%s1430_s0 + $0x48] sm:$0xf]  ;;  %v997_v61 = vld [vmem:[%s1430_s0 + $0x54] sm:$0xf0]  ;;  %v765_v0 = vor.u32 %v996_v57, %v764_v56 }
  0x13   :  { %519 = vmatpush.bf16.msra.mxu1 %v1029_v17  ;;  %v995_v62 = vld [vmem:[%s1430_s0 + $0x4c] sm:$0xf]  ;;  %v774_v63 = vld [vmem:[%s1430_s0 + $0x58] sm:$0xf0]  ;;  %v769_v1 = vor.u32 %v994_v58, %v766_v59  ;;  %v773_v2 = vor.u32 %v997_v61, %v772_v60  ;;  %v780_v4 = vld [vmem:[%s1430_s0 + $0x60] sm:$0xf] }
  0x14   :  { %568 = vmatpush.bf16.msra.mxu2 %v1037_v18  ;;  %v777_v3 = vor.u32 %v995_v62, %v774_v63  ;;  %v1000_v5 = vld [vmem:[%s1430_s0 + $0x6c] sm:$0xf0]  ;;  %v998_v6 = vld [vmem:[%s1430_s0 + $0x64] sm:$0xf]  ;;  %v782_v7 = vld [vmem:[%s1430_s0 + $0x70] sm:$0xf0] }
  0x15   :  { %617 = vmatpush.bf16.msra.mxu3 %v1045_v19  ;;  %v788_v8 = vld [vmem:[%s1430_s0 + $0x68] sm:$0xf]  ;;  %v1001_v9 = vld [vmem:[%s1430_s0 + $0x74] sm:$0xf0]  ;;  %v999_v10 = vld [vmem:[%s1430_s0 + $0x6c] sm:$0xf]  ;;  %v781_v12 = vor.u32 %v1000_v5, %v780_v4  ;;  %v785_v13 = vor.u32 %v998_v6, %v782_v7 }
  0x16   :  { %471 = vmatpush.bf16.msra.mxu0 %v1020_v20  ;;  %v790_v11 = vld [vmem:[%s1430_s0 + $0x78] sm:$0xf0]  ;;  %v789_v14 = vor.u32 %v1001_v9, %v788_v8  ;;  %v796_v16 = vld [vmem:[%s1430_s0 + $0x80] sm:$0xf]  ;;  %v1004_v17 = vld [vmem:[%s1430_s0 + $0x8c] sm:$0xf0] }
  0x17   :  { %520 = vmatpush.bf16.msra.mxu1 %v1028_v21  ;;  %v793_v15 = vor.u32 %v999_v10, %v790_v11  ;;  %v1002_v18 = vld [vmem:[%s1430_s0 + $0x84] sm:$0xf]  ;;  %v798_v19 = vld [vmem:[%s1430_s0 + $0x90] sm:$0xf0]  ;;  %v804_v20 = vld [vmem:[%s1430_s0 + $0x88] sm:$0xf] }
  0x18   :  { %569 = vmatpush.bf16.msra.mxu2 %v1036_v22  ;;  %v1005_v21 = vld [vmem:[%s1430_s0 + $0x94] sm:$0xf0]  ;;  %v1003_v22 = vld [vmem:[%s1430_s0 + $0x8c] sm:$0xf]  ;;  %v820_v32 = vld [vmem:[%s1430_s0 + $0xa8] sm:$0xf] }
  0x19   :  { %618 = vmatpush.bf16.msra.mxu3 %v1044_v23  ;;  %v806_v23 = vld [vmem:[%s1430_s0 + $0x98] sm:$0xf0]  ;;  %v1009_v33 = vld [vmem:[%s1430_s0 + $0xb4] sm:$0xf0]  ;;  %v1007_v34 = vld [vmem:[%s1430_s0 + $0xac] sm:$0xf] }
  0x1a   :  { %472 = vmatpush.bf16.msra.mxu0 %v1019_v24  ;;  %v797_v24 = vor.u32 %v1004_v17, %v796_v16  ;;  %v822_v35 = vld [vmem:[%s1430_s0 + $0xb8] sm:$0xf0]  ;;  %v821_v38 = vor.u32 %v1009_v33, %v820_v32  ;;  %v836_v44 = vld [vmem:[%s1430_s0 + $0xc8] sm:$0xf]  ;;  %v1013_v45 = vld [vmem:[%s1430_s0 + $0xd4] sm:$0xf0] }
  0x1b   :  { %521 = vmatpush.bf16.msra.mxu1 %v1027_v25  ;;  %v801_v25 = vor.u32 %v1002_v18, %v798_v19  ;;  %v825_v39 = vor.u32 %v1007_v34, %v822_v35  ;;  %v1011_v46 = vld [vmem:[%s1430_s0 + $0xcc] sm:$0xf]  ;;  %v838_v47 = vld [vmem:[%s1430_s0 + $0xd8] sm:$0xf0]  ;;  %v837_v50 = vor.u32 %v1013_v45, %v836_v44  ;;  %v852_v56 = vld [vmem:[%s1430_s0 + $0xe8] sm:$0xf] }
  0x1c   :  { %570 = vmatpush.bf16.msra.mxu2 %v1035_v26  ;;  %v805_v26 = vor.u32 %v1005_v21, %v804_v20  ;;  %v841_v51 = vor.u32 %v1011_v46, %v838_v47  ;;  %v1017_v57 = vld [vmem:[%s1430_s0 + $0xf4] sm:$0xf0]  ;;  %v1015_v58 = vld [vmem:[%s1430_s0 + $0xec] sm:$0xf]  ;;  %v854_v59 = vld [vmem:[%s1430_s0 + $0xf8] sm:$0xf0] }
  0x1d   :  { %619 = vmatpush.bf16.msra.mxu3 %v1043_v27  ;;  %v809_v27 = vor.u32 %v1003_v22, %v806_v23  ;;  %v853_v62 = vor.u32 %v1017_v57, %v852_v56  ;;  %v857_v63 = vor.u32 %v1015_v58, %v854_v59 }
  0x1e   :  { %473 = vmatpush.bf16.msra.mxu0 %v1018_v28  ;;  %v812_v28 = vld [vmem:[%s1430_s0 + $0xa0] sm:$0xf] }
  0x1f   :  { %522 = vmatpush.bf16.msra.mxu1 %v1026_v29  ;;  %v1008_v29 = vld [vmem:[%s1430_s0 + $0xac] sm:$0xf0] }
  0x20   :  { %571 = vmatpush.bf16.msra.mxu2 %v1034_v30  ;;  %v1006_v30 = vld [vmem:[%s1430_s0 + $0xa4] sm:$0xf]  ;;  %v813_v36 = vor.u32 %v1008_v29, %v812_v28 }
  0x21   :  { %620 = vmatpush.bf16.msra.mxu3 %v1042_v31  ;;  %474 = vmatmul.bf16.vlgmr.msra.gmra.mxu0 %v733_v40  ;;  %v814_v31 = vld [vmem:[%s1430_s0 + $0xb0] sm:$0xf0]  ;;  %v828_v40 = vld [vmem:[%s1430_s0 + $0xc0] sm:$0xf] }
  0x22   :  { %523 = vmatmul.bf16.vlgmr.msra.gmra.mxu1 %v737_v41  ;;  %v817_v37 = vor.u32 %v1006_v30, %v814_v31  ;;  %v1012_v41 = vld [vmem:[%s1430_s0 + $0xcc] sm:$0xf0] }
  0x23   :  { %572 = vmatmul.bf16.vlgmr.msra.gmra.mxu2 %v741_v42  ;;  %v1010_v42 = vld [vmem:[%s1430_s0 + $0xc4] sm:$0xf]  ;;  %v829_v48 = vor.u32 %v1012_v41, %v828_v40 }
  0x24   :  { %621 = vmatmul.bf16.vlgmr.msra.gmra.mxu3 %v745_v43  ;;  %v830_v43 = vld [vmem:[%s1430_s0 + $0xd0] sm:$0xf0] }
  0x25   :  { %v833_v49 = vor.u32 %v1010_v42, %v830_v43 }
  0x31   :  { %479 = vmatmul.bf16.gmra.mxu0 %v749_v52  ;;  %v844_v52 = vld [vmem:[%s1430_s0 + $0xe0] sm:$0xf] }
  0x32   :  { %528 = vmatmul.bf16.gmra.mxu1 %v753_v53  ;;  %v1016_v53 = vld [vmem:[%s1430_s0 + $0xec] sm:$0xf0] }
  0x33   :  { %577 = vmatmul.bf16.gmra.mxu2 %v757_v54  ;;  %v1014_v54 = vld [vmem:[%s1430_s0 + $0xe4] sm:$0xf]  ;;  %v845_v60 = vor.u32 %v1016_v53, %v844_v52 }
  0x34   :  { %626 = vmatmul.bf16.gmra.mxu3 %v761_v55  ;;  %v846_v55 = vld [vmem:[%s1430_s0 + $0xf0] sm:$0xf0] }
  0x35   :  { %v849_v61 = vor.u32 %v1014_v54, %v846_v55 }
  0x41   :  { %484 = vmatmul.bf16.gmra.mxu0 %v765_v0  ;;  %v1362_v0 = vld [vmem:[%s1429_s2] ss:$0 sm:$0xff] }
  0x42   :  { %533 = vmatmul.bf16.gmra.mxu1 %v769_v1 }
  0x43   :  { %582 = vmatmul.bf16.gmra.mxu2 %v773_v2 }
  0x44   :  { %631 = vmatmul.bf16.gmra.mxu3 %v777_v3 }
  0x51   :  { %489 = vmatmul.bf16.gmra.mxu0 %v781_v12 }
  0x52   :  { %538 = vmatmul.bf16.gmra.mxu1 %v785_v13 }
  0x53   :  { %587 = vmatmul.bf16.gmra.mxu2 %v789_v14 }
  0x54   :  { %636 = vmatmul.bf16.gmra.mxu3 %v793_v15 }
  0x61   :  { %494 = vmatmul.bf16.gmra.mxu0 %v797_v24 }
  0x62   :  { %543 = vmatmul.bf16.gmra.mxu1 %v801_v25 }
  0x63   :  { %592 = vmatmul.bf16.gmra.mxu2 %v805_v26 }
  0x64   :  { %641 = vmatmul.bf16.gmra.mxu3 %v809_v27 }
  0x71   :  { %499 = vmatmul.bf16.gmra.mxu0 %v813_v36 }
  0x72   :  { %548 = vmatmul.bf16.gmra.mxu1 %v817_v37 }
  0x73   :  { %597 = vmatmul.bf16.gmra.mxu2 %v821_v38 }
  0x74   :  { %646 = vmatmul.bf16.gmra.mxu3 %v825_v39 }
  0x81   :  { %504 = vmatmul.bf16.gmra.mxu0 %v829_v48 }
  0x82   :  { %553 = vmatmul.bf16.gmra.mxu1 %v833_v49 }
  0x83   :  { %602 = vmatmul.bf16.gmra.mxu2 %v837_v50 }
  0x84   :  { %651 = vmatmul.bf16.gmra.mxu3 %v841_v51 }
  0x91   :  { %509 = vmatmul.bf16.gmra.mxu0 %v845_v60 }
  0x92   :  { %558 = vmatmul.bf16.gmra.mxu1 %v849_v61 }
  0x93   :  { %607 = vmatmul.bf16.gmra.mxu2 %v853_v62 }
  0x94   :  { %656 = vmatmul.bf16.gmra.mxu3 %v857_v63 }
  0x9e   :  { %v475_v1 = vpop.f32.mrf.mxu0 }
  0x9f   :  { %v524_v2 = vpop.f32.mrf.mxu1  ;;  %v476_v3 = vadd.f32 %v1362_v0, %v475_v1 }
  0xa1   :  { %v525_v4 = vadd.f32 %v524_v2, %v476_v3 }
  0xa6   :  { %v573_v5 = vpop.f32.mrf.mxu2  ;;  %v477_v8 = vpop.f32.mrf.mxu0 }
  0xa7   :  { %v622_v6 = vpop.f32.mrf.mxu3  ;;  %v574_v7 = vadd.f32 %v573_v5, %v525_v4  ;;  %v526_v9 = vpop.f32.mrf.mxu1  ;;  %v478_v11 = vadd.f32 %v1362_v0, %v477_v8 }
  0xa9   :  { %v623_v10 = vadd.f32 %v622_v6, %v574_v7  ;;  %v527_v14 = vadd.f32 %v526_v9, %v478_v11 }
  0xab   :  { %vm662_vm0 = vcmp.ge.f32.partialorder %v623_v10, 0.0  ;;  %v678_v12 = vmul.f32 0.01, %v623_v10 }
  0xad   :  { %v694_v13 = vsel %vm662_vm0, %v623_v10, %v678_v12 }
  0xae   :  { %710 = vst [vmem:[%s1431_s3] sm:$0xff] %v694_v13  ;;  %v575_v15 = vpop.f32.mrf.mxu2  ;;  %v480_v18 = vpop.f32.mrf.mxu0 }
  0xaf   :  { %v624_v16 = vpop.f32.mrf.mxu3  ;;  %v576_v17 = vadd.f32 %v575_v15, %v527_v14  ;;  %v529_v19 = vpop.f32.mrf.mxu1  ;;  %v481_v20 = vadd.f32 %v1362_v0, %v480_v18 }
  0xb1   :  { %v625_v21 = vadd.f32 %v624_v16, %v576_v17  ;;  %v530_v23 = vadd.f32 %v529_v19, %v481_v20 }
  0xb3   :  { %vm663_vm1 = vcmp.ge.f32.partialorder %v625_v21, 0.0  ;;  %v679_v22 = vmul.f32 0.01, %v625_v21 }
  0xb5   :  { %v695_v24 = vsel %vm663_vm1, %v625_v21, %v679_v22 }
  0xb6   :  { %711 = vst [vmem:[%s1431_s3 + $0x8] sm:$0xff] %v695_v24  ;;  %v578_v25 = vpop.f32.mrf.mxu2  ;;  %v482_v28 = vpop.f32.mrf.mxu0 }
  0xb7   :  { %v627_v26 = vpop.f32.mrf.mxu3  ;;  %v579_v27 = vadd.f32 %v578_v25, %v530_v23  ;;  %v531_v29 = vpop.f32.mrf.mxu1  ;;  %v483_v31 = vadd.f32 %v1362_v0, %v482_v28 }
  0xb9   :  { %v628_v30 = vadd.f32 %v627_v26, %v579_v27  ;;  %v532_v34 = vadd.f32 %v531_v29, %v483_v31 }
  0xbb   :  { %vm664_vm2 = vcmp.ge.f32.partialorder %v628_v30, 0.0  ;;  %v680_v32 = vmul.f32 0.01, %v628_v30 }
  0xbd   :  { %v696_v33 = vsel %vm664_vm2, %v628_v30, %v680_v32 }
  0xbe   :  { %712 = vst [vmem:[%s1431_s3 + $0x10] sm:$0xff] %v696_v33  ;;  %v580_v35 = vpop.f32.mrf.mxu2  ;;  %v485_v38 = vpop.f32.mrf.mxu0 }
  0xbf   :  { %v629_v36 = vpop.f32.mrf.mxu3  ;;  %v581_v37 = vadd.f32 %v580_v35, %v532_v34  ;;  %v534_v39 = vpop.f32.mrf.mxu1  ;;  %v486_v40 = vadd.f32 %v1362_v0, %v485_v38 }
  0xc1   :  { %v630_v41 = vadd.f32 %v629_v36, %v581_v37  ;;  %v535_v43 = vadd.f32 %v534_v39, %v486_v40 }
  0xc3   :  { %vm665_vm3 = vcmp.ge.f32.partialorder %v630_v41, 0.0  ;;  %v681_v42 = vmul.f32 0.01, %v630_v41 }
  0xc5   :  { %v697_v44 = vsel %vm665_vm3, %v630_v41, %v681_v42 }
  0xc6   :  { %713 = vst [vmem:[%s1431_s3 + $0x18] sm:$0xff] %v697_v44  ;;  %v583_v45 = vpop.f32.mrf.mxu2  ;;  %v487_v48 = vpop.f32.mrf.mxu0 }
  0xc7   :  { %v632_v46 = vpop.f32.mrf.mxu3  ;;  %v584_v47 = vadd.f32 %v583_v45, %v535_v43  ;;  %v536_v49 = vpop.f32.mrf.mxu1  ;;  %v488_v51 = vadd.f32 %v1362_v0, %v487_v48 }
  0xc9   :  { %v633_v50 = vadd.f32 %v632_v46, %v584_v47  ;;  %v537_v54 = vadd.f32 %v536_v49, %v488_v51 }
  0xcb   :  { %vm666_vm4 = vcmp.ge.f32.partialorder %v633_v50, 0.0  ;;  %v682_v52 = vmul.f32 0.01, %v633_v50 }
  0xcd   :  { %v698_v53 = vsel %vm666_vm4, %v633_v50, %v682_v52 }
  0xce   :  { %714 = vst [vmem:[%s1431_s3 + $0x20] sm:$0xff] %v698_v53  ;;  %v585_v55 = vpop.f32.mrf.mxu2  ;;  %v490_v58 = vpop.f32.mrf.mxu0 }
  0xcf   :  { %v634_v56 = vpop.f32.mrf.mxu3  ;;  %v586_v57 = vadd.f32 %v585_v55, %v537_v54  ;;  %v539_v59 = vpop.f32.mrf.mxu1  ;;  %v491_v60 = vadd.f32 %v1362_v0, %v490_v58 }
  0xd1   :  { %v635_v61 = vadd.f32 %v634_v56, %v586_v57  ;;  %v540_v63 = vadd.f32 %v539_v59, %v491_v60 }
  0xd3   :  { %vm667_vm5 = vcmp.ge.f32.partialorder %v635_v61, 0.0  ;;  %v683_v62 = vmul.f32 0.01, %v635_v61 }
  0xd5   :  { %v699_v1 = vsel %vm667_vm5, %v635_v61, %v683_v62 }
  0xd6   :  { %715 = vst [vmem:[%s1431_s3 + $0x28] sm:$0xff] %v699_v1  ;;  %v588_v2 = vpop.f32.mrf.mxu2  ;;  %v492_v5 = vpop.f32.mrf.mxu0 }
  0xd7   :  { %v637_v3 = vpop.f32.mrf.mxu3  ;;  %v589_v4 = vadd.f32 %v588_v2, %v540_v63  ;;  %v541_v6 = vpop.f32.mrf.mxu1  ;;  %v493_v8 = vadd.f32 %v1362_v0, %v492_v5 }
  0xd9   :  { %v638_v7 = vadd.f32 %v637_v3, %v589_v4  ;;  %v542_v11 = vadd.f32 %v541_v6, %v493_v8 }
  0xdb   :  { %vm668_vm6 = vcmp.ge.f32.partialorder %v638_v7, 0.0  ;;  %v684_v9 = vmul.f32 0.01, %v638_v7 }
  0xdd   :  { %v700_v10 = vsel %vm668_vm6, %v638_v7, %v684_v9 }
  0xde   :  { %716 = vst [vmem:[%s1431_s3 + $0x30] sm:$0xff] %v700_v10  ;;  %v590_v12 = vpop.f32.mrf.mxu2  ;;  %v495_v15 = vpop.f32.mrf.mxu0 }
  0xdf   :  { %v639_v13 = vpop.f32.mrf.mxu3  ;;  %v591_v14 = vadd.f32 %v590_v12, %v542_v11  ;;  %v544_v16 = vpop.f32.mrf.mxu1  ;;  %v496_v17 = vadd.f32 %v1362_v0, %v495_v15 }
  0xe1   :  { %v640_v18 = vadd.f32 %v639_v13, %v591_v14  ;;  %v545_v20 = vadd.f32 %v544_v16, %v496_v17 }
  0xe3   :  { %vm669_vm7 = vcmp.ge.f32.partialorder %v640_v18, 0.0  ;;  %v685_v19 = vmul.f32 0.01, %v640_v18 }
  0xe5   :  { %v701_v21 = vsel %vm669_vm7, %v640_v18, %v685_v19 }
  0xe6   :  { %717 = vst [vmem:[%s1431_s3 + $0x38] sm:$0xff] %v701_v21  ;;  %v593_v22 = vpop.f32.mrf.mxu2  ;;  %v497_v25 = vpop.f32.mrf.mxu0 }
  0xe7   :  { %v642_v23 = vpop.f32.mrf.mxu3  ;;  %v594_v24 = vadd.f32 %v593_v22, %v545_v20  ;;  %v546_v26 = vpop.f32.mrf.mxu1  ;;  %v498_v28 = vadd.f32 %v1362_v0, %v497_v25 }
  0xe9   :  { %v643_v27 = vadd.f32 %v642_v23, %v594_v24  ;;  %v547_v31 = vadd.f32 %v546_v26, %v498_v28 }
  0xeb   :  { %vm670_vm8 = vcmp.ge.f32.partialorder %v643_v27, 0.0  ;;  %v686_v29 = vmul.f32 0.01, %v643_v27 }
  0xed   :  { %v702_v30 = vsel %vm670_vm8, %v643_v27, %v686_v29 }
  0xee   :  { %718 = vst [vmem:[%s1431_s3 + $0x40] sm:$0xff] %v702_v30  ;;  %v595_v32 = vpop.f32.mrf.mxu2  ;;  %v500_v35 = vpop.f32.mrf.mxu0 }
  0xef   :  { %v644_v33 = vpop.f32.mrf.mxu3  ;;  %v596_v34 = vadd.f32 %v595_v32, %v547_v31  ;;  %v549_v36 = vpop.f32.mrf.mxu1  ;;  %v501_v37 = vadd.f32 %v1362_v0, %v500_v35 }
  0xf1   :  { %v645_v38 = vadd.f32 %v644_v33, %v596_v34  ;;  %v550_v40 = vadd.f32 %v549_v36, %v501_v37 }
  0xf3   :  { %vm671_vm9 = vcmp.ge.f32.partialorder %v645_v38, 0.0  ;;  %v687_v39 = vmul.f32 0.01, %v645_v38 }
  0xf5   :  { %v703_v41 = vsel %vm671_vm9, %v645_v38, %v687_v39 }
  0xf6   :  { %719 = vst [vmem:[%s1431_s3 + $0x48] sm:$0xff] %v703_v41  ;;  %v598_v42 = vpop.f32.mrf.mxu2  ;;  %v502_v45 = vpop.f32.mrf.mxu0 }
  0xf7   :  { %v647_v43 = vpop.f32.mrf.mxu3  ;;  %v599_v44 = vadd.f32 %v598_v42, %v550_v40  ;;  %v551_v46 = vpop.f32.mrf.mxu1  ;;  %v503_v48 = vadd.f32 %v1362_v0, %v502_v45 }
  0xf9   :  { %v648_v47 = vadd.f32 %v647_v43, %v599_v44  ;;  %v552_v51 = vadd.f32 %v551_v46, %v503_v48 }
  0xfb   :  { %vm672_vm10 = vcmp.ge.f32.partialorder %v648_v47, 0.0  ;;  %v688_v49 = vmul.f32 0.01, %v648_v47 }
  0xfd   :  { %v704_v50 = vsel %vm672_vm10, %v648_v47, %v688_v49 }
  0xfe   :  { %720 = vst [vmem:[%s1431_s3 + $0x50] sm:$0xff] %v704_v50  ;;  %v600_v52 = vpop.f32.mrf.mxu2  ;;  %v505_v55 = vpop.f32.mrf.mxu0 }
  0xff   :  { %v649_v53 = vpop.f32.mrf.mxu3  ;;  %v601_v54 = vadd.f32 %v600_v52, %v552_v51  ;;  %v554_v56 = vpop.f32.mrf.mxu1  ;;  %v506_v57 = vadd.f32 %v1362_v0, %v505_v55 }
 0x101   :  { %v650_v58 = vadd.f32 %v649_v53, %v601_v54  ;;  %v555_v60 = vadd.f32 %v554_v56, %v506_v57 }
 0x103   :  { %vm673_vm11 = vcmp.ge.f32.partialorder %v650_v58, 0.0  ;;  %v689_v59 = vmul.f32 0.01, %v650_v58 }
 0x105   :  { %v705_v61 = vsel %vm673_vm11, %v650_v58, %v689_v59 }
 0x106   :  { %721 = vst [vmem:[%s1431_s3 + $0x58] sm:$0xff] %v705_v61  ;;  %v603_v62 = vpop.f32.mrf.mxu2  ;;  %v507_v2 = vpop.f32.mrf.mxu0 }
 0x107   :  { %v652_v63 = vpop.f32.mrf.mxu3  ;;  %v604_v1 = vadd.f32 %v603_v62, %v555_v60  ;;  %v556_v3 = vpop.f32.mrf.mxu1  ;;  %v508_v5 = vadd.f32 %v1362_v0, %v507_v2 }
 0x109   :  { %v653_v4 = vadd.f32 %v652_v63, %v604_v1  ;;  %v557_v8 = vadd.f32 %v556_v3, %v508_v5 }
 0x10b   :  { %vm674_vm12 = vcmp.ge.f32.partialorder %v653_v4, 0.0  ;;  %v690_v6 = vmul.f32 0.01, %v653_v4 }
 0x10d   :  { %v706_v7 = vsel %vm674_vm12, %v653_v4, %v690_v6 }
 0x10e   :  { %722 = vst [vmem:[%s1431_s3 + $0x60] sm:$0xff] %v706_v7  ;;  %v605_v9 = vpop.f32.mrf.mxu2  ;;  %v510_v12 = vpop.f32.mrf.mxu0 }
 0x10f   :  { %v654_v10 = vpop.f32.mrf.mxu3  ;;  %v606_v11 = vadd.f32 %v605_v9, %v557_v8  ;;  %v511_v13 = vadd.f32 %v1362_v0, %v510_v12  ;;  %v559_v15 = vpop.f32.mrf.mxu1 }
 0x111   :  { %v655_v14 = vadd.f32 %v654_v10, %v606_v11  ;;  %v560_v17 = vadd.f32 %v559_v15, %v511_v13 }
 0x113   :  { %vm675_vm13 = vcmp.ge.f32.partialorder %v655_v14, 0.0  ;;  %v691_v16 = vmul.f32 0.01, %v655_v14 }
 0x115   :  { %v707_v18 = vsel %vm675_vm13, %v655_v14, %v691_v16 }
 0x116   :  { %723 = vst [vmem:[%s1431_s3 + $0x68] sm:$0xff] %v707_v18  ;;  %v608_v19 = vpop.f32.mrf.mxu2  ;;  %v512_v22 = vpop.f32.mrf.mxu0 }
 0x117   :  { %v657_v20 = vpop.f32.mrf.mxu3  ;;  %v609_v21 = vadd.f32 %v608_v19, %v560_v17  ;;  %v513_v24 = vadd.f32 %v1362_v0, %v512_v22  ;;  %v561_v26 = vpop.f32.mrf.mxu1 }
 0x119   :  { %v658_v23 = vadd.f32 %v657_v20, %v609_v21  ;;  %v562_v28 = vadd.f32 %v561_v26, %v513_v24 }
 0x11b   :  { %vm676_vm14 = vcmp.ge.f32.partialorder %v658_v23, 0.0  ;;  %v692_v25 = vmul.f32 0.01, %v658_v23 }
 0x11d   :  { %v708_v27 = vsel %vm676_vm14, %v658_v23, %v692_v25 }
 0x11e   :  { %724 = vst [vmem:[%s1431_s3 + $0x70] sm:$0xff] %v708_v27  ;;  %v610_v29 = vpop.f32.mrf.mxu2 }
 0x11f   :  { %v611_v30 = vadd.f32 %v610_v29, %v562_v28  ;;  %v659_v31 = vpop.f32.mrf.mxu3 }
 0x121   :  { %v660_v32 = vadd.f32 %v659_v31, %v611_v30 }
 0x123   :  { %vm677_vm15 = vcmp.ge.f32.partialorder %v660_v32, 0.0  ;;  %v693_v33 = vmul.f32 0.01, %v660_v32 }
 0x125   :  { %v709_v34 = vsel %vm677_vm15, %v660_v32, %v693_v33 }
 0x126   :  { %725 = vst [vmem:[%s1431_s3 + $0x78] sm:$0xff] %v709_v34 }

</bundles_post_ra>
